<compile_context>
chip_gen: v5e
topology: v5e:2x2
jax: 0.10.0
libtpu: 0.0.40
codegen_flags: <defaults>
</compile_context>

<pallas_src>
import functools

import jax
import jax.numpy as jnp
from jax.experimental import pallas as pl
from jax.experimental.pallas import tpu as pltpu


_VMEM_LIMIT_BYTES = 32 * 1024 * 1024      # within v7x's 64 MiB physical VMEM
_COMPUTE_DTYPE = jnp.bfloat16             # MXU operands / stored activations
_BN_EPS = 1e-3                            # tf_efficientnet BN eps


def _compiler_params():
    return pltpu.CompilerParams(
        dimension_semantics=("parallel",),
        vmem_limit_bytes=_VMEM_LIMIT_BYTES)


def _pick_tile_m(m):
    """Largest M-tile (multiple of 8, <=512 rows) dividing M that still leaves
    >=2 grid steps (so both v7x TensorCores get work); falls back to M."""
    for t in (512, 256, 128, 64, 32, 16, 8):
        if m % t == 0 and m // t >= 2:
            return t
    return m


# ----------------------------------------------------------------------------
# Pallas kernels
# ----------------------------------------------------------------------------
def _mm_bn_act_kernel(x_ref, w_ref, scale_ref, shift_ref, o_ref, *, act):
    """Fused 1x1-conv-as-matmul + folded BatchNorm + optional SiLU (one M tile)."""
    y = jnp.dot(x_ref[...], w_ref[...], preferred_element_type=jnp.float32)
    y = y * scale_ref[...] + shift_ref[...]
    if act == "silu":
        y = y * jax.nn.sigmoid(y)
    o_ref[...] = y.astype(o_ref.dtype)


def _mm_bn_res_kernel(x_ref, w_ref, scale_ref, shift_ref, res_ref, o_ref):
    """Fused projection matmul + BN + residual add (MBConv shortcut)."""
    y = jnp.dot(x_ref[...], w_ref[...], preferred_element_type=jnp.float32)
    y = y * scale_ref[...] + shift_ref[...] + res_ref[...].astype(jnp.float32)
    o_ref[...] = y.astype(o_ref.dtype)


def _mm_dual_kernel(x_ref, w_ref, o_ref, o_act_ref):
    """conv_head matmul emitting both the raw output (== bn2 Identity feature)
    and its SiLU (act2 feature) in a single pass."""
    y = jnp.dot(x_ref[...], w_ref[...], preferred_element_type=jnp.float32)
    o_ref[...] = y.astype(o_ref.dtype)
    o_act_ref[...] = (y * jax.nn.sigmoid(y)).astype(o_act_ref.dtype)


def _stem_kernel(x_ref, w_ref, scale_ref, shift_ref,
                 o_conv_ref, o_bn_ref, o_act_ref):
    """Fused conv_stem (3x3 stride-2, TF-SAME) + bn1 + act1 for one batch elem.

    The stride-2 conv is evaluated on a space-to-depth block
    [1, Ho+1, Wo+1, 4*Cin] as four shifted (Ho*Wo, 4*Cin) @ (4*Cin, Cout)
    MXU matmuls -- no im2col matrix is ever materialized in HBM.
    """
    _, ho, wo, cout = o_conv_ref.shape
    x = x_ref[0]                                       # (Ho+1, Wo+1, 4*Cin)
    cs = x.shape[-1]
    acc = jnp.zeros((ho * wo, cout), jnp.float32)
    for t, (a, b) in enumerate(((0, 0), (0, 1), (1, 0), (1, 1))):
        xs = x[a:a + ho, b:b + wo, :].reshape(ho * wo, cs)
        acc = acc + jnp.dot(xs, w_ref[t], preferred_element_type=jnp.float32)
    conv = acc.reshape(ho, wo, cout)
    o_conv_ref[0] = conv.astype(o_conv_ref.dtype)
    bn = conv * scale_ref[0] + shift_ref[0]
    o_bn_ref[0] = bn.astype(o_bn_ref.dtype)
    o_act_ref[0] = (bn * jax.nn.sigmoid(bn)).astype(o_act_ref.dtype)


def _dw_s1_kernel(x_ref, w_ref, scale_ref, shift_ref, o_ref, xpad_ref):
    """Depthwise 3x3 stride-1 (SAME) + BN + SiLU for one batch element.
    Zero-padding happens into a VMEM scratch (no HBM pad pass)."""
    _, h, w, c = o_ref.shape
    xpad_ref[...] = jnp.zeros_like(xpad_ref)
    xpad_ref[1:1 + h, 1:1 + w, :] = x_ref[0]
    acc = jnp.zeros((h, w, c), jnp.float32)
    for kh in range(3):
        for kw in range(3):
            tap = xpad_ref[kh:kh + h, kw:kw + w, :].astype(jnp.float32)
            acc = acc + tap * w_ref[kh * 3 + kw, :].astype(jnp.float32)
    y = acc * scale_ref[0] + shift_ref[0]
    y = y * jax.nn.sigmoid(y)
    o_ref[0] = y.astype(o_ref.dtype)


def _dw_s2_kernel(x_ref, w_ref, scale_ref, shift_ref, o_ref):
    """Depthwise 3x3 stride-2 (TF-SAME) + BN + SiLU on a space-to-depth input:
    only the Ho x Wo required outputs are computed (4x less VPU work than a
    full-resolution conv followed by ::2 subsampling)."""
    _, ho, wo, c = o_ref.shape
    x = x_ref[0]                                       # (Ho+1, Wo+1, 4*C)
    acc = jnp.zeros((ho, wo, c), jnp.float32)
    for kh in range(3):
        for kw in range(3):
            a, dy = kh // 2, kh % 2
            b, dx = kw // 2, kw % 2
            g = dy * 2 + dx
            tap = x[a:a + ho, b:b + wo, g * c:(g + 1) * c].astype(jnp.float32)
            acc = acc + tap * w_ref[kh * 3 + kw, :].astype(jnp.float32)
    y = acc * scale_ref[0] + shift_ref[0]
    y = y * jax.nn.sigmoid(y)
    o_ref[0] = y.astype(o_ref.dtype)


# ----------------------------------------------------------------------------
# Pallas wrappers
# ----------------------------------------------------------------------------
def matmul_bn_act(x2d, w, scale, shift, act="none"):
    m, k = x2d.shape
    n = w.shape[1]
    tm = _pick_tile_m(m)
    return pl.pallas_call(
        functools.partial(_mm_bn_act_kernel, act=act),
        out_shape=jax.ShapeDtypeStruct((m, n), x2d.dtype),
        grid=(m // tm,),
        in_specs=[
            pl.BlockSpec((tm, k), lambda i: (i, 0)),
            pl.BlockSpec((k, n), lambda i: (0, 0)),
            pl.BlockSpec((1, n), lambda i: (0, 0)),
            pl.BlockSpec((1, n), lambda i: (0, 0)),
        ],
        out_specs=pl.BlockSpec((tm, n), lambda i: (i, 0)),
        compiler_params=_compiler_params(),
    )(x2d, w, scale, shift)


def matmul_bn_residual(x2d, w, scale, shift, res2d):
    m, k = x2d.shape
    n = w.shape[1]
    tm = _pick_tile_m(m)
    return pl.pallas_call(
        _mm_bn_res_kernel,
        out_shape=jax.ShapeDtypeStruct((m, n), x2d.dtype),
        grid=(m // tm,),
        in_specs=[
            pl.BlockSpec((tm, k), lambda i: (i, 0)),
            pl.BlockSpec((k, n), lambda i: (0, 0)),
            pl.BlockSpec((1, n), lambda i: (0, 0)),
            pl.BlockSpec((1, n), lambda i: (0, 0)),
            pl.BlockSpec((tm, n), lambda i: (i, 0)),
        ],
        out_specs=pl.BlockSpec((tm, n), lambda i: (i, 0)),
        compiler_params=_compiler_params(),
    )(x2d, w, scale, shift, res2d)


def matmul_dual_act(x2d, w):
    m, k = x2d.shape
    n = w.shape[1]
    tm = _pick_tile_m(m)
    out_sds = jax.ShapeDtypeStruct((m, n), x2d.dtype)
    return pl.pallas_call(
        _mm_dual_kernel,
        out_shape=(out_sds, out_sds),
        grid=(m // tm,),
        in_specs=[
            pl.BlockSpec((tm, k), lambda i: (i, 0)),
            pl.BlockSpec((k, n), lambda i: (0, 0)),
        ],
        out_specs=(pl.BlockSpec((tm, n), lambda i: (i, 0)),
                   pl.BlockSpec((tm, n), lambda i: (i, 0))),
        compiler_params=_compiler_params(),
    )(x2d, w)


def stem_bn_act(x_s2d, w_s2d, scale, shift, out_ch):
    n, hs, ws, cs = x_s2d.shape
    ho, wo = hs - 1, ws - 1
    out_sds = jax.ShapeDtypeStruct((n, ho, wo, out_ch), x_s2d.dtype)
    return pl.pallas_call(
        _stem_kernel,
        out_shape=(out_sds, out_sds, out_sds),
        grid=(n,),
        in_specs=[
            pl.BlockSpec((1, hs, ws, cs), lambda i: (i, 0, 0, 0)),
            pl.BlockSpec((4, cs, out_ch), lambda i: (0, 0, 0)),
            pl.BlockSpec((1, out_ch), lambda i: (0, 0)),
            pl.BlockSpec((1, out_ch), lambda i: (0, 0)),
        ],
        out_specs=tuple(
            pl.BlockSpec((1, ho, wo, out_ch), lambda i: (i, 0, 0, 0))
            for _ in range(3)),
        compiler_params=_compiler_params(),
    )(x_s2d, w_s2d, scale, shift)


def dwconv_s1_bn_act(x, w, scale, shift):
    n, h, wd, c = x.shape
    return pl.pallas_call(
        _dw_s1_kernel,
        out_shape=jax.ShapeDtypeStruct((n, h, wd, c), x.dtype),
        grid=(n,),
        in_specs=[
            pl.BlockSpec((1, h, wd, c), lambda i: (i, 0, 0, 0)),
            pl.BlockSpec((9, c), lambda i: (0, 0)),
            pl.BlockSpec((1, c), lambda i: (0, 0)),
            pl.BlockSpec((1, c), lambda i: (0, 0)),
        ],
        out_specs=pl.BlockSpec((1, h, wd, c), lambda i: (i, 0, 0, 0)),
        scratch_shapes=[pltpu.VMEM((h + 2, wd + 2, c), x.dtype)],
        compiler_params=_compiler_params(),
    )(x, w, scale, shift)


def dwconv_s2_bn_act(x_s2d, w, scale, shift):
    n, hs, ws, c4 = x_s2d.shape
    c = c4 // 4
    ho, wo = hs - 1, ws - 1
    return pl.pallas_call(
        _dw_s2_kernel,
        out_shape=jax.ShapeDtypeStruct((n, ho, wo, c), x_s2d.dtype),
        grid=(n,),
        in_specs=[
            pl.BlockSpec((1, hs, ws, c4), lambda i: (i, 0, 0, 0)),
            pl.BlockSpec((9, c), lambda i: (0, 0)),
            pl.BlockSpec((1, c), lambda i: (0, 0)),
            pl.BlockSpec((1, c), lambda i: (0, 0)),
        ],
        out_specs=pl.BlockSpec((1, ho, wo, c), lambda i: (i, 0, 0, 0)),
        compiler_params=_compiler_params(),
    )(x_s2d, w, scale, shift)


# ----------------------------------------------------------------------------
# Plain-JAX layout glue (single pass; replaces pad + full conv + ::2 gather)
# ----------------------------------------------------------------------------
def _space_to_depth_tf_same(x):
    """NHWC -> [N, H/2+1, W/2+1, 4C] with channel index (dy*2+dx)*C + c and
    TF-SAME (end-only) padding folded in."""
    n, h, w, c = x.shape
    assert h % 2 == 0 and w % 2 == 0
    ho, wo = h // 2, w // 2
    xp = jnp.pad(x, ((0, 0), (0, 2), (0, 2), (0, 0)))
    xp = xp.reshape(n, ho + 1, 2, wo + 1, 2, c).transpose(0, 1, 3, 2, 4, 5)
    return xp.reshape(n, ho + 1, wo + 1, 4 * c)


# ----------------------------------------------------------------------------
# Parameter construction (deterministic, synthetic)
# ----------------------------------------------------------------------------
def _bn_params(key, c):
    kg, kb, km, kv = jax.random.split(key, 4)
    gamma = 1.0 + 0.1 * jax.random.normal(kg, (c,), jnp.float32)
    beta = 0.1 * jax.random.normal(kb, (c,), jnp.float32)
    mean = 0.1 * jax.random.normal(km, (c,), jnp.float32)
    var = 1.0 + 0.1 * jax.random.uniform(kv, (c,), jnp.float32)
    scale = gamma / jnp.sqrt(var + _BN_EPS)
    shift = beta - mean * scale
    return scale.reshape(1, c), shift.reshape(1, c)       # f32 epilogue params


def _conv_w(key, k_in, c_out):
    return (0.1 * jax.random.normal(key, (k_in, c_out), jnp.float32)
            ).astype(_COMPUTE_DTYPE)


def _dw_w(key, c):
    return (0.1 * jax.random.normal(key, (9, c), jnp.float32)
            ).astype(_COMPUTE_DTYPE)


def _stem_w_s2d(key, c_in, c_out):
    """3x3 stride-2 conv weights rearranged to the space-to-depth layout
    [tap=a*2+b, (dy*2+dx)*c_in + c, c_out]; out-of-kernel taps are zero."""
    w9 = 0.1 * jax.random.normal(key, (3, 3, c_in, c_out), jnp.float32)
    w = jnp.zeros((2, 2, 2, 2, c_in, c_out), jnp.float32)
    for a in range(2):
        for b in range(2):
            for dy in range(2):
                for dx in range(2):
                    kh, kw = 2 * a + dy, 2 * b + dx
                    if kh < 3 and kw < 3:
                        w = w.at[a, b, dy, dx].set(w9[kh, kw])
    return w.reshape(4, 4 * c_in, c_out).astype(_COMPUTE_DTYPE)


# ----------------------------------------------------------------------------
# Encoder
# ----------------------------------------------------------------------------
class PallasEncoder:
    """Synthetic EfficientNet-style encoder mirroring Encoder.forward: returns
    [x, conv_stem, bn1, act1, block_0..block_2, conv_head, bn2(Identity),
     act2, global_pool(Identity), classifier(Identity)]  (12 features)."""

    def __init__(self, key, in_ch=3, stem_ch=128, head_ch=128):
        # (expand_ratio, out_ch, stride) -- channels are multiples of 128 so
        # every kernel output is lane-dense (full 128-lane vregs / MXU N dim).
        self.block_cfg = [(1, 128, 1), (2, 128, 2), (2, 128, 2)]
        keys = jax.random.split(key, 8 + 8 * len(self.block_cfg))
        ki = iter(keys)

        self.in_ch = in_ch
        self.stem_ch = stem_ch
        self.w_stem = _stem_w_s2d(next(ki), in_ch, stem_ch)
        self.bn1 = _bn_params(next(ki), stem_ch)

        self.blocks = []
        c_in = stem_ch
        for (exp, c_out, stride) in self.block_cfg:
            p = {}
            c_mid = c_in * exp
            if exp != 1:
                p["w_exp"] = _conv_w(next(ki), c_in, c_mid)
                p["bn_exp"] = _bn_params(next(ki), c_mid)
            p["w_dw"] = _dw_w(next(ki), c_mid)
            p["bn_dw"] = _bn_params(next(ki), c_mid)
            p["w_proj"] = _conv_w(next(ki), c_mid, c_out)
            p["bn_proj"] = _bn_params(next(ki), c_out)
            p["cfg"] = (exp, c_in, c_mid, c_out, stride)
            self.blocks.append(p)
            c_in = c_out

        self.w_head = _conv_w(next(ki), c_in, head_ch)
        self._forward = jax.jit(self._forward_impl)

    # -- one MBConv stage ----------------------------------------------------
    def _mbconv(self, x, p):
        exp, c_in, c_mid, c_out, stride = p["cfg"]
        n, h, w, _ = x.shape
        hidden = x
        if exp != 1:        # expand 1x1 + BN + SiLU (single fused M-tiled call)
            h2d = matmul_bn_act(hidden.reshape(n * h * w, c_in), p["w_exp"],
                                *p["bn_exp"], act="silu")
            hidden = h2d.reshape(n, h, w, c_mid)
        if stride == 1:     # depthwise 3x3 + BN + SiLU (pad in VMEM scratch)
            dw = dwconv_s1_bn_act(hidden, p["w_dw"], *p["bn_dw"])
        else:               # direct stride-2 depthwise on space-to-depth input
            dw = dwconv_s2_bn_act(_space_to_depth_tf_same(hidden),
                                  p["w_dw"], *p["bn_dw"])
        no, ho, wo, _ = dw.shape
        dw2d = dw.reshape(no * ho * wo, c_mid)
        if stride == 1 and c_in == c_out:   # projection + BN + residual, fused
            out2d = matmul_bn_residual(dw2d, p["w_proj"], *p["bn_proj"],
                                       x.reshape(n * h * w, c_in))
        else:
            out2d = matmul_bn_act(dw2d, p["w_proj"], *p["bn_proj"], act="none")
        return out2d.reshape(no, ho, wo, c_out)

    # -- full forward: mirrors Encoder.forward --------------------------------
    def _forward_impl(self, x_nchw):
        x = jnp.transpose(x_nchw, (0, 2, 3, 1)).astype(_COMPUTE_DTYPE)   # NHWC
        feats = [x]
        conv_s, bn1, act1 = stem_bn_act(_space_to_depth_tf_same(x),
                                        self.w_stem, *self.bn1, self.stem_ch)
        feats += [conv_s, bn1, act1]                 # conv_stem, bn1, act1
        for p in self.blocks:                        # one feature per stage
            feats.append(self._mbconv(feats[-1], p))
        last = feats[-1]
        n, h, w, c = last.shape
        head, head_act = matmul_dual_act(last.reshape(n * h * w, c), self.w_head)
        head = head.reshape(n, h, w, -1)
        head_act = head_act.reshape(n, h, w, -1)
        feats.append(head)                           # conv_head
        feats.append(head)                           # bn2 = Identity (rm_bn2)
        feats.append(head_act)                       # act2
        feats.append(head_act)                       # global_pool = Identity
        feats.append(head_act)                       # classifier  = Identity
        # back to NCHW (PyTorch convention); transpose each unique array once
        cache, out = {}, []
        for f in feats:
            if id(f) not in cache:
                cache[id(f)] = jnp.transpose(f, (0, 3, 1, 2))
            out.append(cache[id(f)])
        return out

    def __call__(self, x_nchw):
        return self._forward(x_nchw)


if __name__ == "__main__":
    key = jax.random.PRNGKey(0)
    kx, kp = jax.random.split(key)
    x = jax.random.normal(kx, (2, 3, 16, 16), jnp.float32)   # NCHW, like PyTorch
    encoder = PallasEncoder(kp)
    features = encoder(x)
    features = jax.block_until_ready(features)
    assert len(features) == 12
    print("KERNEL_OK")
</pallas_src>

<mosaic_0001>
module attributes {stable_mosaic.version = 11 : i64} {
  func.func @_stem_kernel(%arg0: i32, %arg1: memref<1x9x9x12xbf16, #tpu.memory_space<vmem>>, %arg2: memref<4x12x128xbf16, #tpu.memory_space<vmem>>, %arg3: memref<1x128xf32, #tpu.memory_space<vmem>>, %arg4: memref<1x128xf32, #tpu.memory_space<vmem>>, %arg5: memref<1x8x8x128xbf16, #tpu.memory_space<vmem>>, %arg6: memref<1x8x8x128xbf16, #tpu.memory_space<vmem>>, %arg7: memref<1x8x8x128xbf16, #tpu.memory_space<vmem>>) attributes {dimension_semantics = [#tpu.dimension_semantics<parallel>], iteration_bounds = array<i64: 2>, scalar_prefetch = 0 : i64, scratch_operands = 0 : i64, tpu.core_type = #tpu.core_type<tc>, window_params = [{transform_indices = @transform_0, window_bounds = array<i64: 1, 9, 9, 12>}, {pipeline_mode = #tpu.pipeline_mode<synchronous>, transform_indices = @transform_1, window_bounds = array<i64: 4, 12, 128>}, {pipeline_mode = #tpu.pipeline_mode<synchronous>, transform_indices = @transform_2, window_bounds = array<i64: 1, 128>}, {pipeline_mode = #tpu.pipeline_mode<synchronous>, transform_indices = @transform_3, window_bounds = array<i64: 1, 128>}, {transform_indices = @transform_4, window_bounds = array<i64: 1, 8, 8, 128>}, {transform_indices = @transform_5, window_bounds = array<i64: 1, 8, 8, 128>}, {transform_indices = @transform_6, window_bounds = array<i64: 1, 8, 8, 128>}]} {
    %c0 = arith.constant 0 : index
    %c0_0 = arith.constant 0 : index
    %c0_1 = arith.constant 0 : index
    %c0_2 = arith.constant 0 : index
    %0 = vector.load %arg1[%c0, %c0_0, %c0_1, %c0_2] : memref<1x9x9x12xbf16, #tpu.memory_space<vmem>>, vector<1x9x9x12xbf16>
    %1 = vector.shape_cast %0 : vector<1x9x9x12xbf16> to vector<9x9x12xbf16>
    %cst = arith.constant 0.000000e+00 : f32
    %2 = vector.broadcast %cst : f32 to vector<64x128xf32>
    %3 = vector.extract_strided_slice %1 {offsets = [0, 0, 0], sizes = [8, 8, 12], strides = [1, 1, 1]} : vector<9x9x12xbf16> to vector<8x8x12xbf16>
    %4 = vector.shape_cast %3 : vector<8x8x12xbf16> to vector<64x12xbf16>
    %c0_3 = arith.constant 0 : index
    %c0_4 = arith.constant 0 : index
    %c0_5 = arith.constant 0 : index
    %5 = vector.load %arg2[%c0_3, %c0_4, %c0_5] : memref<4x12x128xbf16, #tpu.memory_space<vmem>>, vector<1x12x128xbf16>
    %6 = vector.shape_cast %5 : vector<1x12x128xbf16> to vector<12x128xbf16>
    %cst_6 = arith.constant dense<0.000000e+00> : vector<64x128xf32>
    %7 = tpu.matmul %4, %6, %cst_6 {dimension_numbers = #tpu.dot_dimension_numbers<[1], [0], [0], [1], [0, 0, 1, 1], [], []>} : vector<64x12xbf16>, vector<12x128xbf16>, vector<64x128xf32> -> vector<64x128xf32>
    %8 = arith.addf %2, %7 : vector<64x128xf32>
    %9 = vector.extract_strided_slice %1 {offsets = [0, 1, 0], sizes = [8, 8, 12], strides = [1, 1, 1]} : vector<9x9x12xbf16> to vector<8x8x12xbf16>
    %10 = vector.shape_cast %9 : vector<8x8x12xbf16> to vector<64x12xbf16>
    %c1 = arith.constant 1 : index
    %c0_7 = arith.constant 0 : index
    %c0_8 = arith.constant 0 : index
    %11 = vector.load %arg2[%c1, %c0_7, %c0_8] : memref<4x12x128xbf16, #tpu.memory_space<vmem>>, vector<1x12x128xbf16>
    %12 = vector.shape_cast %11 : vector<1x12x128xbf16> to vector<12x128xbf16>
    %cst_9 = arith.constant dense<0.000000e+00> : vector<64x128xf32>
    %13 = tpu.matmul %10, %12, %cst_9 {dimension_numbers = #tpu.dot_dimension_numbers<[1], [0], [0], [1], [0, 0, 1, 1], [], []>} : vector<64x12xbf16>, vector<12x128xbf16>, vector<64x128xf32> -> vector<64x128xf32>
    %14 = arith.addf %8, %13 : vector<64x128xf32>
    %15 = vector.extract_strided_slice %1 {offsets = [1, 0, 0], sizes = [8, 8, 12], strides = [1, 1, 1]} : vector<9x9x12xbf16> to vector<8x8x12xbf16>
    %16 = vector.shape_cast %15 : vector<8x8x12xbf16> to vector<64x12xbf16>
    %c2 = arith.constant 2 : index
    %c0_10 = arith.constant 0 : index
    %c0_11 = arith.constant 0 : index
    %17 = vector.load %arg2[%c2, %c0_10, %c0_11] : memref<4x12x128xbf16, #tpu.memory_space<vmem>>, vector<1x12x128xbf16>
    %18 = vector.shape_cast %17 : vector<1x12x128xbf16> to vector<12x128xbf16>
    %cst_12 = arith.constant dense<0.000000e+00> : vector<64x128xf32>
    %19 = tpu.matmul %16, %18, %cst_12 {dimension_numbers = #tpu.dot_dimension_numbers<[1], [0], [0], [1], [0, 0, 1, 1], [], []>} : vector<64x12xbf16>, vector<12x128xbf16>, vector<64x128xf32> -> vector<64x128xf32>
    %20 = arith.addf %14, %19 : vector<64x128xf32>
    %21 = vector.extract_strided_slice %1 {offsets = [1, 1, 0], sizes = [8, 8, 12], strides = [1, 1, 1]} : vector<9x9x12xbf16> to vector<8x8x12xbf16>
    %22 = vector.shape_cast %21 : vector<8x8x12xbf16> to vector<64x12xbf16>
    %c3 = arith.constant 3 : index
    %c0_13 = arith.constant 0 : index
    %c0_14 = arith.constant 0 : index
    %23 = vector.load %arg2[%c3, %c0_13, %c0_14] : memref<4x12x128xbf16, #tpu.memory_space<vmem>>, vector<1x12x128xbf16>
    %24 = vector.shape_cast %23 : vector<1x12x128xbf16> to vector<12x128xbf16>
    %cst_15 = arith.constant dense<0.000000e+00> : vector<64x128xf32>
    %25 = tpu.matmul %22, %24, %cst_15 {dimension_numbers = #tpu.dot_dimension_numbers<[1], [0], [0], [1], [0, 0, 1, 1], [], []>} : vector<64x12xbf16>, vector<12x128xbf16>, vector<64x128xf32> -> vector<64x128xf32>
    %26 = arith.addf %20, %25 : vector<64x128xf32>
    %27 = vector.shape_cast %26 : vector<64x128xf32> to vector<8x8x128xf32>
    %28 = arith.truncf %27 : vector<8x8x128xf32> to vector<8x8x128xbf16>
    %c0_16 = arith.constant 0 : index
    %c0_17 = arith.constant 0 : index
    %c0_18 = arith.constant 0 : index
    %c0_19 = arith.constant 0 : index
    %29 = vector.load %arg5[%c0_16, %c0_17, %c0_18, %c0_19] : memref<1x8x8x128xbf16, #tpu.memory_space<vmem>>, vector<1x8x8x128xbf16>
    %30 = vector.shape_cast %29 : vector<1x8x8x128xbf16> to vector<8x8x128xbf16>
    %31 = vector.shape_cast %28 : vector<8x8x128xbf16> to vector<1x8x8x128xbf16>
    tpu.vector_store %arg5[%c0_16, %c0_17, %c0_18, %c0_19], %31 {strides = array<i32>} : memref<1x8x8x128xbf16, #tpu.memory_space<vmem>>, vector<1x8x8x128xbf16>,
    %c0_20 = arith.constant 0 : index
    %c0_21 = arith.constant 0 : index
    %32 = vector.load %arg3[%c0_20, %c0_21] : memref<1x128xf32, #tpu.memory_space<vmem>>, vector<1x128xf32>
    %33 = vector.shape_cast %32 : vector<1x128xf32> to vector<128xf32>
    %34 = vector.shape_cast %33 : vector<128xf32> to vector<1x1x128xf32>
    %35 = vector.broadcast %34 : vector<1x1x128xf32> to vector<8x8x128xf32>
    %36 = arith.mulf %27, %35 : vector<8x8x128xf32>
    %c0_22 = arith.constant 0 : index
    %c0_23 = arith.constant 0 : index
    %37 = vector.load %arg4[%c0_22, %c0_23] : memref<1x128xf32, #tpu.memory_space<vmem>>, vector<1x128xf32>
    %38 = vector.shape_cast %37 : vector<1x128xf32> to vector<128xf32>
    %39 = vector.shape_cast %38 : vector<128xf32> to vector<1x1x128xf32>
    %40 = vector.broadcast %39 : vector<1x1x128xf32> to vector<8x8x128xf32>
    %41 = arith.addf %36, %40 : vector<8x8x128xf32>
    %42 = arith.truncf %41 : vector<8x8x128xf32> to vector<8x8x128xbf16>
    %c0_24 = arith.constant 0 : index
    %c0_25 = arith.constant 0 : index
    %c0_26 = arith.constant 0 : index
    %c0_27 = arith.constant 0 : index
    %43 = vector.load %arg6[%c0_24, %c0_25, %c0_26, %c0_27] : memref<1x8x8x128xbf16, #tpu.memory_space<vmem>>, vector<1x8x8x128xbf16>
    %44 = vector.shape_cast %43 : vector<1x8x8x128xbf16> to vector<8x8x128xbf16>
    %45 = vector.shape_cast %42 : vector<8x8x128xbf16> to vector<1x8x8x128xbf16>
    tpu.vector_store %arg6[%c0_24, %c0_25, %c0_26, %c0_27], %45 {strides = array<i32>} : memref<1x8x8x128xbf16, #tpu.memory_space<vmem>>, vector<1x8x8x128xbf16>,
    %46 = arith.negf %41 : vector<8x8x128xf32>
    %47 = math.exp %46 : vector<8x8x128xf32>
    %cst_28 = arith.constant 1.000000e+00 : f32
    %48 = vector.broadcast %cst_28 : f32 to vector<8x8x128xf32>
    %49 = arith.addf %48, %47 : vector<8x8x128xf32>
    %50 = arith.divf %48, %49 : vector<8x8x128xf32>
    %51 = arith.mulf %41, %50 : vector<8x8x128xf32>
    %52 = arith.truncf %51 : vector<8x8x128xf32> to vector<8x8x128xbf16>
    %c0_29 = arith.constant 0 : index
    %c0_30 = arith.constant 0 : index
    %c0_31 = arith.constant 0 : index
    %c0_32 = arith.constant 0 : index
    %53 = vector.load %arg7[%c0_29, %c0_30, %c0_31, %c0_32] : memref<1x8x8x128xbf16, #tpu.memory_space<vmem>>, vector<1x8x8x128xbf16>
    %54 = vector.shape_cast %53 : vector<1x8x8x128xbf16> to vector<8x8x128xbf16>
    %55 = vector.shape_cast %52 : vector<8x8x128xbf16> to vector<1x8x8x128xbf16>
    tpu.vector_store %arg7[%c0_29, %c0_30, %c0_31, %c0_32], %55 {strides = array<i32>} : memref<1x8x8x128xbf16, #tpu.memory_space<vmem>>, vector<1x8x8x128xbf16>,
    return
  }
  func.func @transform_0(%arg0: i32) -> (i32, i32, i32, i32) {
    %c0_i32 = arith.constant 0 : i32
    %c0_i32_0 = arith.constant 0 : i32
    %c0_i32_1 = arith.constant 0 : i32
    %c0_i32_2 = arith.constant 0 : i32
    return %arg0, %c0_i32, %c0_i32_0, %c0_i32_1 : i32, i32, i32, i32
  }
  func.func @transform_1(%arg0: i32) -> (i32, i32, i32) {
    %c0_i32 = arith.constant 0 : i32
    %c0_i32_0 = arith.constant 0 : i32
    %c0_i32_1 = arith.constant 0 : i32
    %c0_i32_2 = arith.constant 0 : i32
    return %c0_i32, %c0_i32_0, %c0_i32_1 : i32, i32, i32
  }
  func.func @transform_2(%arg0: i32) -> (i32, i32) {
    %c0_i32 = arith.constant 0 : i32
    %c0_i32_0 = arith.constant 0 : i32
    %c0_i32_1 = arith.constant 0 : i32
    return %c0_i32, %c0_i32_0 : i32, i32
  }
  func.func @transform_3(%arg0: i32) -> (i32, i32) {
    %c0_i32 = arith.constant 0 : i32
    %c0_i32_0 = arith.constant 0 : i32
    %c0_i32_1 = arith.constant 0 : i32
    return %c0_i32, %c0_i32_0 : i32, i32
  }
  func.func @transform_4(%arg0: i32) -> (i32, i32, i32, i32) {
    %c0_i32 = arith.constant 0 : i32
    %c0_i32_0 = arith.constant 0 : i32
    %c0_i32_1 = arith.constant 0 : i32
    %c0_i32_2 = arith.constant 0 : i32
    return %arg0, %c0_i32, %c0_i32_0, %c0_i32_1 : i32, i32, i32, i32
  }
  func.func @transform_5(%arg0: i32) -> (i32, i32, i32, i32) {
    %c0_i32 = arith.constant 0 : i32
    %c0_i32_0 = arith.constant 0 : i32
    %c0_i32_1 = arith.constant 0 : i32
    %c0_i32_2 = arith.constant 0 : i32
    return %arg0, %c0_i32, %c0_i32_0, %c0_i32_1 : i32, i32, i32, i32
  }
  func.func @transform_6(%arg0: i32) -> (i32, i32, i32, i32) {
    %c0_i32 = arith.constant 0 : i32
    %c0_i32_0 = arith.constant 0 : i32
    %c0_i32_1 = arith.constant 0 : i32
    %c0_i32_2 = arith.constant 0 : i32
    return %arg0, %c0_i32, %c0_i32_0, %c0_i32_1 : i32, i32, i32, i32
  }
}

module attributes {stable_mosaic.version = 11 : i64} {
  func.func @_dw_s1_kernel(%arg0: i32, %arg1: memref<1x8x8x128xbf16, #tpu.memory_space<vmem>>, %arg2: memref<9x128xbf16, #tpu.memory_space<vmem>>, %arg3: memref<1x128xf32, #tpu.memory_space<vmem>>, %arg4: memref<1x128xf32, #tpu.memory_space<vmem>>, %arg5: memref<1x8x8x128xbf16, #tpu.memory_space<vmem>>, %arg6: memref<10x10x128xbf16, #tpu.memory_space<vmem>>) attributes {dimension_semantics = [#tpu.dimension_semantics<parallel>], iteration_bounds = array<i64: 2>, scalar_prefetch = 0 : i64, scratch_operands = 1 : i64, tpu.core_type = #tpu.core_type<tc>, window_params = [{transform_indices = @transform_0, window_bounds = array<i64: 1, 8, 8, 128>}, {pipeline_mode = #tpu.pipeline_mode<synchronous>, transform_indices = @transform_1, window_bounds = array<i64: 9, 128>}, {pipeline_mode = #tpu.pipeline_mode<synchronous>, transform_indices = @transform_2, window_bounds = array<i64: 1, 128>}, {pipeline_mode = #tpu.pipeline_mode<synchronous>, transform_indices = @transform_3, window_bounds = array<i64: 1, 128>}, {transform_indices = @transform_4, window_bounds = array<i64: 1, 8, 8, 128>}]} {
    %cst = arith.constant 0.000000e+00 : bf16
    %0 = vector.broadcast %cst : bf16 to vector<10x10x128xbf16>
    %c0 = arith.constant 0 : index
    %c0_0 = arith.constant 0 : index
    %c0_1 = arith.constant 0 : index
    %1 = vector.load %arg6[%c0, %c0_0, %c0_1] : memref<10x10x128xbf16, #tpu.memory_space<vmem>>, vector<10x10x128xbf16>
    tpu.vector_store %arg6[%c0, %c0_0, %c0_1], %0 {strides = array<i32>} : memref<10x10x128xbf16, #tpu.memory_space<vmem>>, vector<10x10x128xbf16>,
    %c0_2 = arith.constant 0 : index
    %c0_3 = arith.constant 0 : index
    %c0_4 = arith.constant 0 : index
    %c0_5 = arith.constant 0 : index
    %2 = vector.load %arg1[%c0_2, %c0_3, %c0_4, %c0_5] : memref<1x8x8x128xbf16, #tpu.memory_space<vmem>>, vector<1x8x8x128xbf16>
    %3 = vector.shape_cast %2 : vector<1x8x8x128xbf16> to vector<8x8x128xbf16>
    %c1 = arith.constant 1 : index
    %c1_6 = arith.constant 1 : index
    %c0_7 = arith.constant 0 : index
    %4 = vector.load %arg6[%c1, %c1_6, %c0_7] : memref<10x10x128xbf16, #tpu.memory_space<vmem>>, vector<8x8x128xbf16>
    tpu.vector_store %arg6[%c1, %c1_6, %c0_7], %3 {strides = array<i32>} : memref<10x10x128xbf16, #tpu.memory_space<vmem>>, vector<8x8x128xbf16>,
    %cst_8 = arith.constant 0.000000e+00 : f32
    %5 = vector.broadcast %cst_8 : f32 to vector<8x8x128xf32>
    %c0_9 = arith.constant 0 : index
    %c0_10 = arith.constant 0 : index
    %c0_11 = arith.constant 0 : index
    %6 = vector.load %arg6[%c0_9, %c0_10, %c0_11] : memref<10x10x128xbf16, #tpu.memory_space<vmem>>, vector<8x8x128xbf16>
    %7 = arith.extf %6 : vector<8x8x128xbf16> to vector<8x8x128xf32>
    %c0_12 = arith.constant 0 : index
    %c0_13 = arith.constant 0 : index
    %8 = vector.load %arg2[%c0_12, %c0_13] : memref<9x128xbf16, #tpu.memory_space<vmem>>, vector<1x128xbf16>
    %9 = vector.shape_cast %8 : vector<1x128xbf16> to vector<128xbf16>
    %10 = arith.extf %9 : vector<128xbf16> to vector<128xf32>
    %11 = vector.shape_cast %10 : vector<128xf32> to vector<1x1x128xf32>
    %12 = vector.broadcast %11 : vector<1x1x128xf32> to vector<8x8x128xf32>
    %13 = arith.mulf %7, %12 : vector<8x8x128xf32>
    %14 = arith.addf %5, %13 : vector<8x8x128xf32>
    %c0_14 = arith.constant 0 : index
    %c1_15 = arith.constant 1 : index
    %c0_16 = arith.constant 0 : index
    %15 = vector.load %arg6[%c0_14, %c1_15, %c0_16] : memref<10x10x128xbf16, #tpu.memory_space<vmem>>, vector<8x8x128xbf16>
    %16 = arith.extf %15 : vector<8x8x128xbf16> to vector<8x8x128xf32>
    %c1_17 = arith.constant 1 : index
    %c0_18 = arith.constant 0 : index
    %17 = vector.load %arg2[%c1_17, %c0_18] : memref<9x128xbf16, #tpu.memory_space<vmem>>, vector<1x128xbf16>
    %18 = vector.shape_cast %17 : vector<1x128xbf16> to vector<128xbf16>
    %19 = arith.extf %18 : vector<128xbf16> to vector<128xf32>
    %20 = vector.shape_cast %19 : vector<128xf32> to vector<1x1x128xf32>
    %21 = vector.broadcast %20 : vector<1x1x128xf32> to vector<8x8x128xf32>
    %22 = arith.mulf %16, %21 : vector<8x8x128xf32>
    %23 = arith.addf %14, %22 : vector<8x8x128xf32>
    %c0_19 = arith.constant 0 : index
    %c2 = arith.constant 2 : index
    %c0_20 = arith.constant 0 : index
    %24 = vector.load %arg6[%c0_19, %c2, %c0_20] : memref<10x10x128xbf16, #tpu.memory_space<vmem>>, vector<8x8x128xbf16>
    %25 = arith.extf %24 : vector<8x8x128xbf16> to vector<8x8x128xf32>
    %c2_21 = arith.constant 2 : index
    %c0_22 = arith.constant 0 : index
    %26 = vector.load %arg2[%c2_21, %c0_22] : memref<9x128xbf16, #tpu.memory_space<vmem>>, vector<1x128xbf16>
    %27 = vector.shape_cast %26 : vector<1x128xbf16> to vector<128xbf16>
    %28 = arith.extf %27 : vector<128xbf16> to vector<128xf32>
    %29 = vector.shape_cast %28 : vector<128xf32> to vector<1x1x128xf32>
    %30 = vector.broadcast %29 : vector<1x1x128xf32> to vector<8x8x128xf32>
    %31 = arith.mulf %25, %30 : vector<8x8x128xf32>
    %32 = arith.addf %23, %31 : vector<8x8x128xf32>
    %c1_23 = arith.constant 1 : index
    %c0_24 = arith.constant 0 : index
    %c0_25 = arith.constant 0 : index
    %33 = vector.load %arg6[%c1_23, %c0_24, %c0_25] : memref<10x10x128xbf16, #tpu.memory_space<vmem>>, vector<8x8x128xbf16>
    %34 = arith.extf %33 : vector<8x8x128xbf16> to vector<8x8x128xf32>
    %c3 = arith.constant 3 : index
    %c0_26 = arith.constant 0 : index
    %35 = vector.load %arg2[%c3, %c0_26] : memref<9x128xbf16, #tpu.memory_space<vmem>>, vector<1x128xbf16>
    %36 = vector.shape_cast %35 : vector<1x128xbf16> to vector<128xbf16>
    %37 = arith.extf %36 : vector<128xbf16> to vector<128xf32>
    %38 = vector.shape_cast %37 : vector<128xf32> to vector<1x1x128xf32>
    %39 = vector.broadcast %38 : vector<1x1x128xf32> to vector<8x8x128xf32>
    %40 = arith.mulf %34, %39 : vector<8x8x128xf32>
    %41 = arith.addf %32, %40 : vector<8x8x128xf32>
    %c1_27 = arith.constant 1 : index
    %c1_28 = arith.constant 1 : index
    %c0_29 = arith.constant 0 : index
    %42 = vector.load %arg6[%c1_27, %c1_28, %c0_29] : memref<10x10x128xbf16, #tpu.memory_space<vmem>>, vector<8x8x128xbf16>
    %43 = arith.extf %42 : vector<8x8x128xbf16> to vector<8x8x128xf32>
    %c4 = arith.constant 4 : index
    %c0_30 = arith.constant 0 : index
    %44 = vector.load %arg2[%c4, %c0_30] : memref<9x128xbf16, #tpu.memory_space<vmem>>, vector<1x128xbf16>
    %45 = vector.shape_cast %44 : vector<1x128xbf16> to vector<128xbf16>
    %46 = arith.extf %45 : vector<128xbf16> to vector<128xf32>
    %47 = vector.shape_cast %46 : vector<128xf32> to vector<1x1x128xf32>
    %48 = vector.broadcast %47 : vector<1x1x128xf32> to vector<8x8x128xf32>
    %49 = arith.mulf %43, %48 : vector<8x8x128xf32>
    %50 = arith.addf %41, %49 : vector<8x8x128xf32>
    %c1_31 = arith.constant 1 : index
    %c2_32 = arith.constant 2 : index
    %c0_33 = arith.constant 0 : index
    %51 = vector.load %arg6[%c1_31, %c2_32, %c0_33] : memref<10x10x128xbf16, #tpu.memory_space<vmem>>, vector<8x8x128xbf16>
    %52 = arith.extf %51 : vector<8x8x128xbf16> to vector<8x8x128xf32>
    %c5 = arith.constant 5 : index
    %c0_34 = arith.constant 0 : index
    %53 = vector.load %arg2[%c5, %c0_34] : memref<9x128xbf16, #tpu.memory_space<vmem>>, vector<1x128xbf16>
    %54 = vector.shape_cast %53 : vector<1x128xbf16> to vector<128xbf16>
    %55 = arith.extf %54 : vector<128xbf16> to vector<128xf32>
    %56 = vector.shape_cast %55 : vector<128xf32> to vector<1x1x128xf32>
    %57 = vector.broadcast %56 : vector<1x1x128xf32> to vector<8x8x128xf32>
    %58 = arith.mulf %52, %57 : vector<8x8x128xf32>
    %59 = arith.addf %50, %58 : vector<8x8x128xf32>
    %c2_35 = arith.constant 2 : index
    %c0_36 = arith.constant 0 : index
    %c0_37 = arith.constant 0 : index
    %60 = vector.load %arg6[%c2_35, %c0_36, %c0_37] : memref<10x10x128xbf16, #tpu.memory_space<vmem>>, vector<8x8x128xbf16>
    %61 = arith.extf %60 : vector<8x8x128xbf16> to vector<8x8x128xf32>
    %c6 = arith.constant 6 : index
    %c0_38 = arith.constant 0 : index
    %62 = vector.load %arg2[%c6, %c0_38] : memref<9x128xbf16, #tpu.memory_space<vmem>>, vector<1x128xbf16>
    %63 = vector.shape_cast %62 : vector<1x128xbf16> to vector<128xbf16>
    %64 = arith.extf %63 : vector<128xbf16> to vector<128xf32>
    %65 = vector.shape_cast %64 : vector<128xf32> to vector<1x1x128xf32>
    %66 = vector.broadcast %65 : vector<1x1x128xf32> to vector<8x8x128xf32>
    %67 = arith.mulf %61, %66 : vector<8x8x128xf32>
    %68 = arith.addf %59, %67 : vector<8x8x128xf32>
    %c2_39 = arith.constant 2 : index
    %c1_40 = arith.constant 1 : index
    %c0_41 = arith.constant 0 : index
    %69 = vector.load %arg6[%c2_39, %c1_40, %c0_41] : memref<10x10x128xbf16, #tpu.memory_space<vmem>>, vector<8x8x128xbf16>
    %70 = arith.extf %69 : vector<8x8x128xbf16> to vector<8x8x128xf32>
    %c7 = arith.constant 7 : index
    %c0_42 = arith.constant 0 : index
    %71 = vector.load %arg2[%c7, %c0_42] : memref<9x128xbf16, #tpu.memory_space<vmem>>, vector<1x128xbf16>
    %72 = vector.shape_cast %71 : vector<1x128xbf16> to vector<128xbf16>
    %73 = arith.extf %72 : vector<128xbf16> to vector<128xf32>
    %74 = vector.shape_cast %73 : vector<128xf32> to vector<1x1x128xf32>
    %75 = vector.broadcast %74 : vector<1x1x128xf32> to vector<8x8x128xf32>
    %76 = arith.mulf %70, %75 : vector<8x8x128xf32>
    %77 = arith.addf %68, %76 : vector<8x8x128xf32>
    %c2_43 = arith.constant 2 : index
    %c2_44 = arith.constant 2 : index
    %c0_45 = arith.constant 0 : index
    %78 = vector.load %arg6[%c2_43, %c2_44, %c0_45] : memref<10x10x128xbf16, #tpu.memory_space<vmem>>, vector<8x8x128xbf16>
    %79 = arith.extf %78 : vector<8x8x128xbf16> to vector<8x8x128xf32>
    %c8 = arith.constant 8 : index
    %c0_46 = arith.constant 0 : index
    %80 = vector.load %arg2[%c8, %c0_46] : memref<9x128xbf16, #tpu.memory_space<vmem>>, vector<1x128xbf16>
    %81 = vector.shape_cast %80 : vector<1x128xbf16> to vector<128xbf16>
    %82 = arith.extf %81 : vector<128xbf16> to vector<128xf32>
    %83 = vector.shape_cast %82 : vector<128xf32> to vector<1x1x128xf32>
    %84 = vector.broadcast %83 : vector<1x1x128xf32> to vector<8x8x128xf32>
    %85 = arith.mulf %79, %84 : vector<8x8x128xf32>
    %86 = arith.addf %77, %85 : vector<8x8x128xf32>
    %c0_47 = arith.constant 0 : index
    %c0_48 = arith.constant 0 : index
    %87 = vector.load %arg3[%c0_47, %c0_48] : memref<1x128xf32, #tpu.memory_space<vmem>>, vector<1x128xf32>
    %88 = vector.shape_cast %87 : vector<1x128xf32> to vector<128xf32>
    %89 = vector.shape_cast %88 : vector<128xf32> to vector<1x1x128xf32>
    %90 = vector.broadcast %89 : vector<1x1x128xf32> to vector<8x8x128xf32>
    %91 = arith.mulf %86, %90 : vector<8x8x128xf32>
    %c0_49 = arith.constant 0 : index
    %c0_50 = arith.constant 0 : index
    %92 = vector.load %arg4[%c0_49, %c0_50] : memref<1x128xf32, #tpu.memory_space<vmem>>, vector<1x128xf32>
    %93 = vector.shape_cast %92 : vector<1x128xf32> to vector<128xf32>
    %94 = vector.shape_cast %93 : vector<128xf32> to vector<1x1x128xf32>
    %95 = vector.broadcast %94 : vector<1x1x128xf32> to vector<8x8x128xf32>
    %96 = arith.addf %91, %95 : vector<8x8x128xf32>
    %97 = arith.negf %96 : vector<8x8x128xf32>
    %98 = math.exp %97 : vector<8x8x128xf32>
    %cst_51 = arith.constant 1.000000e+00 : f32
    %99 = vector.broadcast %cst_51 : f32 to vector<8x8x128xf32>
    %100 = arith.addf %99, %98 : vector<8x8x128xf32>
    %101 = arith.divf %99, %100 : vector<8x8x128xf32>
    %102 = arith.mulf %96, %101 : vector<8x8x128xf32>
    %103 = arith.truncf %102 : vector<8x8x128xf32> to vector<8x8x128xbf16>
    %c0_52 = arith.constant 0 : index
    %c0_53 = arith.constant 0 : index
    %c0_54 = arith.constant 0 : index
    %c0_55 = arith.constant 0 : index
    %104 = vector.load %arg5[%c0_52, %c0_53, %c0_54, %c0_55] : memref<1x8x8x128xbf16, #tpu.memory_space<vmem>>, vector<1x8x8x128xbf16>
    %105 = vector.shape_cast %104 : vector<1x8x8x128xbf16> to vector<8x8x128xbf16>
    %106 = vector.shape_cast %103 : vector<8x8x128xbf16> to vector<1x8x8x128xbf16>
    tpu.vector_store %arg5[%c0_52, %c0_53, %c0_54, %c0_55], %106 {strides = array<i32>} : memref<1x8x8x128xbf16, #tpu.memory_space<vmem>>, vector<1x8x8x128xbf16>,
    return
  }
  func.func @transform_0(%arg0: i32) -> (i32, i32, i32, i32) {
    %c0_i32 = arith.constant 0 : i32
    %c0_i32_0 = arith.constant 0 : i32
    %c0_i32_1 = arith.constant 0 : i32
    %c0_i32_2 = arith.constant 0 : i32
    return %arg0, %c0_i32, %c0_i32_0, %c0_i32_1 : i32, i32, i32, i32
  }
  func.func @transform_1(%arg0: i32) -> (i32, i32) {
    %c0_i32 = arith.constant 0 : i32
    %c0_i32_0 = arith.constant 0 : i32
    %c0_i32_1 = arith.constant 0 : i32
    return %c0_i32, %c0_i32_0 : i32, i32
  }
  func.func @transform_2(%arg0: i32) -> (i32, i32) {
    %c0_i32 = arith.constant 0 : i32
    %c0_i32_0 = arith.constant 0 : i32
    %c0_i32_1 = arith.constant 0 : i32
    return %c0_i32, %c0_i32_0 : i32, i32
  }
  func.func @transform_3(%arg0: i32) -> (i32, i32) {
    %c0_i32 = arith.constant 0 : i32
    %c0_i32_0 = arith.constant 0 : i32
    %c0_i32_1 = arith.constant 0 : i32
    return %c0_i32, %c0_i32_0 : i32, i32
  }
  func.func @transform_4(%arg0: i32) -> (i32, i32, i32, i32) {
    %c0_i32 = arith.constant 0 : i32
    %c0_i32_0 = arith.constant 0 : i32
    %c0_i32_1 = arith.constant 0 : i32
    %c0_i32_2 = arith.constant 0 : i32
    return %arg0, %c0_i32, %c0_i32_0, %c0_i32_1 : i32, i32, i32, i32
  }
}

module attributes {stable_mosaic.version = 11 : i64} {
  func.func @_mm_bn_res_kernel(%arg0: i32, %arg1: memref<64x128xbf16, #tpu.memory_space<vmem>>, %arg2: memref<128x128xbf16, #tpu.memory_space<vmem>>, %arg3: memref<1x128xf32, #tpu.memory_space<vmem>>, %arg4: memref<1x128xf32, #tpu.memory_space<vmem>>, %arg5: memref<64x128xbf16, #tpu.memory_space<vmem>>, %arg6: memref<64x128xbf16, #tpu.memory_space<vmem>>) attributes {dimension_semantics = [#tpu.dimension_semantics<parallel>], iteration_bounds = array<i64: 2>, scalar_prefetch = 0 : i64, scratch_operands = 0 : i64, tpu.core_type = #tpu.core_type<tc>, window_params = [{transform_indices = @transform_0, window_bounds = array<i64: 64, 128>}, {pipeline_mode = #tpu.pipeline_mode<synchronous>, transform_indices = @transform_1, window_bounds = array<i64: 128, 128>}, {pipeline_mode = #tpu.pipeline_mode<synchronous>, transform_indices = @transform_2, window_bounds = array<i64: 1, 128>}, {pipeline_mode = #tpu.pipeline_mode<synchronous>, transform_indices = @transform_3, window_bounds = array<i64: 1, 128>}, {transform_indices = @transform_4, window_bounds = array<i64: 64, 128>}, {transform_indices = @transform_5, window_bounds = array<i64: 64, 128>}]} {
    %c0 = arith.constant 0 : index
    %c0_0 = arith.constant 0 : index
    %0 = vector.load %arg1[%c0, %c0_0] : memref<64x128xbf16, #tpu.memory_space<vmem>>, vector<64x128xbf16>
    %c0_1 = arith.constant 0 : index
    %c0_2 = arith.constant 0 : index
    %1 = vector.load %arg2[%c0_1, %c0_2] : memref<128x128xbf16, #tpu.memory_space<vmem>>, vector<128x128xbf16>
    %cst = arith.constant dense<0.000000e+00> : vector<64x128xf32>
    %2 = tpu.matmul %0, %1, %cst {dimension_numbers = #tpu.dot_dimension_numbers<[1], [0], [0], [1], [0, 0, 1, 1], [], []>} : vector<64x128xbf16>, vector<128x128xbf16>, vector<64x128xf32> -> vector<64x128xf32>
    %c0_3 = arith.constant 0 : index
    %c0_4 = arith.constant 0 : index
    %3 = vector.load %arg3[%c0_3, %c0_4] : memref<1x128xf32, #tpu.memory_space<vmem>>, vector<1x128xf32>
    %4 = vector.broadcast %3 : vector<1x128xf32> to vector<64x128xf32>
    %5 = arith.mulf %2, %4 : vector<64x128xf32>
    %c0_5 = arith.constant 0 : index
    %c0_6 = arith.constant 0 : index
    %6 = vector.load %arg4[%c0_5, %c0_6] : memref<1x128xf32, #tpu.memory_space<vmem>>, vector<1x128xf32>
    %7 = vector.broadcast %6 : vector<1x128xf32> to vector<64x128xf32>
    %8 = arith.addf %5, %7 : vector<64x128xf32>
    %c0_7 = arith.constant 0 : index
    %c0_8 = arith.constant 0 : index
    %9 = vector.load %arg5[%c0_7, %c0_8] : memref<64x128xbf16, #tpu.memory_space<vmem>>, vector<64x128xbf16>
    %10 = arith.extf %9 : vector<64x128xbf16> to vector<64x128xf32>
    %11 = arith.addf %8, %10 : vector<64x128xf32>
    %12 = arith.truncf %11 : vector<64x128xf32> to vector<64x128xbf16>
    %c0_9 = arith.constant 0 : index
    %c0_10 = arith.constant 0 : index
    %13 = vector.load %arg6[%c0_9, %c0_10] : memref<64x128xbf16, #tpu.memory_space<vmem>>, vector<64x128xbf16>
    tpu.vector_store %arg6[%c0_9, %c0_10], %12 {strides = array<i32>} : memref<64x128xbf16, #tpu.memory_space<vmem>>, vector<64x128xbf16>,
    return
  }
  func.func @transform_0(%arg0: i32) -> (i32, i32) {
    %c0_i32 = arith.constant 0 : i32
    %c0_i32_0 = arith.constant 0 : i32
    return %arg0, %c0_i32 : i32, i32
  }
  func.func @transform_1(%arg0: i32) -> (i32, i32) {
    %c0_i32 = arith.constant 0 : i32
    %c0_i32_0 = arith.constant 0 : i32
    %c0_i32_1 = arith.constant 0 : i32
    return %c0_i32, %c0_i32_0 : i32, i32
  }
  func.func @transform_2(%arg0: i32) -> (i32, i32) {
    %c0_i32 = arith.constant 0 : i32
    %c0_i32_0 = arith.constant 0 : i32
    %c0_i32_1 = arith.constant 0 : i32
    return %c0_i32, %c0_i32_0 : i32, i32
  }
  func.func @transform_3(%arg0: i32) -> (i32, i32) {
    %c0_i32 = arith.constant 0 : i32
    %c0_i32_0 = arith.constant 0 : i32
    %c0_i32_1 = arith.constant 0 : i32
    return %c0_i32, %c0_i32_0 : i32, i32
  }
  func.func @transform_4(%arg0: i32) -> (i32, i32) {
    %c0_i32 = arith.constant 0 : i32
    %c0_i32_0 = arith.constant 0 : i32
    return %arg0, %c0_i32 : i32, i32
  }
  func.func @transform_5(%arg0: i32) -> (i32, i32) {
    %c0_i32 = arith.constant 0 : i32
    %c0_i32_0 = arith.constant 0 : i32
    return %arg0, %c0_i32 : i32, i32
  }
}

module attributes {stable_mosaic.version = 11 : i64} {
  func.func @_mm_bn_act_kernel(%arg0: i32, %arg1: memref<64x128xbf16, #tpu.memory_space<vmem>>, %arg2: memref<128x256xbf16, #tpu.memory_space<vmem>>, %arg3: memref<1x256xf32, #tpu.memory_space<vmem>>, %arg4: memref<1x256xf32, #tpu.memory_space<vmem>>, %arg5: memref<64x256xbf16, #tpu.memory_space<vmem>>) attributes {dimension_semantics = [#tpu.dimension_semantics<parallel>], iteration_bounds = array<i64: 2>, scalar_prefetch = 0 : i64, scratch_operands = 0 : i64, tpu.core_type = #tpu.core_type<tc>, window_params = [{transform_indices = @transform_0, window_bounds = array<i64: 64, 128>}, {pipeline_mode = #tpu.pipeline_mode<synchronous>, transform_indices = @transform_1, window_bounds = array<i64: 128, 256>}, {pipeline_mode = #tpu.pipeline_mode<synchronous>, transform_indices = @transform_2, window_bounds = array<i64: 1, 256>}, {pipeline_mode = #tpu.pipeline_mode<synchronous>, transform_indices = @transform_3, window_bounds = array<i64: 1, 256>}, {transform_indices = @transform_4, window_bounds = array<i64: 64, 256>}]} {
    %c0 = arith.constant 0 : index
    %c0_0 = arith.constant 0 : index
    %0 = vector.load %arg1[%c0, %c0_0] : memref<64x128xbf16, #tpu.memory_space<vmem>>, vector<64x128xbf16>
    %c0_1 = arith.constant 0 : index
    %c0_2 = arith.constant 0 : index
    %1 = vector.load %arg2[%c0_1, %c0_2] : memref<128x256xbf16, #tpu.memory_space<vmem>>, vector<128x256xbf16>
    %cst = arith.constant dense<0.000000e+00> : vector<64x256xf32>
    %2 = tpu.matmul %0, %1, %cst {dimension_numbers = #tpu.dot_dimension_numbers<[1], [0], [0], [1], [0, 0, 1, 1], [], []>} : vector<64x128xbf16>, vector<128x256xbf16>, vector<64x256xf32> -> vector<64x256xf32>
    %c0_3 = arith.constant 0 : index
    %c0_4 = arith.constant 0 : index
    %3 = vector.load %arg3[%c0_3, %c0_4] : memref<1x256xf32, #tpu.memory_space<vmem>>, vector<1x256xf32>
    %4 = vector.broadcast %3 : vector<1x256xf32> to vector<64x256xf32>
    %5 = arith.mulf %2, %4 : vector<64x256xf32>
    %c0_5 = arith.constant 0 : index
    %c0_6 = arith.constant 0 : index
    %6 = vector.load %arg4[%c0_5, %c0_6] : memref<1x256xf32, #tpu.memory_space<vmem>>, vector<1x256xf32>
    %7 = vector.broadcast %6 : vector<1x256xf32> to vector<64x256xf32>
    %8 = arith.addf %5, %7 : vector<64x256xf32>
    %9 = arith.negf %8 : vector<64x256xf32>
    %10 = math.exp %9 : vector<64x256xf32>
    %cst_7 = arith.constant 1.000000e+00 : f32
    %11 = vector.broadcast %cst_7 : f32 to vector<64x256xf32>
    %12 = arith.addf %11, %10 : vector<64x256xf32>
    %13 = arith.divf %11, %12 : vector<64x256xf32>
    %14 = arith.mulf %8, %13 : vector<64x256xf32>
    %15 = arith.truncf %14 : vector<64x256xf32> to vector<64x256xbf16>
    %c0_8 = arith.constant 0 : index
    %c0_9 = arith.constant 0 : index
    %16 = vector.load %arg5[%c0_8, %c0_9] : memref<64x256xbf16, #tpu.memory_space<vmem>>, vector<64x256xbf16>
    tpu.vector_store %arg5[%c0_8, %c0_9], %15 {strides = array<i32>} : memref<64x256xbf16, #tpu.memory_space<vmem>>, vector<64x256xbf16>,
    return
  }
  func.func @transform_0(%arg0: i32) -> (i32, i32) {
    %c0_i32 = arith.constant 0 : i32
    %c0_i32_0 = arith.constant 0 : i32
    return %arg0, %c0_i32 : i32, i32
  }
  func.func @transform_1(%arg0: i32) -> (i32, i32) {
    %c0_i32 = arith.constant 0 : i32
    %c0_i32_0 = arith.constant 0 : i32
    %c0_i32_1 = arith.constant 0 : i32
    return %c0_i32, %c0_i32_0 : i32, i32
  }
  func.func @transform_2(%arg0: i32) -> (i32, i32) {
    %c0_i32 = arith.constant 0 : i32
    %c0_i32_0 = arith.constant 0 : i32
    %c0_i32_1 = arith.constant 0 : i32
    return %c0_i32, %c0_i32_0 : i32, i32
  }
  func.func @transform_3(%arg0: i32) -> (i32, i32) {
    %c0_i32 = arith.constant 0 : i32
    %c0_i32_0 = arith.constant 0 : i32
    %c0_i32_1 = arith.constant 0 : i32
    return %c0_i32, %c0_i32_0 : i32, i32
  }
  func.func @transform_4(%arg0: i32) -> (i32, i32) {
    %c0_i32 = arith.constant 0 : i32
    %c0_i32_0 = arith.constant 0 : i32
    return %arg0, %c0_i32 : i32, i32
  }
}

module attributes {stable_mosaic.version = 11 : i64} {
  func.func @_dw_s2_kernel(%arg0: i32, %arg1: memref<1x5x5x1024xbf16, #tpu.memory_space<vmem>>, %arg2: memref<9x256xbf16, #tpu.memory_space<vmem>>, %arg3: memref<1x256xf32, #tpu.memory_space<vmem>>, %arg4: memref<1x256xf32, #tpu.memory_space<vmem>>, %arg5: memref<1x4x4x256xbf16, #tpu.memory_space<vmem>>) attributes {dimension_semantics = [#tpu.dimension_semantics<parallel>], iteration_bounds = array<i64: 2>, scalar_prefetch = 0 : i64, scratch_operands = 0 : i64, tpu.core_type = #tpu.core_type<tc>, window_params = [{transform_indices = @transform_0, window_bounds = array<i64: 1, 5, 5, 1024>}, {pipeline_mode = #tpu.pipeline_mode<synchronous>, transform_indices = @transform_1, window_bounds = array<i64: 9, 256>}, {pipeline_mode = #tpu.pipeline_mode<synchronous>, transform_indices = @transform_2, window_bounds = array<i64: 1, 256>}, {pipeline_mode = #tpu.pipeline_mode<synchronous>, transform_indices = @transform_3, window_bounds = array<i64: 1, 256>}, {transform_indices = @transform_4, window_bounds = array<i64: 1, 4, 4, 256>}]} {
    %c0 = arith.constant 0 : index
    %c0_0 = arith.constant 0 : index
    %c0_1 = arith.constant 0 : index
    %c0_2 = arith.constant 0 : index
    %0 = vector.load %arg1[%c0, %c0_0, %c0_1, %c0_2] : memref<1x5x5x1024xbf16, #tpu.memory_space<vmem>>, vector<1x5x5x1024xbf16>
    %1 = vector.shape_cast %0 : vector<1x5x5x1024xbf16> to vector<5x5x1024xbf16>
    %cst = arith.constant 0.000000e+00 : f32
    %2 = vector.broadcast %cst : f32 to vector<4x4x256xf32>
    %3 = vector.extract_strided_slice %1 {offsets = [0, 0, 0], sizes = [4, 4, 256], strides = [1, 1, 1]} : vector<5x5x1024xbf16> to vector<4x4x256xbf16>
    %4 = arith.extf %3 : vector<4x4x256xbf16> to vector<4x4x256xf32>
    %c0_3 = arith.constant 0 : index
    %c0_4 = arith.constant 0 : index
    %5 = vector.load %arg2[%c0_3, %c0_4] : memref<9x256xbf16, #tpu.memory_space<vmem>>, vector<1x256xbf16>
    %6 = vector.shape_cast %5 : vector<1x256xbf16> to vector<256xbf16>
    %7 = arith.extf %6 : vector<256xbf16> to vector<256xf32>
    %8 = vector.shape_cast %7 : vector<256xf32> to vector<1x1x256xf32>
    %9 = vector.broadcast %8 : vector<1x1x256xf32> to vector<4x4x256xf32>
    %10 = arith.mulf %4, %9 : vector<4x4x256xf32>
    %11 = arith.addf %2, %10 : vector<4x4x256xf32>
    %12 = vector.extract_strided_slice %1 {offsets = [0, 0, 256], sizes = [4, 4, 256], strides = [1, 1, 1]} : vector<5x5x1024xbf16> to vector<4x4x256xbf16>
    %13 = arith.extf %12 : vector<4x4x256xbf16> to vector<4x4x256xf32>
    %c1 = arith.constant 1 : index
    %c0_5 = arith.constant 0 : index
    %14 = vector.load %arg2[%c1, %c0_5] : memref<9x256xbf16, #tpu.memory_space<vmem>>, vector<1x256xbf16>
    %15 = vector.shape_cast %14 : vector<1x256xbf16> to vector<256xbf16>
    %16 = arith.extf %15 : vector<256xbf16> to vector<256xf32>
    %17 = vector.shape_cast %16 : vector<256xf32> to vector<1x1x256xf32>
    %18 = vector.broadcast %17 : vector<1x1x256xf32> to vector<4x4x256xf32>
    %19 = arith.mulf %13, %18 : vector<4x4x256xf32>
    %20 = arith.addf %11, %19 : vector<4x4x256xf32>
    %21 = vector.extract_strided_slice %1 {offsets = [0, 1, 0], sizes = [4, 4, 256], strides = [1, 1, 1]} : vector<5x5x1024xbf16> to vector<4x4x256xbf16>
    %22 = arith.extf %21 : vector<4x4x256xbf16> to vector<4x4x256xf32>
    %c2 = arith.constant 2 : index
    %c0_6 = arith.constant 0 : index
    %23 = vector.load %arg2[%c2, %c0_6] : memref<9x256xbf16, #tpu.memory_space<vmem>>, vector<1x256xbf16>
    %24 = vector.shape_cast %23 : vector<1x256xbf16> to vector<256xbf16>
    %25 = arith.extf %24 : vector<256xbf16> to vector<256xf32>
    %26 = vector.shape_cast %25 : vector<256xf32> to vector<1x1x256xf32>
    %27 = vector.broadcast %26 : vector<1x1x256xf32> to vector<4x4x256xf32>
    %28 = arith.mulf %22, %27 : vector<4x4x256xf32>
    %29 = arith.addf %20, %28 : vector<4x4x256xf32>
    %30 = vector.extract_strided_slice %1 {offsets = [0, 0, 512], sizes = [4, 4, 256], strides = [1, 1, 1]} : vector<5x5x1024xbf16> to vector<4x4x256xbf16>
    %31 = arith.extf %30 : vector<4x4x256xbf16> to vector<4x4x256xf32>
    %c3 = arith.constant 3 : index
    %c0_7 = arith.constant 0 : index
    %32 = vector.load %arg2[%c3, %c0_7] : memref<9x256xbf16, #tpu.memory_space<vmem>>, vector<1x256xbf16>
    %33 = vector.shape_cast %32 : vector<1x256xbf16> to vector<256xbf16>
    %34 = arith.extf %33 : vector<256xbf16> to vector<256xf32>
    %35 = vector.shape_cast %34 : vector<256xf32> to vector<1x1x256xf32>
    %36 = vector.broadcast %35 : vector<1x1x256xf32> to vector<4x4x256xf32>
    %37 = arith.mulf %31, %36 : vector<4x4x256xf32>
    %38 = arith.addf %29, %37 : vector<4x4x256xf32>
    %39 = vector.extract_strided_slice %1 {offsets = [0, 0, 768], sizes = [4, 4, 256], strides = [1, 1, 1]} : vector<5x5x1024xbf16> to vector<4x4x256xbf16>
    %40 = arith.extf %39 : vector<4x4x256xbf16> to vector<4x4x256xf32>
    %c4 = arith.constant 4 : index
    %c0_8 = arith.constant 0 : index
    %41 = vector.load %arg2[%c4, %c0_8] : memref<9x256xbf16, #tpu.memory_space<vmem>>, vector<1x256xbf16>
    %42 = vector.shape_cast %41 : vector<1x256xbf16> to vector<256xbf16>
    %43 = arith.extf %42 : vector<256xbf16> to vector<256xf32>
    %44 = vector.shape_cast %43 : vector<256xf32> to vector<1x1x256xf32>
    %45 = vector.broadcast %44 : vector<1x1x256xf32> to vector<4x4x256xf32>
    %46 = arith.mulf %40, %45 : vector<4x4x256xf32>
    %47 = arith.addf %38, %46 : vector<4x4x256xf32>
    %48 = vector.extract_strided_slice %1 {offsets = [0, 1, 512], sizes = [4, 4, 256], strides = [1, 1, 1]} : vector<5x5x1024xbf16> to vector<4x4x256xbf16>
    %49 = arith.extf %48 : vector<4x4x256xbf16> to vector<4x4x256xf32>
    %c5 = arith.constant 5 : index
    %c0_9 = arith.constant 0 : index
    %50 = vector.load %arg2[%c5, %c0_9] : memref<9x256xbf16, #tpu.memory_space<vmem>>, vector<1x256xbf16>
    %51 = vector.shape_cast %50 : vector<1x256xbf16> to vector<256xbf16>
    %52 = arith.extf %51 : vector<256xbf16> to vector<256xf32>
    %53 = vector.shape_cast %52 : vector<256xf32> to vector<1x1x256xf32>
    %54 = vector.broadcast %53 : vector<1x1x256xf32> to vector<4x4x256xf32>
    %55 = arith.mulf %49, %54 : vector<4x4x256xf32>
    %56 = arith.addf %47, %55 : vector<4x4x256xf32>
    %57 = vector.extract_strided_slice %1 {offsets = [1, 0, 0], sizes = [4, 4, 256], strides = [1, 1, 1]} : vector<5x5x1024xbf16> to vector<4x4x256xbf16>
    %58 = arith.extf %57 : vector<4x4x256xbf16> to vector<4x4x256xf32>
    %c6 = arith.constant 6 : index
    %c0_10 = arith.constant 0 : index
    %59 = vector.load %arg2[%c6, %c0_10] : memref<9x256xbf16, #tpu.memory_space<vmem>>, vector<1x256xbf16>
    %60 = vector.shape_cast %59 : vector<1x256xbf16> to vector<256xbf16>
    %61 = arith.extf %60 : vector<256xbf16> to vector<256xf32>
    %62 = vector.shape_cast %61 : vector<256xf32> to vector<1x1x256xf32>
    %63 = vector.broadcast %62 : vector<1x1x256xf32> to vector<4x4x256xf32>
    %64 = arith.mulf %58, %63 : vector<4x4x256xf32>
    %65 = arith.addf %56, %64 : vector<4x4x256xf32>
    %66 = vector.extract_strided_slice %1 {offsets = [1, 0, 256], sizes = [4, 4, 256], strides = [1, 1, 1]} : vector<5x5x1024xbf16> to vector<4x4x256xbf16>
    %67 = arith.extf %66 : vector<4x4x256xbf16> to vector<4x4x256xf32>
    %c7 = arith.constant 7 : index
    %c0_11 = arith.constant 0 : index
    %68 = vector.load %arg2[%c7, %c0_11] : memref<9x256xbf16, #tpu.memory_space<vmem>>, vector<1x256xbf16>
    %69 = vector.shape_cast %68 : vector<1x256xbf16> to vector<256xbf16>
    %70 = arith.extf %69 : vector<256xbf16> to vector<256xf32>
    %71 = vector.shape_cast %70 : vector<256xf32> to vector<1x1x256xf32>
    %72 = vector.broadcast %71 : vector<1x1x256xf32> to vector<4x4x256xf32>
    %73 = arith.mulf %67, %72 : vector<4x4x256xf32>
    %74 = arith.addf %65, %73 : vector<4x4x256xf32>
    %75 = vector.extract_strided_slice %1 {offsets = [1, 1, 0], sizes = [4, 4, 256], strides = [1, 1, 1]} : vector<5x5x1024xbf16> to vector<4x4x256xbf16>
    %76 = arith.extf %75 : vector<4x4x256xbf16> to vector<4x4x256xf32>
    %c8 = arith.constant 8 : index
    %c0_12 = arith.constant 0 : index
    %77 = vector.load %arg2[%c8, %c0_12] : memref<9x256xbf16, #tpu.memory_space<vmem>>, vector<1x256xbf16>
    %78 = vector.shape_cast %77 : vector<1x256xbf16> to vector<256xbf16>
    %79 = arith.extf %78 : vector<256xbf16> to vector<256xf32>
    %80 = vector.shape_cast %79 : vector<256xf32> to vector<1x1x256xf32>
    %81 = vector.broadcast %80 : vector<1x1x256xf32> to vector<4x4x256xf32>
    %82 = arith.mulf %76, %81 : vector<4x4x256xf32>
    %83 = arith.addf %74, %82 : vector<4x4x256xf32>
    %c0_13 = arith.constant 0 : index
    %c0_14 = arith.constant 0 : index
    %84 = vector.load %arg3[%c0_13, %c0_14] : memref<1x256xf32, #tpu.memory_space<vmem>>, vector<1x256xf32>
    %85 = vector.shape_cast %84 : vector<1x256xf32> to vector<256xf32>
    %86 = vector.shape_cast %85 : vector<256xf32> to vector<1x1x256xf32>
    %87 = vector.broadcast %86 : vector<1x1x256xf32> to vector<4x4x256xf32>
    %88 = arith.mulf %83, %87 : vector<4x4x256xf32>
    %c0_15 = arith.constant 0 : index
    %c0_16 = arith.constant 0 : index
    %89 = vector.load %arg4[%c0_15, %c0_16] : memref<1x256xf32, #tpu.memory_space<vmem>>, vector<1x256xf32>
    %90 = vector.shape_cast %89 : vector<1x256xf32> to vector<256xf32>
    %91 = vector.shape_cast %90 : vector<256xf32> to vector<1x1x256xf32>
    %92 = vector.broadcast %91 : vector<1x1x256xf32> to vector<4x4x256xf32>
    %93 = arith.addf %88, %92 : vector<4x4x256xf32>
    %94 = arith.negf %93 : vector<4x4x256xf32>
    %95 = math.exp %94 : vector<4x4x256xf32>
    %cst_17 = arith.constant 1.000000e+00 : f32
    %96 = vector.broadcast %cst_17 : f32 to vector<4x4x256xf32>
    %97 = arith.addf %96, %95 : vector<4x4x256xf32>
    %98 = arith.divf %96, %97 : vector<4x4x256xf32>
    %99 = arith.mulf %93, %98 : vector<4x4x256xf32>
    %100 = arith.truncf %99 : vector<4x4x256xf32> to vector<4x4x256xbf16>
    %c0_18 = arith.constant 0 : index
    %c0_19 = arith.constant 0 : index
    %c0_20 = arith.constant 0 : index
    %c0_21 = arith.constant 0 : index
    %101 = vector.load %arg5[%c0_18, %c0_19, %c0_20, %c0_21] : memref<1x4x4x256xbf16, #tpu.memory_space<vmem>>, vector<1x4x4x256xbf16>
    %102 = vector.shape_cast %101 : vector<1x4x4x256xbf16> to vector<4x4x256xbf16>
    %103 = vector.shape_cast %100 : vector<4x4x256xbf16> to vector<1x4x4x256xbf16>
    tpu.vector_store %arg5[%c0_18, %c0_19, %c0_20, %c0_21], %103 {strides = array<i32>} : memref<1x4x4x256xbf16, #tpu.memory_space<vmem>>, vector<1x4x4x256xbf16>,
    return
  }
  func.func @transform_0(%arg0: i32) -> (i32, i32, i32, i32) {
    %c0_i32 = arith.constant 0 : i32
    %c0_i32_0 = arith.constant 0 : i32
    %c0_i32_1 = arith.constant 0 : i32
    %c0_i32_2 = arith.constant 0 : i32
    return %arg0, %c0_i32, %c0_i32_0, %c0_i32_1 : i32, i32, i32, i32
  }
  func.func @transform_1(%arg0: i32) -> (i32, i32) {
    %c0_i32 = arith.constant 0 : i32
    %c0_i32_0 = arith.constant 0 : i32
    %c0_i32_1 = arith.constant 0 : i32
    return %c0_i32, %c0_i32_0 : i32, i32
  }
  func.func @transform_2(%arg0: i32) -> (i32, i32) {
    %c0_i32 = arith.constant 0 : i32
    %c0_i32_0 = arith.constant 0 : i32
    %c0_i32_1 = arith.constant 0 : i32
    return %c0_i32, %c0_i32_0 : i32, i32
  }
  func.func @transform_3(%arg0: i32) -> (i32, i32) {
    %c0_i32 = arith.constant 0 : i32
    %c0_i32_0 = arith.constant 0 : i32
    %c0_i32_1 = arith.constant 0 : i32
    return %c0_i32, %c0_i32_0 : i32, i32
  }
  func.func @transform_4(%arg0: i32) -> (i32, i32, i32, i32) {
    %c0_i32 = arith.constant 0 : i32
    %c0_i32_0 = arith.constant 0 : i32
    %c0_i32_1 = arith.constant 0 : i32
    %c0_i32_2 = arith.constant 0 : i32
    return %arg0, %c0_i32, %c0_i32_0, %c0_i32_1 : i32, i32, i32, i32
  }
}

module attributes {stable_mosaic.version = 11 : i64} {
  func.func @_mm_bn_act_kernel(%arg0: i32, %arg1: memref<16x256xbf16, #tpu.memory_space<vmem>>, %arg2: memref<256x128xbf16, #tpu.memory_space<vmem>>, %arg3: memref<1x128xf32, #tpu.memory_space<vmem>>, %arg4: memref<1x128xf32, #tpu.memory_space<vmem>>, %arg5: memref<16x128xbf16, #tpu.memory_space<vmem>>) attributes {dimension_semantics = [#tpu.dimension_semantics<parallel>], iteration_bounds = array<i64: 2>, scalar_prefetch = 0 : i64, scratch_operands = 0 : i64, tpu.core_type = #tpu.core_type<tc>, window_params = [{transform_indices = @transform_0, window_bounds = array<i64: 16, 256>}, {pipeline_mode = #tpu.pipeline_mode<synchronous>, transform_indices = @transform_1, window_bounds = array<i64: 256, 128>}, {pipeline_mode = #tpu.pipeline_mode<synchronous>, transform_indices = @transform_2, window_bounds = array<i64: 1, 128>}, {pipeline_mode = #tpu.pipeline_mode<synchronous>, transform_indices = @transform_3, window_bounds = array<i64: 1, 128>}, {transform_indices = @transform_4, window_bounds = array<i64: 16, 128>}]} {
    %c0 = arith.constant 0 : index
    %c0_0 = arith.constant 0 : index
    %0 = vector.load %arg1[%c0, %c0_0] : memref<16x256xbf16, #tpu.memory_space<vmem>>, vector<16x256xbf16>
    %c0_1 = arith.constant 0 : index
    %c0_2 = arith.constant 0 : index
    %1 = vector.load %arg2[%c0_1, %c0_2] : memref<256x128xbf16, #tpu.memory_space<vmem>>, vector<256x128xbf16>
    %cst = arith.constant dense<0.000000e+00> : vector<16x128xf32>
    %2 = tpu.matmul %0, %1, %cst {dimension_numbers = #tpu.dot_dimension_numbers<[1], [0], [0], [1], [0, 0, 1, 1], [], []>} : vector<16x256xbf16>, vector<256x128xbf16>, vector<16x128xf32> -> vector<16x128xf32>
    %c0_3 = arith.constant 0 : index
    %c0_4 = arith.constant 0 : index
    %3 = vector.load %arg3[%c0_3, %c0_4] : memref<1x128xf32, #tpu.memory_space<vmem>>, vector<1x128xf32>
    %4 = vector.broadcast %3 : vector<1x128xf32> to vector<16x128xf32>
    %5 = arith.mulf %2, %4 : vector<16x128xf32>
    %c0_5 = arith.constant 0 : index
    %c0_6 = arith.constant 0 : index
    %6 = vector.load %arg4[%c0_5, %c0_6] : memref<1x128xf32, #tpu.memory_space<vmem>>, vector<1x128xf32>
    %7 = vector.broadcast %6 : vector<1x128xf32> to vector<16x128xf32>
    %8 = arith.addf %5, %7 : vector<16x128xf32>
    %9 = arith.truncf %8 : vector<16x128xf32> to vector<16x128xbf16>
    %c0_7 = arith.constant 0 : index
    %c0_8 = arith.constant 0 : index
    %10 = vector.load %arg5[%c0_7, %c0_8] : memref<16x128xbf16, #tpu.memory_space<vmem>>, vector<16x128xbf16>
    tpu.vector_store %arg5[%c0_7, %c0_8], %9 {strides = array<i32>} : memref<16x128xbf16, #tpu.memory_space<vmem>>, vector<16x128xbf16>,
    return
  }
  func.func @transform_0(%arg0: i32) -> (i32, i32) {
    %c0_i32 = arith.constant 0 : i32
    %c0_i32_0 = arith.constant 0 : i32
    return %arg0, %c0_i32 : i32, i32
  }
  func.func @transform_1(%arg0: i32) -> (i32, i32) {
    %c0_i32 = arith.constant 0 : i32
    %c0_i32_0 = arith.constant 0 : i32
    %c0_i32_1 = arith.constant 0 : i32
    return %c0_i32, %c0_i32_0 : i32, i32
  }
  func.func @transform_2(%arg0: i32) -> (i32, i32) {
    %c0_i32 = arith.constant 0 : i32
    %c0_i32_0 = arith.constant 0 : i32
    %c0_i32_1 = arith.constant 0 : i32
    return %c0_i32, %c0_i32_0 : i32, i32
  }
  func.func @transform_3(%arg0: i32) -> (i32, i32) {
    %c0_i32 = arith.constant 0 : i32
    %c0_i32_0 = arith.constant 0 : i32
    %c0_i32_1 = arith.constant 0 : i32
    return %c0_i32, %c0_i32_0 : i32, i32
  }
  func.func @transform_4(%arg0: i32) -> (i32, i32) {
    %c0_i32 = arith.constant 0 : i32
    %c0_i32_0 = arith.constant 0 : i32
    return %arg0, %c0_i32 : i32, i32
  }
}

module attributes {stable_mosaic.version = 11 : i64} {
  func.func @_mm_bn_act_kernel(%arg0: i32, %arg1: memref<16x128xbf16, #tpu.memory_space<vmem>>, %arg2: memref<128x256xbf16, #tpu.memory_space<vmem>>, %arg3: memref<1x256xf32, #tpu.memory_space<vmem>>, %arg4: memref<1x256xf32, #tpu.memory_space<vmem>>, %arg5: memref<16x256xbf16, #tpu.memory_space<vmem>>) attributes {dimension_semantics = [#tpu.dimension_semantics<parallel>], iteration_bounds = array<i64: 2>, scalar_prefetch = 0 : i64, scratch_operands = 0 : i64, tpu.core_type = #tpu.core_type<tc>, window_params = [{transform_indices = @transform_0, window_bounds = array<i64: 16, 128>}, {pipeline_mode = #tpu.pipeline_mode<synchronous>, transform_indices = @transform_1, window_bounds = array<i64: 128, 256>}, {pipeline_mode = #tpu.pipeline_mode<synchronous>, transform_indices = @transform_2, window_bounds = array<i64: 1, 256>}, {pipeline_mode = #tpu.pipeline_mode<synchronous>, transform_indices = @transform_3, window_bounds = array<i64: 1, 256>}, {transform_indices = @transform_4, window_bounds = array<i64: 16, 256>}]} {
    %c0 = arith.constant 0 : index
    %c0_0 = arith.constant 0 : index
    %0 = vector.load %arg1[%c0, %c0_0] : memref<16x128xbf16, #tpu.memory_space<vmem>>, vector<16x128xbf16>
    %c0_1 = arith.constant 0 : index
    %c0_2 = arith.constant 0 : index
    %1 = vector.load %arg2[%c0_1, %c0_2] : memref<128x256xbf16, #tpu.memory_space<vmem>>, vector<128x256xbf16>
    %cst = arith.constant dense<0.000000e+00> : vector<16x256xf32>
    %2 = tpu.matmul %0, %1, %cst {dimension_numbers = #tpu.dot_dimension_numbers<[1], [0], [0], [1], [0, 0, 1, 1], [], []>} : vector<16x128xbf16>, vector<128x256xbf16>, vector<16x256xf32> -> vector<16x256xf32>
    %c0_3 = arith.constant 0 : index
    %c0_4 = arith.constant 0 : index
    %3 = vector.load %arg3[%c0_3, %c0_4] : memref<1x256xf32, #tpu.memory_space<vmem>>, vector<1x256xf32>
    %4 = vector.broadcast %3 : vector<1x256xf32> to vector<16x256xf32>
    %5 = arith.mulf %2, %4 : vector<16x256xf32>
    %c0_5 = arith.constant 0 : index
    %c0_6 = arith.constant 0 : index
    %6 = vector.load %arg4[%c0_5, %c0_6] : memref<1x256xf32, #tpu.memory_space<vmem>>, vector<1x256xf32>
    %7 = vector.broadcast %6 : vector<1x256xf32> to vector<16x256xf32>
    %8 = arith.addf %5, %7 : vector<16x256xf32>
    %9 = arith.negf %8 : vector<16x256xf32>
    %10 = math.exp %9 : vector<16x256xf32>
    %cst_7 = arith.constant 1.000000e+00 : f32
    %11 = vector.broadcast %cst_7 : f32 to vector<16x256xf32>
    %12 = arith.addf %11, %10 : vector<16x256xf32>
    %13 = arith.divf %11, %12 : vector<16x256xf32>
    %14 = arith.mulf %8, %13 : vector<16x256xf32>
    %15 = arith.truncf %14 : vector<16x256xf32> to vector<16x256xbf16>
    %c0_8 = arith.constant 0 : index
    %c0_9 = arith.constant 0 : index
    %16 = vector.load %arg5[%c0_8, %c0_9] : memref<16x256xbf16, #tpu.memory_space<vmem>>, vector<16x256xbf16>
    tpu.vector_store %arg5[%c0_8, %c0_9], %15 {strides = array<i32>} : memref<16x256xbf16, #tpu.memory_space<vmem>>, vector<16x256xbf16>,
    return
  }
  func.func @transform_0(%arg0: i32) -> (i32, i32) {
    %c0_i32 = arith.constant 0 : i32
    %c0_i32_0 = arith.constant 0 : i32
    return %arg0, %c0_i32 : i32, i32
  }
  func.func @transform_1(%arg0: i32) -> (i32, i32) {
    %c0_i32 = arith.constant 0 : i32
    %c0_i32_0 = arith.constant 0 : i32
    %c0_i32_1 = arith.constant 0 : i32
    return %c0_i32, %c0_i32_0 : i32, i32
  }
  func.func @transform_2(%arg0: i32) -> (i32, i32) {
    %c0_i32 = arith.constant 0 : i32
    %c0_i32_0 = arith.constant 0 : i32
    %c0_i32_1 = arith.constant 0 : i32
    return %c0_i32, %c0_i32_0 : i32, i32
  }
  func.func @transform_3(%arg0: i32) -> (i32, i32) {
    %c0_i32 = arith.constant 0 : i32
    %c0_i32_0 = arith.constant 0 : i32
    %c0_i32_1 = arith.constant 0 : i32
    return %c0_i32, %c0_i32_0 : i32, i32
  }
  func.func @transform_4(%arg0: i32) -> (i32, i32) {
    %c0_i32 = arith.constant 0 : i32
    %c0_i32_0 = arith.constant 0 : i32
    return %arg0, %c0_i32 : i32, i32
  }
}

module attributes {stable_mosaic.version = 11 : i64} {
  func.func @_dw_s2_kernel(%arg0: i32, %arg1: memref<1x3x3x1024xbf16, #tpu.memory_space<vmem>>, %arg2: memref<9x256xbf16, #tpu.memory_space<vmem>>, %arg3: memref<1x256xf32, #tpu.memory_space<vmem>>, %arg4: memref<1x256xf32, #tpu.memory_space<vmem>>, %arg5: memref<1x2x2x256xbf16, #tpu.memory_space<vmem>>) attributes {dimension_semantics = [#tpu.dimension_semantics<parallel>], iteration_bounds = array<i64: 2>, scalar_prefetch = 0 : i64, scratch_operands = 0 : i64, tpu.core_type = #tpu.core_type<tc>, window_params = [{transform_indices = @transform_0, window_bounds = array<i64: 1, 3, 3, 1024>}, {pipeline_mode = #tpu.pipeline_mode<synchronous>, transform_indices = @transform_1, window_bounds = array<i64: 9, 256>}, {pipeline_mode = #tpu.pipeline_mode<synchronous>, transform_indices = @transform_2, window_bounds = array<i64: 1, 256>}, {pipeline_mode = #tpu.pipeline_mode<synchronous>, transform_indices = @transform_3, window_bounds = array<i64: 1, 256>}, {transform_indices = @transform_4, window_bounds = array<i64: 1, 2, 2, 256>}]} {
    %c0 = arith.constant 0 : index
    %c0_0 = arith.constant 0 : index
    %c0_1 = arith.constant 0 : index
    %c0_2 = arith.constant 0 : index
    %0 = vector.load %arg1[%c0, %c0_0, %c0_1, %c0_2] : memref<1x3x3x1024xbf16, #tpu.memory_space<vmem>>, vector<1x3x3x1024xbf16>
    %1 = vector.shape_cast %0 : vector<1x3x3x1024xbf16> to vector<3x3x1024xbf16>
    %cst = arith.constant 0.000000e+00 : f32
    %2 = vector.broadcast %cst : f32 to vector<2x2x256xf32>
    %3 = vector.extract_strided_slice %1 {offsets = [0, 0, 0], sizes = [2, 2, 256], strides = [1, 1, 1]} : vector<3x3x1024xbf16> to vector<2x2x256xbf16>
    %4 = arith.extf %3 : vector<2x2x256xbf16> to vector<2x2x256xf32>
    %c0_3 = arith.constant 0 : index
    %c0_4 = arith.constant 0 : index
    %5 = vector.load %arg2[%c0_3, %c0_4] : memref<9x256xbf16, #tpu.memory_space<vmem>>, vector<1x256xbf16>
    %6 = vector.shape_cast %5 : vector<1x256xbf16> to vector<256xbf16>
    %7 = arith.extf %6 : vector<256xbf16> to vector<256xf32>
    %8 = vector.shape_cast %7 : vector<256xf32> to vector<1x1x256xf32>
    %9 = vector.broadcast %8 : vector<1x1x256xf32> to vector<2x2x256xf32>
    %10 = arith.mulf %4, %9 : vector<2x2x256xf32>
    %11 = arith.addf %2, %10 : vector<2x2x256xf32>
    %12 = vector.extract_strided_slice %1 {offsets = [0, 0, 256], sizes = [2, 2, 256], strides = [1, 1, 1]} : vector<3x3x1024xbf16> to vector<2x2x256xbf16>
    %13 = arith.extf %12 : vector<2x2x256xbf16> to vector<2x2x256xf32>
    %c1 = arith.constant 1 : index
    %c0_5 = arith.constant 0 : index
    %14 = vector.load %arg2[%c1, %c0_5] : memref<9x256xbf16, #tpu.memory_space<vmem>>, vector<1x256xbf16>
    %15 = vector.shape_cast %14 : vector<1x256xbf16> to vector<256xbf16>
    %16 = arith.extf %15 : vector<256xbf16> to vector<256xf32>
    %17 = vector.shape_cast %16 : vector<256xf32> to vector<1x1x256xf32>
    %18 = vector.broadcast %17 : vector<1x1x256xf32> to vector<2x2x256xf32>
    %19 = arith.mulf %13, %18 : vector<2x2x256xf32>
    %20 = arith.addf %11, %19 : vector<2x2x256xf32>
    %21 = vector.extract_strided_slice %1 {offsets = [0, 1, 0], sizes = [2, 2, 256], strides = [1, 1, 1]} : vector<3x3x1024xbf16> to vector<2x2x256xbf16>
    %22 = arith.extf %21 : vector<2x2x256xbf16> to vector<2x2x256xf32>
    %c2 = arith.constant 2 : index
    %c0_6 = arith.constant 0 : index
    %23 = vector.load %arg2[%c2, %c0_6] : memref<9x256xbf16, #tpu.memory_space<vmem>>, vector<1x256xbf16>
    %24 = vector.shape_cast %23 : vector<1x256xbf16> to vector<256xbf16>
    %25 = arith.extf %24 : vector<256xbf16> to vector<256xf32>
    %26 = vector.shape_cast %25 : vector<256xf32> to vector<1x1x256xf32>
    %27 = vector.broadcast %26 : vector<1x1x256xf32> to vector<2x2x256xf32>
    %28 = arith.mulf %22, %27 : vector<2x2x256xf32>
    %29 = arith.addf %20, %28 : vector<2x2x256xf32>
    %30 = vector.extract_strided_slice %1 {offsets = [0, 0, 512], sizes = [2, 2, 256], strides = [1, 1, 1]} : vector<3x3x1024xbf16> to vector<2x2x256xbf16>
    %31 = arith.extf %30 : vector<2x2x256xbf16> to vector<2x2x256xf32>
    %c3 = arith.constant 3 : index
    %c0_7 = arith.constant 0 : index
    %32 = vector.load %arg2[%c3, %c0_7] : memref<9x256xbf16, #tpu.memory_space<vmem>>, vector<1x256xbf16>
    %33 = vector.shape_cast %32 : vector<1x256xbf16> to vector<256xbf16>
    %34 = arith.extf %33 : vector<256xbf16> to vector<256xf32>
    %35 = vector.shape_cast %34 : vector<256xf32> to vector<1x1x256xf32>
    %36 = vector.broadcast %35 : vector<1x1x256xf32> to vector<2x2x256xf32>
    %37 = arith.mulf %31, %36 : vector<2x2x256xf32>
    %38 = arith.addf %29, %37 : vector<2x2x256xf32>
    %39 = vector.extract_strided_slice %1 {offsets = [0, 0, 768], sizes = [2, 2, 256], strides = [1, 1, 1]} : vector<3x3x1024xbf16> to vector<2x2x256xbf16>
    %40 = arith.extf %39 : vector<2x2x256xbf16> to vector<2x2x256xf32>
    %c4 = arith.constant 4 : index
    %c0_8 = arith.constant 0 : index
    %41 = vector.load %arg2[%c4, %c0_8] : memref<9x256xbf16, #tpu.memory_space<vmem>>, vector<1x256xbf16>
    %42 = vector.shape_cast %41 : vector<1x256xbf16> to vector<256xbf16>
    %43 = arith.extf %42 : vector<256xbf16> to vector<256xf32>
    %44 = vector.shape_cast %43 : vector<256xf32> to vector<1x1x256xf32>
    %45 = vector.broadcast %44 : vector<1x1x256xf32> to vector<2x2x256xf32>
    %46 = arith.mulf %40, %45 : vector<2x2x256xf32>
    %47 = arith.addf %38, %46 : vector<2x2x256xf32>
    %48 = vector.extract_strided_slice %1 {offsets = [0, 1, 512], sizes = [2, 2, 256], strides = [1, 1, 1]} : vector<3x3x1024xbf16> to vector<2x2x256xbf16>
    %49 = arith.extf %48 : vector<2x2x256xbf16> to vector<2x2x256xf32>
    %c5 = arith.constant 5 : index
    %c0_9 = arith.constant 0 : index
    %50 = vector.load %arg2[%c5, %c0_9] : memref<9x256xbf16, #tpu.memory_space<vmem>>, vector<1x256xbf16>
    %51 = vector.shape_cast %50 : vector<1x256xbf16> to vector<256xbf16>
    %52 = arith.extf %51 : vector<256xbf16> to vector<256xf32>
    %53 = vector.shape_cast %52 : vector<256xf32> to vector<1x1x256xf32>
    %54 = vector.broadcast %53 : vector<1x1x256xf32> to vector<2x2x256xf32>
    %55 = arith.mulf %49, %54 : vector<2x2x256xf32>
    %56 = arith.addf %47, %55 : vector<2x2x256xf32>
    %57 = vector.extract_strided_slice %1 {offsets = [1, 0, 0], sizes = [2, 2, 256], strides = [1, 1, 1]} : vector<3x3x1024xbf16> to vector<2x2x256xbf16>
    %58 = arith.extf %57 : vector<2x2x256xbf16> to vector<2x2x256xf32>
    %c6 = arith.constant 6 : index
    %c0_10 = arith.constant 0 : index
    %59 = vector.load %arg2[%c6, %c0_10] : memref<9x256xbf16, #tpu.memory_space<vmem>>, vector<1x256xbf16>
    %60 = vector.shape_cast %59 : vector<1x256xbf16> to vector<256xbf16>
    %61 = arith.extf %60 : vector<256xbf16> to vector<256xf32>
    %62 = vector.shape_cast %61 : vector<256xf32> to vector<1x1x256xf32>
    %63 = vector.broadcast %62 : vector<1x1x256xf32> to vector<2x2x256xf32>
    %64 = arith.mulf %58, %63 : vector<2x2x256xf32>
    %65 = arith.addf %56, %64 : vector<2x2x256xf32>
    %66 = vector.extract_strided_slice %1 {offsets = [1, 0, 256], sizes = [2, 2, 256], strides = [1, 1, 1]} : vector<3x3x1024xbf16> to vector<2x2x256xbf16>
    %67 = arith.extf %66 : vector<2x2x256xbf16> to vector<2x2x256xf32>
    %c7 = arith.constant 7 : index
    %c0_11 = arith.constant 0 : index
    %68 = vector.load %arg2[%c7, %c0_11] : memref<9x256xbf16, #tpu.memory_space<vmem>>, vector<1x256xbf16>
    %69 = vector.shape_cast %68 : vector<1x256xbf16> to vector<256xbf16>
    %70 = arith.extf %69 : vector<256xbf16> to vector<256xf32>
    %71 = vector.shape_cast %70 : vector<256xf32> to vector<1x1x256xf32>
    %72 = vector.broadcast %71 : vector<1x1x256xf32> to vector<2x2x256xf32>
    %73 = arith.mulf %67, %72 : vector<2x2x256xf32>
    %74 = arith.addf %65, %73 : vector<2x2x256xf32>
    %75 = vector.extract_strided_slice %1 {offsets = [1, 1, 0], sizes = [2, 2, 256], strides = [1, 1, 1]} : vector<3x3x1024xbf16> to vector<2x2x256xbf16>
    %76 = arith.extf %75 : vector<2x2x256xbf16> to vector<2x2x256xf32>
    %c8 = arith.constant 8 : index
    %c0_12 = arith.constant 0 : index
    %77 = vector.load %arg2[%c8, %c0_12] : memref<9x256xbf16, #tpu.memory_space<vmem>>, vector<1x256xbf16>
    %78 = vector.shape_cast %77 : vector<1x256xbf16> to vector<256xbf16>
    %79 = arith.extf %78 : vector<256xbf16> to vector<256xf32>
    %80 = vector.shape_cast %79 : vector<256xf32> to vector<1x1x256xf32>
    %81 = vector.broadcast %80 : vector<1x1x256xf32> to vector<2x2x256xf32>
    %82 = arith.mulf %76, %81 : vector<2x2x256xf32>
    %83 = arith.addf %74, %82 : vector<2x2x256xf32>
    %c0_13 = arith.constant 0 : index
    %c0_14 = arith.constant 0 : index
    %84 = vector.load %arg3[%c0_13, %c0_14] : memref<1x256xf32, #tpu.memory_space<vmem>>, vector<1x256xf32>
    %85 = vector.shape_cast %84 : vector<1x256xf32> to vector<256xf32>
    %86 = vector.shape_cast %85 : vector<256xf32> to vector<1x1x256xf32>
    %87 = vector.broadcast %86 : vector<1x1x256xf32> to vector<2x2x256xf32>
    %88 = arith.mulf %83, %87 : vector<2x2x256xf32>
    %c0_15 = arith.constant 0 : index
    %c0_16 = arith.constant 0 : index
    %89 = vector.load %arg4[%c0_15, %c0_16] : memref<1x256xf32, #tpu.memory_space<vmem>>, vector<1x256xf32>
    %90 = vector.shape_cast %89 : vector<1x256xf32> to vector<256xf32>
    %91 = vector.shape_cast %90 : vector<256xf32> to vector<1x1x256xf32>
    %92 = vector.broadcast %91 : vector<1x1x256xf32> to vector<2x2x256xf32>
    %93 = arith.addf %88, %92 : vector<2x2x256xf32>
    %94 = arith.negf %93 : vector<2x2x256xf32>
    %95 = math.exp %94 : vector<2x2x256xf32>
    %cst_17 = arith.constant 1.000000e+00 : f32
    %96 = vector.broadcast %cst_17 : f32 to vector<2x2x256xf32>
    %97 = arith.addf %96, %95 : vector<2x2x256xf32>
    %98 = arith.divf %96, %97 : vector<2x2x256xf32>
    %99 = arith.mulf %93, %98 : vector<2x2x256xf32>
    %100 = arith.truncf %99 : vector<2x2x256xf32> to vector<2x2x256xbf16>
    %c0_18 = arith.constant 0 : index
    %c0_19 = arith.constant 0 : index
    %c0_20 = arith.constant 0 : index
    %c0_21 = arith.constant 0 : index
    %101 = vector.load %arg5[%c0_18, %c0_19, %c0_20, %c0_21] : memref<1x2x2x256xbf16, #tpu.memory_space<vmem>>, vector<1x2x2x256xbf16>
    %102 = vector.shape_cast %101 : vector<1x2x2x256xbf16> to vector<2x2x256xbf16>
    %103 = vector.shape_cast %100 : vector<2x2x256xbf16> to vector<1x2x2x256xbf16>
    tpu.vector_store %arg5[%c0_18, %c0_19, %c0_20, %c0_21], %103 {strides = array<i32>} : memref<1x2x2x256xbf16, #tpu.memory_space<vmem>>, vector<1x2x2x256xbf16>,
    return
  }
  func.func @transform_0(%arg0: i32) -> (i32, i32, i32, i32) {
    %c0_i32 = arith.constant 0 : i32
    %c0_i32_0 = arith.constant 0 : i32
    %c0_i32_1 = arith.constant 0 : i32
    %c0_i32_2 = arith.constant 0 : i32
    return %arg0, %c0_i32, %c0_i32_0, %c0_i32_1 : i32, i32, i32, i32
  }
  func.func @transform_1(%arg0: i32) -> (i32, i32) {
    %c0_i32 = arith.constant 0 : i32
    %c0_i32_0 = arith.constant 0 : i32
    %c0_i32_1 = arith.constant 0 : i32
    return %c0_i32, %c0_i32_0 : i32, i32
  }
  func.func @transform_2(%arg0: i32) -> (i32, i32) {
    %c0_i32 = arith.constant 0 : i32
    %c0_i32_0 = arith.constant 0 : i32
    %c0_i32_1 = arith.constant 0 : i32
    return %c0_i32, %c0_i32_0 : i32, i32
  }
  func.func @transform_3(%arg0: i32) -> (i32, i32) {
    %c0_i32 = arith.constant 0 : i32
    %c0_i32_0 = arith.constant 0 : i32
    %c0_i32_1 = arith.constant 0 : i32
    return %c0_i32, %c0_i32_0 : i32, i32
  }
  func.func @transform_4(%arg0: i32) -> (i32, i32, i32, i32) {
    %c0_i32 = arith.constant 0 : i32
    %c0_i32_0 = arith.constant 0 : i32
    %c0_i32_1 = arith.constant 0 : i32
    %c0_i32_2 = arith.constant 0 : i32
    return %arg0, %c0_i32, %c0_i32_0, %c0_i32_1 : i32, i32, i32, i32
  }
}

module attributes {stable_mosaic.version = 11 : i64} {
  func.func @_mm_dual_kernel(%arg0: i32, %arg1: memref<8x128xbf16, #tpu.memory_space<vmem>>, %arg2: memref<128x128xbf16, #tpu.memory_space<vmem>>, %arg3: memref<8x128xbf16, #tpu.memory_space<vmem>>, %arg4: memref<8x128xbf16, #tpu.memory_space<vmem>>) attributes {dimension_semantics = [#tpu.dimension_semantics<parallel>], iteration_bounds = array<i64: 1>, scalar_prefetch = 0 : i64, scratch_operands = 0 : i64, tpu.core_type = #tpu.core_type<tc>, window_params = [{transform_indices = @transform_0, window_bounds = array<i64: 8, 128>}, {pipeline_mode = #tpu.pipeline_mode<synchronous>, transform_indices = @transform_1, window_bounds = array<i64: 128, 128>}, {transform_indices = @transform_2, window_bounds = array<i64: 8, 128>}, {transform_indices = @transform_3, window_bounds = array<i64: 8, 128>}]} {
    %c0 = arith.constant 0 : index
    %c0_0 = arith.constant 0 : index
    %0 = vector.load %arg1[%c0, %c0_0] : memref<8x128xbf16, #tpu.memory_space<vmem>>, vector<8x128xbf16>
    %c0_1 = arith.constant 0 : index
    %c0_2 = arith.constant 0 : index
    %1 = vector.load %arg2[%c0_1, %c0_2] : memref<128x128xbf16, #tpu.memory_space<vmem>>, vector<128x128xbf16>
    %cst = arith.constant dense<0.000000e+00> : vector<8x128xf32>
    %2 = tpu.matmul %0, %1, %cst {dimension_numbers = #tpu.dot_dimension_numbers<[1], [0], [0], [1], [0, 0, 1, 1], [], []>} : vector<8x128xbf16>, vector<128x128xbf16>, vector<8x128xf32> -> vector<8x128xf32>
    %3 = arith.truncf %2 : vector<8x128xf32> to vector<8x128xbf16>
    %c0_3 = arith.constant 0 : index
    %c0_4 = arith.constant 0 : index
    %4 = vector.load %arg3[%c0_3, %c0_4] : memref<8x128xbf16, #tpu.memory_space<vmem>>, vector<8x128xbf16>
    tpu.vector_store %arg3[%c0_3, %c0_4], %3 {strides = array<i32>} : memref<8x128xbf16, #tpu.memory_space<vmem>>, vector<8x128xbf16>,
    %5 = arith.negf %2 : vector<8x128xf32>
    %6 = math.exp %5 : vector<8x128xf32>
    %cst_5 = arith.constant 1.000000e+00 : f32
    %7 = vector.broadcast %cst_5 : f32 to vector<8x128xf32>
    %8 = arith.addf %7, %6 : vector<8x128xf32>
    %9 = arith.divf %7, %8 : vector<8x128xf32>
    %10 = arith.mulf %2, %9 : vector<8x128xf32>
    %11 = arith.truncf %10 : vector<8x128xf32> to vector<8x128xbf16>
    %c0_6 = arith.constant 0 : index
    %c0_7 = arith.constant 0 : index
    %12 = vector.load %arg4[%c0_6, %c0_7] : memref<8x128xbf16, #tpu.memory_space<vmem>>, vector<8x128xbf16>
    tpu.vector_store %arg4[%c0_6, %c0_7], %11 {strides = array<i32>} : memref<8x128xbf16, #tpu.memory_space<vmem>>, vector<8x128xbf16>,
    return
  }
  func.func @transform_0(%arg0: i32) -> (i32, i32) {
    %c0_i32 = arith.constant 0 : i32
    %c0_i32_0 = arith.constant 0 : i32
    return %arg0, %c0_i32 : i32, i32
  }
  func.func @transform_1(%arg0: i32) -> (i32, i32) {
    %c0_i32 = arith.constant 0 : i32
    %c0_i32_0 = arith.constant 0 : i32
    %c0_i32_1 = arith.constant 0 : i32
    return %c0_i32, %c0_i32_0 : i32, i32
  }
  func.func @transform_2(%arg0: i32) -> (i32, i32) {
    %c0_i32 = arith.constant 0 : i32
    %c0_i32_0 = arith.constant 0 : i32
    return %arg0, %c0_i32 : i32, i32
  }
  func.func @transform_3(%arg0: i32) -> (i32, i32) {
    %c0_i32 = arith.constant 0 : i32
    %c0_i32_0 = arith.constant 0 : i32
    return %arg0, %c0_i32 : i32, i32
  }
}

module attributes {stable_mosaic.version = 11 : i64} {
  func.func @_mm_bn_act_kernel(%arg0: i32, %arg1: memref<8x256xbf16, #tpu.memory_space<vmem>>, %arg2: memref<256x128xbf16, #tpu.memory_space<vmem>>, %arg3: memref<1x128xf32, #tpu.memory_space<vmem>>, %arg4: memref<1x128xf32, #tpu.memory_space<vmem>>, %arg5: memref<8x128xbf16, #tpu.memory_space<vmem>>) attributes {dimension_semantics = [#tpu.dimension_semantics<parallel>], iteration_bounds = array<i64: 1>, scalar_prefetch = 0 : i64, scratch_operands = 0 : i64, tpu.core_type = #tpu.core_type<tc>, window_params = [{transform_indices = @transform_0, window_bounds = array<i64: 8, 256>}, {pipeline_mode = #tpu.pipeline_mode<synchronous>, transform_indices = @transform_1, window_bounds = array<i64: 256, 128>}, {pipeline_mode = #tpu.pipeline_mode<synchronous>, transform_indices = @transform_2, window_bounds = array<i64: 1, 128>}, {pipeline_mode = #tpu.pipeline_mode<synchronous>, transform_indices = @transform_3, window_bounds = array<i64: 1, 128>}, {transform_indices = @transform_4, window_bounds = array<i64: 8, 128>}]} {
    %c0 = arith.constant 0 : index
    %c0_0 = arith.constant 0 : index
    %0 = vector.load %arg1[%c0, %c0_0] : memref<8x256xbf16, #tpu.memory_space<vmem>>, vector<8x256xbf16>
    %c0_1 = arith.constant 0 : index
    %c0_2 = arith.constant 0 : index
    %1 = vector.load %arg2[%c0_1, %c0_2] : memref<256x128xbf16, #tpu.memory_space<vmem>>, vector<256x128xbf16>
    %cst = arith.constant dense<0.000000e+00> : vector<8x128xf32>
    %2 = tpu.matmul %0, %1, %cst {dimension_numbers = #tpu.dot_dimension_numbers<[1], [0], [0], [1], [0, 0, 1, 1], [], []>} : vector<8x256xbf16>, vector<256x128xbf16>, vector<8x128xf32> -> vector<8x128xf32>
    %c0_3 = arith.constant 0 : index
    %c0_4 = arith.constant 0 : index
    %3 = vector.load %arg3[%c0_3, %c0_4] : memref<1x128xf32, #tpu.memory_space<vmem>>, vector<1x128xf32>
    %4 = vector.broadcast %3 : vector<1x128xf32> to vector<8x128xf32>
    %5 = arith.mulf %2, %4 : vector<8x128xf32>
    %c0_5 = arith.constant 0 : index
    %c0_6 = arith.constant 0 : index
    %6 = vector.load %arg4[%c0_5, %c0_6] : memref<1x128xf32, #tpu.memory_space<vmem>>, vector<1x128xf32>
    %7 = vector.broadcast %6 : vector<1x128xf32> to vector<8x128xf32>
    %8 = arith.addf %5, %7 : vector<8x128xf32>
    %9 = arith.truncf %8 : vector<8x128xf32> to vector<8x128xbf16>
    %c0_7 = arith.constant 0 : index
    %c0_8 = arith.constant 0 : index
    %10 = vector.load %arg5[%c0_7, %c0_8] : memref<8x128xbf16, #tpu.memory_space<vmem>>, vector<8x128xbf16>
    tpu.vector_store %arg5[%c0_7, %c0_8], %9 {strides = array<i32>} : memref<8x128xbf16, #tpu.memory_space<vmem>>, vector<8x128xbf16>,
    return
  }
  func.func @transform_0(%arg0: i32) -> (i32, i32) {
    %c0_i32 = arith.constant 0 : i32
    %c0_i32_0 = arith.constant 0 : i32
    return %arg0, %c0_i32 : i32, i32
  }
  func.func @transform_1(%arg0: i32) -> (i32, i32) {
    %c0_i32 = arith.constant 0 : i32
    %c0_i32_0 = arith.constant 0 : i32
    %c0_i32_1 = arith.constant 0 : i32
    return %c0_i32, %c0_i32_0 : i32, i32
  }
  func.func @transform_2(%arg0: i32) -> (i32, i32) {
    %c0_i32 = arith.constant 0 : i32
    %c0_i32_0 = arith.constant 0 : i32
    %c0_i32_1 = arith.constant 0 : i32
    return %c0_i32, %c0_i32_0 : i32, i32
  }
  func.func @transform_3(%arg0: i32) -> (i32, i32) {
    %c0_i32 = arith.constant 0 : i32
    %c0_i32_0 = arith.constant 0 : i32
    %c0_i32_1 = arith.constant 0 : i32
    return %c0_i32, %c0_i32_0 : i32, i32
  }
  func.func @transform_4(%arg0: i32) -> (i32, i32) {
    %c0_i32 = arith.constant 0 : i32
    %c0_i32_0 = arith.constant 0 : i32
    return %arg0, %c0_i32 : i32, i32
  }
}

</mosaic_0001>

<bundles_post_ra>
// kernel: _forward_impl.12
= control target key start
LH: loop header
LB: loop body
LE: loop exit
PB: predicated region body
PF: predicated region fallthrough
CT: control target
= control target key end

     0   :  { %s694_s18 = smov 0   ;;  %s749_s0 = inlined_call_operand.vmem [shape: bf16[128,128], index: 0, kind: input, shape index: {}]   ;;  %s750_s1 = inlined_call_operand.vmem [shape: bf16[128,128], index: 1, kind: input, shape index: {}]   ;;  %s751_s2 = inlined_call_operand.vmem [shape: f32[1,128], index: 2, kind: input, shape index: {}]   ;;  %s752_s3 = inlined_call_operand.vmem [shape: f32[1,128], index: 3, kind: input, shape index: {}]   ;;  %s753_s4 = inlined_call_operand.vmem [shape: bf16[128,128], index: 4, kind: input, shape index: {}]   ;;  %s754_s5 = inlined_call_operand.vmem [shape: bf16[128,128], index: 5, kind: output, shape index: {}]  }
   0x1 LB: > { %s507_s19 = sadd.s32 4294967295, %s662_s18   ;;  %p511_p0 = scmp.ge.s32.totalorder %s662_s18, 1  ;;  %s662_s18 = sphi %s694_s18, %s15_s18  }
   0x2   : > { %p199_p1 = scmp.lt.s32.totalorder %s662_s18, 3 }
   0x4   : > { %p200_p2 = pnand %p511_p0, %p199_p1 }
   0x5   : > { %s512_s28 = sshll.u32 (!%p200_p2), %s507_s19, 3 }
   0x6   : > { %203 = sbr.rel (%p200_p2) target bundleno = 194 (0xc2), region = 40  ;;  %p233_p3 = scmp.lt.s32.totalorder (!%p200_p2), %s512_s28, 15 }
   0xb   : > { %v579_v0 = vld [vmem:[%s750_s1 + $0x38] sm:$0xff]  ;;  %v578_v1 = vld [vmem:[%s750_s1 + $0x30] sm:$0xff]  ;;  %v577_v2 = vld [vmem:[%s750_s1 + $0x28] sm:$0xff]  ;;  %s756_s28 = smov (!%p233_p3, %s512_s28), 15 }
   0xc   : > { %346 = vmatpush.bf16.msra.mxu0 %v579_v0  ;;  %622 = vmatpush.bf16.msra.mxu1 %v579_v0  ;;  %v576_v3 = vld [vmem:[%s750_s1 + $0x20] sm:$0xff]  ;;  %v575_v4 = vld [vmem:[%s750_s1 + $0x18] sm:$0xff]  ;;  %v574_v5 = vld [vmem:[%s750_s1 + $0x10] sm:$0xff]  ;;  %s723_s10 = sshll.u32 %s756_s28, 2 }
   0xd   : > { %623 = vmatpush.bf16.msra.mxu2 %v579_v0  ;;  %624 = vmatpush.bf16.msra.mxu3 %v579_v0  ;;  %v573_v6 = vld [vmem:[%s750_s1 + $0x8] sm:$0xff]  ;;  %v572_v7 = vld [vmem:[%s750_s1] sm:$0xff]  ;;  %s236_s15 = scalar_lea.vmem %s749_s0, %s723_s10  ;;  %s242_s21 = scalar_lea.vmem %s753_s4, %s723_s10 }
   0xe   : > { %v568_v8 = vld [vmem:[%s236_s15] sm:$0xff]  ;;  %v569_v9 = vld [vmem:[%s236_s15 + $0x8] sm:$0xff]  ;;  %v570_v10 = vld [vmem:[%s236_s15 + $0x10] sm:$0xff]  ;;  %s248_s26 = scalar_lea.vmem %s754_s5, %s723_s10 }
   0xf   : > { %v571_v11 = vld [vmem:[%s236_s15 + $0x18] sm:$0xff]  ;;  %v654_v14 = vld [vmem:[%s751_s2] ss:$0 sm:$0xff]  ;;  %v616_v19 = vld [vmem:[%s242_s21 + $0x8] sm:$0xff]  }
  0x10   : > { %347 = vmatpush.bf16.msra.mxu0 %v578_v1  ;;  %625 = vmatpush.bf16.msra.mxu1 %v578_v1  ;;  %v655_v16 = vld [vmem:[%s752_s3] ss:$0 sm:$0xff]  ;;  %v586_v23 = vunpack.c.l.bf16 %v616_v19  ;;  %v587_v27 = vunpack.c.h.bf16 %v616_v19  ;;  %v617_v32 = vld [vmem:[%s242_s21 + $0x10] sm:$0xff]   ;;  %v618_v33 = vld [vmem:[%s242_s21 + $0x18] sm:$0xff]  }
  0x11   : > { %626 = vmatpush.bf16.msra.mxu2 %v578_v1  ;;  %627 = vmatpush.bf16.msra.mxu3 %v578_v1  ;;  %v581_v17 = vld [vmem:[%s242_s21] sm:$0xff]   ;;  %v590_v42 = vunpack.c.l.bf16 %v617_v32  ;;  %v594_v43 = vunpack.c.l.bf16 %v618_v33  ;;  %v591_v47 = vunpack.c.h.bf16 %v617_v32  ;;  %v595_v49 = vunpack.c.h.bf16 %v618_v33 }
  0x12   : > { %v582_v22 = vunpack.c.l.bf16 %v581_v17  ;;  %v583_v25 = vunpack.c.h.bf16 %v581_v17 }
  0x14   : > { %348 = vmatpush.bf16.msra.mxu0 %v577_v2  ;;  %628 = vmatpush.bf16.msra.mxu1 %v577_v2 }
  0x15   : > { %629 = vmatpush.bf16.msra.mxu2 %v577_v2  ;;  %630 = vmatpush.bf16.msra.mxu3 %v577_v2 }
  0x18   : > { %349 = vmatpush.bf16.msra.mxu0 %v576_v3  ;;  %631 = vmatpush.bf16.msra.mxu1 %v576_v3 }
  0x19   : > { %632 = vmatpush.bf16.msra.mxu2 %v576_v3  ;;  %633 = vmatpush.bf16.msra.mxu3 %v576_v3 }
  0x1c   : > { %350 = vmatpush.bf16.msra.mxu0 %v575_v4  ;;  %634 = vmatpush.bf16.msra.mxu1 %v575_v4 }
  0x1d   : > { %635 = vmatpush.bf16.msra.mxu2 %v575_v4  ;;  %636 = vmatpush.bf16.msra.mxu3 %v575_v4 }
  0x20   : > { %351 = vmatpush.bf16.msra.mxu0 %v574_v5  ;;  %637 = vmatpush.bf16.msra.mxu1 %v574_v5 }
  0x21   : > { %638 = vmatpush.bf16.msra.mxu2 %v574_v5  ;;  %639 = vmatpush.bf16.msra.mxu3 %v574_v5 }
  0x24   : > { %352 = vmatpush.bf16.msra.mxu0 %v573_v6  ;;  %640 = vmatpush.bf16.msra.mxu1 %v573_v6 }
  0x25   : > { %641 = vmatpush.bf16.msra.mxu2 %v573_v6  ;;  %642 = vmatpush.bf16.msra.mxu3 %v573_v6 }
  0x28   : > { %353 = vmatpush.bf16.msra.mxu0 %v572_v7  ;;  %643 = vmatpush.bf16.msra.mxu1 %v572_v7 }
  0x29   : > { %644 = vmatpush.bf16.msra.mxu2 %v572_v7  ;;  %645 = vmatpush.bf16.msra.mxu3 %v572_v7 }
  0x2b   : > { %354 = vmatmul.bf16.vlgmr.msra.gmra.mxu0 %v568_v8  ;;  %359 = vmatmul.bf16.vlgmr.msra.gmra.mxu1 %v569_v9 }
  0x2c   : > { %364 = vmatmul.bf16.vlgmr.msra.gmra.mxu2 %v570_v10  ;;  %369 = vmatmul.bf16.vlgmr.msra.gmra.mxu3 %v571_v11 }
  0xa8   : > { %v355_v12 = vpop.f32.mrf.mxu0  ;;  %v360_v13 = vpop.f32.mrf.mxu1 }
  0xa9   : > { %v379_v15 = vmul.f32 %v654_v14, %v355_v12  ;;  %v381_v18 = vmul.f32 %v654_v14, %v360_v13 }
  0xab   : > { %v391_v28 = vadd.f32 %v655_v16, %v379_v15  ;;  %v393_v29 = vadd.f32 %v655_v16, %v381_v18 }
  0xad   : > { %v415_v38 = vadd.f32 %v582_v22, %v391_v28  ;;  %v417_v39 = vadd.f32 %v586_v23, %v393_v29 }
  0xaf   : > { %v365_v20 = vpop.f32.mrf.mxu2  ;;  %v370_v21 = vpop.f32.mrf.mxu3 }
  0xb0   : > { %v357_v24 = vpop.f32.mrf.mxu0  ;;  %v362_v26 = vpop.f32.mrf.mxu1  ;;  %v383_v36 = vmul.f32 %v654_v14, %v365_v20  ;;  %v385_v37 = vmul.f32 %v654_v14, %v370_v21 }
  0xb1   : > { %v380_v30 = vmul.f32 %v654_v14, %v357_v24  ;;  %v382_v31 = vmul.f32 %v654_v14, %v362_v26 }
  0xb2   : > { %v395_v50 = vadd.f32 %v655_v16, %v383_v36  ;;  %v397_v51 = vadd.f32 %v655_v16, %v385_v37 }
  0xb3   : > { %v392_v34 = vadd.f32 %v655_v16, %v380_v30  ;;  %v394_v35 = vadd.f32 %v655_v16, %v382_v31 }
  0xb4   : > { %v419_v56 = vadd.f32 %v590_v42, %v395_v50  ;;  %v421_v57 = vadd.f32 %v594_v43, %v397_v51 }
  0xb5   : > { %v416_v40 = vadd.f32 %v583_v25, %v392_v34  ;;  %v418_v41 = vadd.f32 %v587_v27, %v394_v35 }
  0xb7   : > { %v599_v44 = vpack.c.bf16 %v416_v40, %v415_v38  ;;  %v604_v45 = vpack.c.bf16 %v418_v41, %v417_v39  ;;  %v367_v46 = vpop.f32.mrf.mxu2  ;;  %v372_v48 = vpop.f32.mrf.mxu3 }
  0xb8   : > { %v384_v52 = vmul.f32 %v654_v14, %v367_v46  ;;  %v386_v53 = vmul.f32 %v654_v14, %v372_v48 }
  0xb9   : > { %600 = vst [vmem:[%s248_s26] sm:$0xff] %v599_v44  }
  0xba   : > { %619 = vst [vmem:[%s248_s26 + $0x8] sm:$0xff] %v604_v45   ;;  %v396_v54 = vadd.f32 %v655_v16, %v384_v52  ;;  %v398_v55 = vadd.f32 %v655_v16, %v386_v53 }
  0xbc   : > { %v420_v58 = vadd.f32 %v591_v47, %v396_v54  ;;  %v422_v59 = vadd.f32 %v595_v49, %v398_v55 }
  0xbe   : > { %v609_v60 = vpack.c.bf16 %v420_v58, %v419_v56  ;;  %v614_v61 = vpack.c.bf16 %v422_v59, %v421_v57 }
  0xc0   : > { %620 = vst [vmem:[%s248_s26 + $0x10] sm:$0xff] %v609_v60  }
  0xc1   : > { %621 = vst [vmem:[%s248_s26 + $0x18] sm:$0xff] %v614_v61  }
  0xc2 PF: > { %s15_s18 = sadd.s32 1, %s662_s18  }
  0xc3   : > { %p12_p4 = scmp.ge.s32.totalorder %s15_s18, 4  }
  0xc5   :  { %14 = sbr.rel (!%p12_p4) target bundleno = 1 (0x1), region = 73 }

// kernel: _forward_impl.10
= control target key start
LH: loop header
LB: loop body
LE: loop exit
PB: predicated region body
PF: predicated region fallthrough
CT: control target
= control target key end

     0   :  { %s1822_s0 = inlined_call_operand.vmem [shape: bf16[2,9,9,12], index: 0, kind: input, shape index: {}]   ;;  %s1823_s1 = inlined_call_operand.vmem [shape: bf16[4,12,128], index: 1, kind: input, shape index: {}]   ;;  %s1824_s2 = inlined_call_operand.vmem [shape: f32[1,128], index: 2, kind: input, shape index: {}]   ;;  %s1825_s3 = inlined_call_operand.vmem [shape: f32[1,128], index: 3, kind: input, shape index: {}]   ;;  %s1826_s4 = inlined_call_operand.hbm [shape: bf16[2,8,8,128], index: 4, kind: output, shape index: {0}]   ;;  %s1827_s5 = inlined_call_operand.hbm [shape: bf16[2,8,8,128], index: 5, kind: output, shape index: {1}]   ;;  %s1828_s6 = inlined_call_operand.vmem [shape: bf16[2,8,8,128], index: 6, kind: output, shape index: {2}]  }
   0x1   :  { %1829 = sst [smem:[#allocation8_spill]] %s1822_s0 }
   0x2   :  { %12 = vsyncpa [#allocation3], 0 }
   0x3   :  { %14 = vsyncpa [#allocation3 + $0x1], 0 }
   0x4   :  { %15 = vsyncpa [#allocation5], 0 }
   0x5   :  { %17 = vsyncpa [#allocation5 + $0x1], 0  ;;  %s1440_s21 = smov 0   ;;  %s1442_s22 = smov 0  }
   0x6   :  { %s1444_s23 = smov 0   ;;  %s1446_s24 = smov 0  }
   0x7 LB: > { %s1461_s25 = sadd.s32 4294967295, %s1401_s24   ;;  %s1087_s26 = sadd.s32 4294967294, %s1401_s24   ;;  %s1401_s24 = sphi %s1446_s24, %s1842_s24   ;;  %s1397_s23 = sphi %s1444_s23, %s1841_s23   ;;  %s1393_s22 = sphi %s1442_s22, %s1840_s22   ;;  %s1389_s21 = sphi %s1440_s21, %s1839_s21  }
   0x8   : > { %s1465_s27 = sadd.s32 1, %s1401_s24   ;;  %s119_s28 = sadd.s32 1, %s1397_s23 }
   0x9   : > { %s116_s29 = ssub.s32 %s1401_s24, %s1465_s27  ;;  %p129_p0 = scmp.ne.s32.totalorder %s1397_s23, %s1393_s22 }
   0xa   : > { %p117_p1 = scmp.eq.s32.totalorder %s116_s29, 0  ;;  %p130_p2 = scmp.eq.s32.totalorder %s1461_s25, 1 }
   0xb   : > { %p135_p3 = scmp.ne.s32.totalorder %s1393_s22, %s1389_s21  ;;  %p136_p4 = scmp.eq.s32.totalorder %s1087_s26, 1 }
   0xc   : > { %s1476_s30 = scalar_select %p117_p1, %s1397_s23, %s119_s28  }
   0xd   : > { %p1478_p5 = por %p130_p2, %p129_p0  ;;  %p1482_p6 = por %p136_p4, %p135_p3 }
   0xe   : > { %p1090_p7 = scmp.ge.s32.totalorder %s1401_s24, 1  ;;  %p223_p8 = scmp.lt.s32.totalorder %s1401_s24, 3 }
  0x10   : > { %p224_p9 = pnand %p1090_p7, %p223_p8 }
  0x11   : > { %p263_p10 = scmp.lt.s32.totalorder (!%p224_p9), %s1461_s25, 1  ;;  %s1832_s0 = sld [smem:[#allocation8_spill]] (!%p224_p9) }
  0x12   : > { %227 = sbr.rel (%p224_p9) target bundleno = 279 (0x117), region = 36  ;;  %s1615_s20 = sand.u32 (!%p224_p9), 1, %s1393_s22  }
  0x13   : > { %s1091_s26 = sshll.u32 (!%p224_p9), %s1615_s20, 5  ;;  %s1155_s12 = sshll.u32 (!%p224_p9), %s1461_s25, 5 }
  0x14   : > { %s1623_s28 = scalar_lea.vmem (!%p224_p9), [#allocation2], %s1091_s26  ;;  %s1632_s29 = scalar_lea.vmem (!%p224_p9), [#allocation4], %s1091_s26 }
  0x15   : > { %s943_s15 = scalar_lea.hbm (!%p224_p9), %s1826_s4, %s1155_s12  ;;  %s944_s16 = sshll.u32 (!%p224_p9), %s1623_s28, 4  ;;  %s1722_s16 = int_to_ptr.vmem [resolvable:$true] %s944_s16 }
  0x16   : > { %s946_s18 = sshll.u32 (!%p224_p9), %s943_s15, 4  ;;  %s922_s10 = scalar_lea.sflag (!%p224_p9), [#allocation3], %s1615_s20  ;;  %s947_s18 = int_to_ptr.hbm [resolvable:$true] %s946_s18 }
  0x17   : > { %vm442_vm0 = vcmask 1045504   ;;  %v1118_v0 = vld [vmem:[%s1823_s1 + $0x10] sm:$0xf]  ;;  %v1153_v1 = vld [vmem:[%s1823_s1 + $0x10] sm:$0x30]  ;;  %s1502_s17 = scalar_select %p263_p10, %s1461_s25, 1 }
  0x18   : > { %v1119_v2 = vor.u32 %v1153_v1, %v1118_v0  ;;  %v1108_v3 = vld [vmem:[%s1823_s1] sm:$0xf]  ;;  %v1151_v4 = vld [vmem:[%s1823_s1] sm:$0x30]  ;;  %v1100_v6 = vld [vmem:[%s1823_s1 + $0x8] sm:$0xf] }
  0x19   : > { %v1109_v5 = vor.u32 %v1151_v4, %v1108_v3  ;;  %v1152_v7 = vld [vmem:[%s1823_s1 + $0x8] sm:$0x30]  ;;  %v1128_v10 = vld [vmem:[%s1823_s1 + $0x18] sm:$0xf]  ;;  %v1154_v11 = vld [vmem:[%s1823_s1 + $0x18] sm:$0x30] }
  0x1a   : > { %v571_v8 = vsel %vm442_vm0, %v1119_v2, 0  ;;  %v1101_v9 = vor.u32 %v1152_v7, %v1100_v6  ;;  %s1226_s11 = smul.u32 72, %s1502_s17  ;;  %v1129_v13 = vor.u32 %v1154_v11, %v1128_v10  ;;  %vm429_vm1 = vcmask 97280   ;;  %s1150_s9 = sshll.u32 %s1502_s17, 5 }
  0x1b   : > { %580 = vmatpush.bf16.msra.mxu2 %v571_v8  ;;  %v513_v12 = vsel %vm442_vm0, %v1109_v5, 0  ;;  %vm294_vm2 = vsmask.f32 3328  ;;  %vm295_vm3 = vsmask.f32 7440  ;;  %s961_s25 = sshll.u32 %s1632_s29, 4  ;;  %s962_s25 = int_to_ptr.vmem [resolvable:$true] %s961_s25 }
  0x1c   : > { %522 = vmatpush.bf16.msra.mxu1 %v513_v12  ;;  %v444_v14 = vsel %vm442_vm0, %v1101_v9, 0  ;;  %s1523_s14 = scalar_lea.vmem %s1832_s0, %s1226_s11  ;;  %v650_v15 = vsel %vm442_vm0, %v1129_v13, 0  ;;  %vm1543_vm4 = vmor %vm294_vm2, %vm295_vm3  ;;  %s1676_s11 = scalar_lea.vmem %s1828_s6, %s1150_s9 }
  0x1d   : > { %453 = vmatpush.bf16.msra.mxu0 %v444_v14  ;;  %v276_v16 = vld [vmem:[%s1523_s14 + $0x8] sm:$0xf]  ;;  %v1528_v17 = vld [vmem:[%s1523_s14 + $0x10] sm:$0xf]  ;;  %v274_v18 = vld [vmem:[%s1523_s14] sm:$0xf]  ;;  %659 = vmatpush.bf16.msra.mxu3 %v650_v15  ;;  %s1731_s9 = scalar_lea.hbm %s1827_s5, %s1155_s12 }
  0x1e   : > { %v312_v19 = vshrl.u32 %v276_v16, 16  ;;  %v315_v20 = vshll.u32 %v276_v16, 16  ;;  %v326_v21 = vshrl.u32 %v1528_v17, 16  ;;  %v329_v22 = vshll.u32 %v1528_v17, 16  ;;  %v275_v23 = vld [vmem:[%s1523_s14 + $0x4] sm:$0x1] }
  0x1f   : > { %v484_v24 = vunpack.c.l.b16 %v276_v16  ;;  %v485_v25 = vunpack.c.l.b16 %v1528_v17  ;;  %v298_v26 = vshrl.u32 %v274_v18, 16  ;;  %v301_v27 = vshll.u32 %v274_v18, 16  ;;  %v277_v28 = vld [vmem:[%s1523_s14 + $0xc] sm:$0x1]  ;;  %v279_v29 = vld [vmem:[%s1523_s14 + $0x14] sm:$0x1] }
  0x20   : > { %v314_v30 = vrot.slane %v312_v19, 4  ;;  %v317_v31 = vrot.slane %v315_v20, 5  ;;  %v328_v32 = vrot.slane %v326_v21, 4  ;;  %v331_v33 = vrot.slane %v329_v22, 5  ;;  %v280_v34 = vld [vmem:[%s1523_s14 + $0x18] sm:$0xf] }
  0x21   : > { %v549_v35 = vpack.c.b16 %v485_v25, %v484_v24  ;;  %v300_v36 = vrot.slane %v298_v26, 4  ;;  %v303_v37 = vrot.slane %v301_v27, 5  ;;  %v483_v38 = vunpack.c.l.b16 %v274_v18  ;;  %v1548_v47 = vld [vmem:[%s1523_s14 + $0x20] sm:$0xf]  ;;  %v281_v60 = vld [vmem:[%s1523_s14 + $0x1c] sm:$0x1] }
  0x22   : > { %v307_v39 = vshll.u32 %v275_v23, 16  ;;  %v318_v40 = vor.u32 %v317_v31, %v314_v30  ;;  %v321_v41 = vshll.u32 %v277_v28, 16  ;;  %v332_v42 = vor.u32 %v331_v33, %v328_v32  ;;  %v283_v1 = vld [vmem:[%s1523_s14 + $0x24] sm:$0x1]  ;;  %v284_v19 = vld [vmem:[%s1523_s14 + $0x28] sm:$0xf] }
  0x23   : > { %1120 = vmatmul.msk.bf16.vlgmr.msra.gmra.mxu2 %vm429_vm1, %v549_v35  ;;  %v491_v43 = vpack.c.b16 %v484_v24, %v483_v38  ;;  %v304_v45 = vor.u32 %v303_v37, %v300_v36  ;;  %v335_v46 = vshll.u32 %v279_v29, 16  ;;  %v340_v48 = vshrl.u32 %v280_v34, 16  ;;  %v1566_v20 = vld [vmem:[%s1523_s14 + $0x30] sm:$0xf]  ;;  %v287_v35 = vld [vmem:[%s1523_s14 + $0x34] sm:$0x1] }
  0x24   : > { %v309_v49 = vrot.slane %v307_v39, 5  ;;  %v319_v50 = vrot.slane %v318_v40, 4  ;;  %v323_v51 = vrot.slane %v321_v41, 5  ;;  %v333_v52 = vrot.slane %v332_v42, 4  ;;  %s963_s17 = sshll.u32 %s1731_s9, 4  ;;  %s1321_s12 = sshra.s32 %s947_s18, 4  ;;  %s1322_s12 = int_to_ptr.hbm [resolvable:$true] %s1321_s12  ;;  %s964_s17 = int_to_ptr.hbm [resolvable:$true] %s963_s17 }
  0x25   : > { %1110 = vmatmul.msk.bf16.vlgmr.msra.gmra.mxu1 %vm429_vm1, %v491_v43  ;;  %v305_v53 = vrot.slane %v304_v45, 4  ;;  %v337_v54 = vrot.slane %v335_v46, 5  ;;  %v342_v55 = vrot.slane %v340_v48, 4  ;;  %v343_v56 = vshll.u32 %v280_v34, 16  ;;  %s1323_s13 = scalar_lea.hbm %s1322_s12, 32  ;;  %s1327_s19 = scalar_lea.hbm %s1826_s4, 64 }
  0x26   : > { %v324_v57 = vsel %vm1543_vm4, %v319_v50, %v323_v51  ;;  %v354_v58 = vshrl.u32 %v1548_v47, 16  ;;  %v357_v59 = vshll.u32 %v1548_v47, 16  ;;  %v349_v7 = vshll.u32 %v281_v60, 16  ;;  %v290_v50 = vld [vmem:[%s1523_s14 + $0x40] sm:$0xf]  ;;  %p1324_p11 = scmp.ne.s32.totalorder %s1322_s12, %s1323_s13  ;;  %p1328_p0 = scmp.lt.s32.totalorder %s1322_s12, %s1826_s4 }
  0x27   : > { %v310_v61 = vsel %vm1543_vm4, %v305_v53, %v309_v49  ;;  %v413_v62 = vunpack.c.l.b16 %v324_v57  ;;  %v338_v63 = vsel %vm1543_vm4, %v333_v52, %v337_v54  ;;  %v345_v0 = vrot.slane %v343_v56, 5  ;;  %v288_v49 = vld [vmem:[%s1523_s14 + $0x38] sm:$0xf]  ;;  %p1329_p1 = scmp.lt.s32.totalorder %s1327_s19, %s1323_s13 }
  0x28   : > { %v412_v2 = vunpack.c.l.b16 %v310_v61  ;;  %v414_v3 = vunpack.c.l.b16 %v338_v63  ;;  %v356_v4 = vrot.slane %v354_v58, 4  ;;  %v359_v5 = vrot.slane %v357_v59, 5  ;;  %p1325_p12 = pnand %p1324_p11, %p1478_p5 }
  0x29   : > { %v346_v6 = vor.u32 %v345_v0, %v342_v55  ;;  %v363_v11 = vshll.u32 %v283_v1, 16  ;;  %v486_v12 = vunpack.c.l.b16 %v280_v34  ;;  %v487_v13 = vunpack.c.l.b16 %v1548_v47  ;;  %v285_v34 = vld [vmem:[%s1523_s14 + $0x2c] sm:$0x1]  ;;  %v289_v1 = vld [vmem:[%s1523_s14 + $0x3c] sm:$0x1]  ;;  %p1330_p2 = por %p1329_p1, %p1328_p0 }
  0x2a   : > { %v420_v8 = vpack.c.b16 %v413_v62, %v412_v2  ;;  %v628_v9 = vpack.c.b16 %v414_v3, %v413_v62  ;;  %v360_v10 = vor.u32 %v359_v5, %v356_v4  ;;  %v351_v15 = vrot.slane %v349_v7, 5  ;;  %v291_v2 = vld [vmem:[%s1523_s14 + $0x44] sm:$0x1]  ;;  %p1326_p13 = pneg %p1325_p12 }
  0x2b   : > { %v347_v14 = vrot.slane %v346_v6, 4  ;;  %v365_v18 = vrot.slane %v363_v11, 5  ;;  %v550_v21 = vpack.c.b16 %v487_v13, %v486_v12  ;;  %v492_v22 = vpack.c.b16 %v486_v12, %v485_v25 }
  0x2c   : > { %1102 = vmatmul.msk.bf16.vlgmr.msra.gmra.mxu0 %vm429_vm1, %v420_v8  ;;  %1130 = vmatmul.msk.bf16.vlgmr.msra.gmra.mxu3 %vm429_vm1, %v628_v9  ;;  %v361_v16 = vrot.slane %v360_v10, 4  ;;  %v368_v23 = vshrl.u32 %v284_v19, 16  ;;  %v371_v24 = vshll.u32 %v284_v19, 16  ;;  %v382_v28 = vshrl.u32 %v1566_v20, 16  ;;  %p1331_p3 = pnand %p1330_p2, %p1326_p13 }
  0x2d   : > { %v352_v26 = vsel %vm1543_vm4, %v347_v14, %v351_v15  ;;  %v385_v29 = vshll.u32 %v1566_v20, 16  ;;  %v377_v39 = vshll.u32 %v285_v34, 16  ;;  %v391_v41 = vshll.u32 %v287_v35, 16 }
  0x2e   : > { %v366_v27 = vsel %vm1543_vm4, %v361_v16, %v365_v18  ;;  %v415_v30 = vunpack.c.l.b16 %v352_v26  ;;  %v370_v17 = vrot.slane %v368_v23, 4  ;;  %v373_v25 = vrot.slane %v371_v24, 5 }
  0x2f   : > { %v416_v31 = vunpack.c.l.b16 %v366_v27  ;;  %v384_v32 = vrot.slane %v382_v28, 4  ;;  %v387_v33 = vrot.slane %v385_v29, 5  ;;  %v488_v42 = vunpack.c.l.b16 %v284_v19 }
  0x30   : > { %v421_v36 = vpack.c.b16 %v415_v30, %v414_v3  ;;  %v374_v38 = vor.u32 %v373_v25, %v370_v17  ;;  %v489_v43 = vunpack.c.l.b16 %v1566_v20  ;;  %v379_v46 = vrot.slane %v377_v39, 5 }
  0x31   : > { %v629_v37 = vpack.c.b16 %v416_v31, %v415_v30  ;;  %v388_v40 = vor.u32 %v387_v33, %v384_v32  ;;  %v393_v48 = vrot.slane %v391_v41, 5  ;;  %v493_v52 = vpack.c.b16 %v488_v42, %v487_v13  ;;  %v1611_v32 = vld [vmem:[%s1825_s3] ss:$0 sm:$0xff] }
  0x32   : > { %v375_v45 = vrot.slane %v374_v38, 4  ;;  %v551_v51 = vpack.c.b16 %v489_v43, %v488_v42  ;;  %v396_v53 = vshrl.u32 %v288_v49, 16  ;;  %v399_v54 = vshll.u32 %v288_v49, 16 }
  0x33   : > { %1121 = vmatmul.msk.bf16.gmra.mxu2 %vm429_vm1, %v550_v21  ;;  %v389_v47 = vrot.slane %v388_v40, 4  ;;  %v611_v57 = vshrl.u32 %v290_v50, 16  ;;  %v614_v58 = vshll.u32 %v290_v50, 16  ;;  %v405_v6 = vshll.u32 %v289_v1, 16 }
  0x34   : > { %v380_v55 = vsel %vm1543_vm4, %v375_v45, %v379_v46  ;;  %v398_v61 = vrot.slane %v396_v53, 4  ;;  %v401_v62 = vrot.slane %v399_v54, 5  ;;  %v620_v8 = vshll.u32 %v291_v2, 16 }
  0x35   : > { %1111 = vmatmul.msk.bf16.gmra.mxu1 %vm429_vm1, %v492_v22  ;;  %v394_v56 = vsel %vm1543_vm4, %v389_v47, %v393_v48  ;;  %v417_v59 = vunpack.c.l.b16 %v380_v55  ;;  %v613_v63 = vrot.slane %v611_v57, 4  ;;  %v616_v0 = vrot.slane %v614_v58, 5 }
  0x36   : > { %v418_v60 = vunpack.c.l.b16 %v394_v56  ;;  %v402_v5 = vor.u32 %v401_v62, %v398_v61  ;;  %v490_v9 = vunpack.c.l.b16 %v288_v49  ;;  %v548_v10 = vunpack.c.l.b16 %v290_v50 }
  0x37   : > { %v422_v3 = vpack.c.b16 %v417_v59, %v416_v31  ;;  %v617_v7 = vor.u32 %v616_v0, %v613_v63  ;;  %v407_v12 = vrot.slane %v405_v6, 5  ;;  %v622_v14 = vrot.slane %v620_v8, 5  ;;  %v1606_v31 = vld [vmem:[%s1824_s2] ss:$0 sm:$0xff] }
  0x38   : > { %v630_v4 = vpack.c.b16 %v418_v60, %v417_v59  ;;  %v403_v11 = vrot.slane %v402_v5, 4  ;;  %v552_v15 = vpack.c.b16 %v548_v10, %v490_v9  ;;  %v494_v16 = vpack.c.b16 %v490_v9, %v489_v43 }
  0x39   : > { %v618_v13 = vrot.slane %v617_v7, 4 }
  0x3a   : > { %v408_v18 = vsel %vm1543_vm4, %v403_v11, %v407_v12 }
  0x3b   : > { %v623_v19 = vsel %vm1543_vm4, %v618_v13, %v622_v14  ;;  %v419_v20 = vunpack.c.l.b16 %v408_v18 }
  0x3c   : > { %1103 = vmatmul.msk.bf16.gmra.mxu0 %vm429_vm1, %v421_v36  ;;  %1131 = vmatmul.msk.bf16.gmra.mxu3 %vm429_vm1, %v629_v37  ;;  %v627_v21 = vunpack.c.l.b16 %v623_v19 }
  0x3d   : > { %v423_v22 = vpack.c.b16 %v419_v20, %v418_v60 }
  0x3e   : > { %v631_v23 = vpack.c.b16 %v627_v21, %v419_v20 }
  0x43   : > { %1122 = vmatmul.msk.bf16.gmra.mxu2 %vm429_vm1, %v551_v51 }
  0x45   : > { %1112 = vmatmul.msk.bf16.gmra.mxu1 %vm429_vm1, %v493_v52 }
  0x4c   : > { %1104 = vmatmul.msk.bf16.gmra.mxu0 %vm429_vm1, %v422_v3  ;;  %1132 = vmatmul.msk.bf16.gmra.mxu3 %vm429_vm1, %v630_v4 }
  0x53   : > { %1123 = vmatmul.msk.bf16.gmra.mxu2 %vm429_vm1, %v552_v15 }
  0x55   : > { %1113 = vmatmul.msk.bf16.gmra.mxu1 %vm429_vm1, %v494_v16 }
  0x5c   : > { %1105 = vmatmul.msk.bf16.gmra.mxu0 %vm429_vm1, %v423_v22  ;;  %1133 = vmatmul.msk.bf16.gmra.mxu3 %vm429_vm1, %v631_v23 }
  0xa2   : > { %v524_v24 = vpop.f32.mrf.mxu1 }
  0xa6   : > { %v582_v26 = vpop.f32.mrf.mxu2 }
  0xa9   : > { %v455_v27 = vpop.f32.mrf.mxu0 }
  0xaa   : > { %v525_v28 = vadd.f32 %v524_v24, %v455_v27  ;;  %v526_v29 = vpop.f32.mrf.mxu1 }
  0xac   : > { %v602_v44 = vadd.f32 %v582_v26, %v525_v28 }
  0xae   : > { %v584_v30 = vpop.f32.mrf.mxu2 }
  0xaf   : > { %v661_v17 = vpop.f32.mrf.mxu3 }
  0xb0   : > { %v681_v25 = vadd.f32 %v661_v17, %v602_v44 }
  0xb1   : > { %v457_v33 = vpop.f32.mrf.mxu0 }
  0xb2   : > { %v709_v34 = vmul.f32 %v1606_v31, %v681_v25  ;;  %v527_v35 = vadd.f32 %v526_v29, %v457_v33  ;;  %v529_v36 = vpop.f32.mrf.mxu1 }
  0xb4   : > { %v1618_v37 = vadd.f32 %v1611_v32, %v709_v34  ;;  %v603_v40 = vadd.f32 %v584_v30, %v527_v35 }
  0xb6   : > { %v1134_v38 = vmul.f32 -1.442695, %v1618_v37  ;;  %v587_v39 = vpop.f32.mrf.mxu2 }
  0xb7   : > { %v663_v41 = vpop.f32.mrf.mxu3 }
  0xb8   : > { %1275 = vpow2.f32 %v1134_v38  ;;  %v682_v42 = vadd.f32 %v663_v41, %v603_v40 }
  0xb9   : > { %v460_v43 = vpop.f32.mrf.mxu0 }
  0xba   : > { %v1160_v45 = vpack.c.bf16 %v682_v42, %v681_v25  ;;  %v710_v46 = vmul.f32 %v1606_v31, %v682_v42  ;;  %v530_v47 = vadd.f32 %v529_v36, %v460_v43  ;;  %v531_v48 = vpop.f32.mrf.mxu1 }
  0xbc   : > { %1161 = vst [vmem:[%s1623_s28] sm:$0xff] %v1160_v45   ;;  %v1627_v49 = vadd.f32 %v1611_v32, %v710_v46  ;;  %v604_v50 = vadd.f32 %v587_v39, %v530_v47 }
  0xbe   : > { %v1276_v51 = vpop.eup %1275  ;;  %v1180_v52 = vpack.c.bf16 %v1627_v49, %v1618_v37  ;;  %v1135_v53 = vmul.f32 -1.442695, %v1627_v49  ;;  %v589_v54 = vpop.f32.mrf.mxu2 }
  0xbf   : > { %v769_v55 = vadd.f32 1.0, %v1276_v51  ;;  %v666_v56 = vpop.f32.mrf.mxu3 }
  0xc0   : > { %1181 = vst [vmem:[%s1632_s29] sm:$0xff] %v1180_v52   ;;  %1277 = vpow2.f32 %v1135_v53  ;;  %v683_v57 = vadd.f32 %v666_v56, %v604_v50 }
  0xc1   : > { %1279 = vrcp.f32 %v769_v55  ;;  %v462_v58 = vpop.f32.mrf.mxu0  ;;  %v788_v27 = vand.u32 2147483648, %v769_v55  ;;  %vm782_vm6 = vweird.f32 %v769_v55  ;;  %v786_v44 = vand.u32 2147483647, %v769_v55 }
  0xc2   : > { %v711_v59 = vmul.f32 %v1606_v31, %v683_v57  ;;  %v532_v60 = vadd.f32 %v531_v48, %v462_v58  ;;  %v534_v61 = vpop.f32.mrf.mxu1 }
  0xc3   : > { %v789_v39 = vor.u32 1.1754944e-38, %v788_v27  ;;  %vm787_vm9 = vcmp.eq.f32.partialorder %v786_v44, 8.507059e+37 }
  0xc4   : > { %v1637_v62 = vadd.f32 %v1611_v32, %v711_v59  ;;  %v605_v1 = vadd.f32 %v589_v54, %v532_v60 }
  0xc6   : > { %v1278_v63 = vpop.eup %1277  ;;  %v1136_v0 = vmul.f32 -1.442695, %v1637_v62  ;;  %v592_v4 = vpop.f32.mrf.mxu2 }
  0xc7   : > { %v1280_v2 = vpop.eup %1279  ;;  %v770_v3 = vadd.f32 1.0, %v1278_v63  ;;  %v668_v5 = vpop.f32.mrf.mxu3 }
  0xc8   : > { %v778_v6 = vmul.f32 %v1280_v2, %v769_v55  ;;  %1281 = vpow2.f32 %v1136_v0  ;;  %v684_v7 = vadd.f32 %v668_v5, %v605_v1  ;;  %vm783_vm5 = vweird.f32 %v1280_v2 }
  0xc9   : > { %1283 = vrcp.f32 %v770_v3  ;;  %v465_v8 = vpop.f32.mrf.mxu0  ;;  %vm1652_vm7 = vmor %vm782_vm6, %vm783_vm5  ;;  %v801_v33 = vand.u32 2147483647, %v770_v3  ;;  %v803_v34 = vand.u32 2147483648, %v770_v3  ;;  %vm797_vm10 = vweird.f32 %v770_v3 }
  0xca   : > { %v779_v9 = vsub.f32 1.0, %v778_v6  ;;  %v1165_v10 = vpack.c.bf16 %v684_v7, %v683_v57  ;;  %v712_v11 = vmul.f32 %v1606_v31, %v684_v7  ;;  %v535_v12 = vadd.f32 %v534_v61, %v465_v8  ;;  %v536_v15 = vpop.f32.mrf.mxu1 }
  0xcb   : > { %v804_v47 = vor.u32 1.1754944e-38, %v803_v34  ;;  %vm802_vm12 = vcmp.eq.f32.partialorder %v801_v33, 8.507059e+37 }
  0xcc   : > { %v780_v13 = vmul.f32 %v1280_v2, %v779_v9  ;;  %1217 = vst [vmem:[%s1623_s28 + $0x8] sm:$0xff] %v1165_v10   ;;  %v1643_v14 = vadd.f32 %v1611_v32, %v712_v11  ;;  %v606_v20 = vadd.f32 %v592_v4, %v535_v12 }
  0xce   : > { %v1282_v16 = vpop.eup %1281  ;;  %v1185_v18 = vpack.c.bf16 %v1643_v14, %v1637_v62  ;;  %v1137_v19 = vmul.f32 -1.442695, %v1643_v14  ;;  %v781_v24 = vadd.f32 %v1280_v2, %v780_v13  ;;  %v594_v28 = vpop.f32.mrf.mxu2 }
  0xcf   : > { %v1284_v21 = vpop.eup %1283  ;;  %v1648_v22 = vadd.f32 1.0, %v1282_v16  ;;  %v671_v23 = vpop.f32.mrf.mxu3 }
  0xd0   : > { %v793_v26 = vmul.f32 %v1284_v21, %v770_v3  ;;  %1220 = vst [vmem:[%s1632_s29 + $0x8] sm:$0xff] %v1185_v18   ;;  %1285 = vpow2.f32 %v1137_v19  ;;  %v685_v17 = vadd.f32 %v671_v23, %v606_v20  ;;  %v785_v35 = vsel %vm1652_vm7, %v1280_v2, %v781_v24 }
  0xd1   : > { %1287 = vrcp.f32 %v1648_v22  ;;  %v467_v29 = vpop.f32.mrf.mxu0  ;;  %vm798_vm8 = vweird.f32 %v1284_v21  ;;  %v790_v46 = vsel %vm787_vm9, %v789_v39, %v785_v35  ;;  %vm812_vm14 = vweird.f32 %v1648_v22 }
  0xd2   : > { %v794_v30 = vsub.f32 1.0, %v793_v26  ;;  %v713_v38 = vmul.f32 %v1606_v31, %v685_v17  ;;  %v537_v40 = vadd.f32 %v536_v15, %v467_v29  ;;  %vm799_vm11 = vmor %vm797_vm10, %vm798_vm8  ;;  %v539_v50 = vpop.f32.mrf.mxu1  ;;  %v897_v58 = vmul.f32 %v790_v46, %v1618_v37 }
  0xd3   : > { %v816_v9 = vand.u32 2147483647, %v1648_v22  ;;  %v818_v12 = vand.u32 2147483648, %v1648_v22 }
  0xd4   : > { %v795_v36 = vmul.f32 %v1284_v21, %v794_v30  ;;  %v1660_v43 = vadd.f32 %v1611_v32, %v713_v38  ;;  %v607_v56 = vadd.f32 %v594_v28, %v537_v40 }
  0xd5   : > { %vm817_vm1 = vcmp.eq.f32.partialorder %v816_v9, 8.507059e+37  ;;  %v819_v44 = vor.u32 1.1754944e-38, %v818_v12 }
  0xd6   : > { %v1286_v41 = vpop.eup %1285  ;;  %v796_v42 = vadd.f32 %v1284_v21, %v795_v36  ;;  %v1138_v54 = vmul.f32 -1.442695, %v1660_v43  ;;  %v597_v61 = vpop.f32.mrf.mxu2 }
  0xd7   : > { %v1662_v45 = vpop.eup %1287  ;;  %v1664_v48 = vadd.f32 1.0, %v1286_v41  ;;  %v673_v51 = vpop.f32.mrf.mxu3 }
  0xd8   : > { %v800_v52 = vsel %vm799_vm11, %v1284_v21, %v796_v42  ;;  %v808_v53 = vmul.f32 %v1662_v45, %v1648_v22  ;;  %v686_v63 = vadd.f32 %v673_v51, %v607_v56  ;;  %vm813_vm13 = vweird.f32 %v1662_v45 }
  0xd9   : > { %v805_v55 = vsel %vm802_vm12, %v804_v47, %v800_v52  ;;  %1289 = vrcp.f32 %v1664_v48  ;;  %v470_v57 = vpop.f32.mrf.mxu0  ;;  %vm1699_vm15 = vmor %vm812_vm14, %vm813_vm13  ;;  %v831_v26 = vand.u32 2147483647, %v1664_v48  ;;  %v833_v27 = vand.u32 2147483648, %v1664_v48 }
  0xda   : > { %v898_v59 = vmul.f32 %v805_v55, %v1627_v49  ;;  %v809_v60 = vsub.f32 1.0, %v808_v53  ;;  %1291 = vpow2.f32 %v1138_v54  ;;  %v540_v0 = vadd.f32 %v539_v50, %v470_v57  ;;  %v541_v18 = vpop.f32.mrf.mxu1 }
  0xdb   : > { %v1170_v3 = vpack.c.bf16 %v686_v63, %v685_v17  ;;  %v714_v37 = vmul.f32 %v1606_v31, %v686_v63  ;;  %vm827_vm2 = vweird.f32 %v1664_v48  ;;  %v834_v35 = vor.u32 1.1754944e-38, %v833_v27 }
  0xdc   : > { %v1200_v1 = vpack.c.bf16 %v898_v59, %v897_v58  ;;  %v810_v2 = vmul.f32 %v1662_v45, %v809_v60  ;;  %v608_v4 = vadd.f32 %v597_v61, %v540_v0  ;;  %vm832_vm4 = vcmp.eq.f32.partialorder %v831_v26, 8.507059e+37 }
  0xdd   : > { %1218 = vst [vmem:[%s1623_s28 + $0x10] sm:$0xff] %v1170_v3   ;;  %v1685_v6 = vadd.f32 %v1611_v32, %v714_v37 }
  0xde   : > { %1201 = vst [vmem:[%s1676_s11] sm:$0xff] %v1200_v1   ;;  %v811_v5 = vadd.f32 %v1662_v45, %v810_v2  ;;  %v599_v30 = vpop.f32.mrf.mxu2 }
  0xdf   : > { %v1290_v49 = vpop.eup %1289  ;;  %v676_v7 = vpop.f32.mrf.mxu3  ;;  %v1190_v15 = vpack.c.bf16 %v1685_v6, %v1660_v43  ;;  %v1139_v16 = vmul.f32 -1.442695, %v1685_v6 }
  0xe0   : > { %v1292_v8 = vpop.eup %1291  ;;  %v823_v10 = vmul.f32 %v1290_v49, %v1664_v48  ;;  %v687_v11 = vadd.f32 %v676_v7, %v608_v4  ;;  %v815_v24 = vsel %vm1699_vm15, %v1662_v45, %v811_v5  ;;  %vm828_vm0 = vweird.f32 %v1290_v49 }
  0xe1   : > { %v1691_v13 = vadd.f32 1.0, %v1292_v8  ;;  %v472_v19 = vpop.f32.mrf.mxu0  ;;  %1221 = vst [vmem:[%s1632_s29 + $0x10] sm:$0xff] %v1190_v15   ;;  %v820_v34 = vsel %vm817_vm1, %v819_v44, %v815_v24  ;;  %vm829_vm3 = vmor %vm827_vm2, %vm828_vm0 }
  0xe2   : > { %v824_v21 = vsub.f32 1.0, %v823_v10  ;;  %v715_v22 = vmul.f32 %v1606_v31, %v687_v11  ;;  %v542_v23 = vadd.f32 %v541_v18, %v472_v19  ;;  %v899_v45 = vmul.f32 %v820_v34, %v1637_v62 }
  0xe3   : > { %1293 = vrcp.f32 %v1691_v13 }
  0xe4   : > { %v825_v28 = vmul.f32 %v1290_v49, %v824_v21  ;;  %1295 = vpow2.f32 %v1139_v16  ;;  %v1712_v29 = vadd.f32 %v1611_v32, %v715_v22  ;;  %v609_v33 = vadd.f32 %v599_v30, %v542_v23 }
  0xe6   : > { %v826_v17 = vadd.f32 %v1290_v49, %v825_v28  ;;  %v1140_v25 = vmul.f32 -1.442695, %v1712_v29 }
  0xe7   : > { %v678_v36 = vpop.f32.mrf.mxu3 }
  0xe8   : > { %v830_v38 = vsel %vm829_vm3, %v1290_v49, %v826_v17  ;;  %1297 = vpow2.f32 %v1140_v25  ;;  %v688_v39 = vadd.f32 %v678_v36, %v609_v33 }
  0xe9   : > { %v1724_v40 = vpop.eup %1293  ;;  %v835_v41 = vsel %vm832_vm4, %v834_v35, %v830_v38 }
  0xea   : > { %v1296_v42 = vpop.eup %1295  ;;  %v900_v46 = vmul.f32 %v835_v41, %v1643_v14  ;;  %v838_v47 = vmul.f32 %v1724_v40, %v1691_v13  ;;  %v1175_v48 = vpack.c.bf16 %v688_v39, %v687_v11  ;;  %v716_v51 = vmul.f32 %v1606_v31, %v688_v39 }
  0xeb   : > { %v1737_v50 = vadd.f32 1.0, %v1296_v42 }
  0xec   : > { %v1205_v52 = vpack.c.bf16 %v900_v46, %v899_v45  ;;  %v839_v53 = vsub.f32 1.0, %v838_v47  ;;  %1219 = vst [vmem:[%s1623_s28 + $0x18] sm:$0xff] %v1175_v48  }
  0xed   : > { %1299 = vrcp.f32 %v1737_v50 }
  0xee   : > { %1334 = shalt.err (!%p1331_p3)
}
  0xef   : > { %s1403_s28 = smov 64   ;;  %s1404_s9 = smov 4   ;;  %v1298_v31 = vpop.eup %1297  ;;  %1223 = vst [vmem:[%s1676_s11 + $0x8] sm:$0xff] %v1205_v52   ;;  %v1761_v62 = vadd.f32 %v1611_v32, %v716_v51  ;;  %v840_v54 = vmul.f32 %v1724_v40, %v839_v53 }
  0xf0   : > { %1227 = dma.vmem_to_hbm [thread:$0]  (%p1478_p5), %s1722_s16, 512, %s947_s18, %s922_s10, %s1403_s28, %s1403_s28, %s1404_s9   ;;  %v1763_v14 = vadd.f32 1.0, %v1298_v31 }
  0xf1   : > { %v1195_v55 = vpack.c.bf16 %v1761_v62, %v1712_v29  ;;  %v1141_v56 = vmul.f32 -1.442695, %v1761_v62  ;;  %s927_s0 = scalar_lea.sflag [#allocation5], %s1615_s20  ;;  %s1349_s16 = sshra.s32 %s964_s17, 4  ;;  %s1350_s16 = int_to_ptr.hbm [resolvable:$true] %s1349_s16 }
  0xf2   : > { %1301 = vrcp.f32 %v1763_v14  ;;  %s1351_s18 = scalar_lea.hbm %s1350_s16, 32  ;;  %s1355_s13 = scalar_lea.hbm %s1827_s5, 64 }
  0xf3   : > { %1222 = vst [vmem:[%s1632_s29 + $0x18] sm:$0xff] %v1195_v55   ;;  %1303 = vpow2.f32 %v1141_v56  ;;  %v1300_v57 = vpop.eup %1299  ;;  %p1352_p4 = scmp.ne.s32.totalorder %s1350_s16, %s1351_s18  ;;  %p1356_p9 = scmp.lt.s32.totalorder %s1350_s16, %s1827_s5 }
  0xf4   : > { %p1357_p10 = scmp.lt.s32.totalorder %s1355_s13, %s1351_s18 }
  0xf5   : > { %p1353_p7 = pnand %p1352_p4, %p1478_p5 }
  0xf6   : > { %p1358_p11 = por %p1357_p10, %p1356_p9 }
  0xf7   : > { %p1354_p8 = pneg %p1353_p7 }
  0xf9   : > { %p1359_p12 = pnand %p1358_p11, %p1354_p8 }
  0xfb   : > { %1362 = shalt.err (!%p1359_p12)
}
  0xfc   : > { %1228 = dma.vmem_to_hbm [thread:$0]  (%p1478_p5), %s962_s25, 512, %s964_s17, %s927_s0, %s1403_s28, %s1403_s28, %s1404_s9   ;;  %v841_v32 = vadd.f32 %v1724_v40, %v840_v54  ;;  %vm843_vm5 = vweird.f32 %v1724_v40  ;;  %v853_v58 = vmul.f32 %v1300_v57, %v1737_v50  ;;  %v848_v59 = vand.u32 2147483648, %v1691_v13  ;;  %v1302_v63 = vpop.eup %1301 }
  0xfd   : > { %vm842_vm6 = vweird.f32 %v1691_v13  ;;  %v846_v60 = vand.u32 2147483647, %v1691_v13  ;;  %v861_v0 = vand.u32 2147483647, %v1737_v50  ;;  %v863_v1 = vand.u32 2147483648, %v1737_v50  ;;  %v1304_v2 = vpop.eup %1303 }
  0xfe   : > { %v854_v61 = vsub.f32 1.0, %v853_v58  ;;  %vm844_vm7 = vmor %vm842_vm6, %vm843_vm5  ;;  %vm858_vm8 = vweird.f32 %v1300_v57  ;;  %v868_v4 = vmul.f32 %v1302_v63, %v1763_v14  ;;  %v849_v49 = vor.u32 1.1754944e-38, %v848_v59 }
  0xff   : > { %v845_v3 = vsel %vm844_vm7, %v1724_v40, %v841_v32  ;;  %v776_v5 = vadd.f32 1.0, %v1304_v2  ;;  %vm847_vm9 = vcmp.eq.f32.partialorder %v846_v60, 8.507059e+37  ;;  %vm857_vm10 = vweird.f32 %v1737_v50 }
 0x100   : > { %v855_v37 = vmul.f32 %v1300_v57, %v854_v61  ;;  %v869_v8 = vsub.f32 1.0, %v868_v4  ;;  %v850_v9 = vsel %vm847_vm9, %v849_v49, %v845_v3  ;;  %vm859_vm11 = vmor %vm857_vm10, %vm858_vm8  ;;  %v864_v10 = vor.u32 1.1754944e-38, %v863_v1 }
 0x101   : > { %1305 = vrcp.f32 %v776_v5  ;;  %vm862_vm12 = vcmp.eq.f32.partialorder %v861_v0, 8.507059e+37  ;;  %v901_v13 = vmul.f32 %v850_v9, %v1660_v43  ;;  %vm873_vm13 = vweird.f32 %v1302_v63 }
 0x102   : > { %v856_v7 = vadd.f32 %v1300_v57, %v855_v37  ;;  %v870_v16 = vmul.f32 %v1302_v63, %v869_v8  ;;  %v878_v22 = vand.u32 2147483648, %v1763_v14  ;;  %vm872_vm14 = vweird.f32 %v1763_v14 }
 0x103   : > { %v876_v23 = vand.u32 2147483647, %v1763_v14  ;;  %vm874_vm15 = vmor %vm872_vm14, %vm873_vm13  ;;  %v893_v26 = vand.u32 2147483648, %v776_v5  ;;  %vm887_vm2 = vweird.f32 %v776_v5 }
 0x104   : > { %v860_v11 = vsel %vm859_vm11, %v1300_v57, %v856_v7  ;;  %v871_v20 = vadd.f32 %v1302_v63, %v870_v16  ;;  %v879_v28 = vor.u32 1.1754944e-38, %v878_v22 }
 0x105   : > { %v865_v12 = vsel %vm862_vm12, %v864_v10, %v860_v11  ;;  %vm877_vm1 = vcmp.eq.f32.partialorder %v876_v23, 8.507059e+37  ;;  %v894_v17 = vor.u32 1.1754944e-38, %v893_v26 }
 0x106   : > { %v902_v15 = vmul.f32 %v865_v12, %v1685_v6  ;;  %v875_v27 = vsel %vm874_vm15, %v1302_v63, %v871_v20  ;;  %v891_v6 = vand.u32 2147483647, %v776_v5 }
 0x107   : > { %v1306_v19 = vpop.eup %1305  ;;  %v880_v30 = vsel %vm877_vm1, %v879_v28, %v875_v27 }
 0x108   : > { %v1210_v18 = vpack.c.bf16 %v902_v15, %v901_v13  ;;  %v883_v21 = vmul.f32 %v1306_v19, %v776_v5  ;;  %vm888_vm0 = vweird.f32 %v1306_v19  ;;  %vm892_vm4 = vcmp.eq.f32.partialorder %v891_v6, 8.507059e+37 }
 0x109   : > { %vm889_vm3 = vmor %vm887_vm2, %vm888_vm0  ;;  %v903_v34 = vmul.f32 %v880_v30, %v1712_v29 }
 0x10a   : > { %1224 = vst [vmem:[%s1676_s11 + $0x10] sm:$0xff] %v1210_v18   ;;  %v884_v24 = vsub.f32 1.0, %v883_v21 }
 0x10c   : > { %v885_v43 = vmul.f32 %v1306_v19, %v884_v24 }
 0x10e   : > { %v886_v44 = vadd.f32 %v1306_v19, %v885_v43 }
 0x110   : > { %v890_v25 = vsel %vm889_vm3, %v1306_v19, %v886_v44 }
 0x111   : > { %v895_v33 = vsel %vm892_vm4, %v894_v17, %v890_v25 }
 0x112   : > { %v904_v35 = vmul.f32 %v895_v33, %v1761_v62 }
 0x114   : > { %v1215_v36 = vpack.c.bf16 %v904_v35, %v903_v34 }
 0x116   : > { %1225 = vst [vmem:[%s1676_s11 + $0x18] sm:$0xff] %v1215_v36  }
 0x117 PF: > { %p1238_p5 = scmp.ge.s32.totalorder %s1401_s24, 2  ;;  %s981_s7 = sand.u32 1, %s1389_s21  }
 0x118   : > { %s982_s20 = scalar_lea.sflag [#allocation3], %s981_s7 }
 0x119   : > { %p1232_p13 = pnand %p1238_p5, %p1482_p6 }
 0x11b   : > { %p1233_p0 = pneg %p1232_p13 }
 0x11d   : > { %1380 = dma.done.wait (%p1233_p0), %s982_s20, 512  }
 0x11e   : > { %1382 = vsyncadd (%p1233_p0), %s982_s20, 4294966784  ;;  %s992_s29 = scalar_lea.sflag [#allocation5], %s981_s7 }
 0x11f   : > { %1384 = dma.done.wait (%p1233_p0), %s992_s29, 512  }
 0x120   : > { %1386 = vsyncadd (%p1233_p0), %s992_s29, 4294966784  ;;  %p20_p1 = scmp.ge.s32.totalorder %s1465_s27, 4   ;;  %s1839_s21 = smov %s1393_s22 }
 0x121   : > { %s1840_s22 = smov %s1397_s23  ;;  %s1841_s23 = smov %s1476_s30 }
 0x122   : > { %s1842_s24 = smov %s1465_s27  ;;  %22 = sbr.rel (!%p20_p1) target bundleno = 7 (0x7), region = 103 }
 0x127   :  { %1006 = vsyncpa [#allocation3], 1 }
 0x128   :  { %1008 = vsyncpa [#allocation3 + $0x1], 1 }
 0x129   :  { %1009 = vsyncpa [#allocation5], 1 }
 0x12a   :  { %1011 = vsyncpa [#allocation5 + $0x1], 1 }

// kernel: _forward_impl.11
= control target key start
LH: loop header
LB: loop body
LE: loop exit
PB: predicated region body
PF: predicated region fallthrough
CT: control target
= control target key end

     0   :  { %s1384_s15 = smov 0   ;;  %s1848_s0 = inlined_call_operand.vmem [shape: bf16[2,8,8,128], index: 0, kind: input, shape index: {}]   ;;  %s1849_s1 = inlined_call_operand.vmem [shape: bf16[9,128], index: 1, kind: input, shape index: {}]   ;;  %s1850_s2 = inlined_call_operand.vmem [shape: f32[1,128], index: 2, kind: input, shape index: {}]   ;;  %s1851_s3 = inlined_call_operand.vmem [shape: f32[1,128], index: 3, kind: input, shape index: {}]   ;;  %s1852_s4 = inlined_call_operand.vmem [shape: bf16[2,8,8,128], index: 4, kind: output, shape index: {}]  }
   0x1 LB: > { %s1263_s16 = sadd.s32 4294967295, %s1356_s15   ;;  %p1267_p0 = scmp.ge.s32.totalorder %s1356_s15, 1  ;;  %s1356_s15 = sphi %s1384_s15, %s14_s15  }
   0x2   : > { %p162_p1 = scmp.lt.s32.totalorder %s1356_s15, 3 }
   0x4   : > { %p163_p2 = pnand %p1267_p0, %p162_p1 }
   0x5   : > { %p188_p3 = scmp.lt.s32.totalorder (!%p163_p2), %s1263_s16, 1 }
   0x6   : > { %166 = sbr.rel (%p163_p2) target bundleno = 207 (0xcf), region = 36 }
   0xb   : > { %v1358_v0 = vmov 0   ;;  %s1866_s16 = smov (!%p188_p3, %s1263_s16), 1  ;;  %v378_v4 = vld [vmem:[%s1849_s1] sm:$0x1]  ;;  %vm309_vm0 = vsmask.f32 7938 }
   0xc   : > { %201 = vst [vmem:[#allocation2 + $0x8] sm:$0xf] %v1358_v0  ;;  %s1282_s17 = sshll.u32 %s1866_s16, 5  ;;  %vm308_vm1 = vcmask 1043456   ;;  %vm315_vm2 = vsmask.f32 256  ;;  %v379_v12 = vunpack.c.l.bf16 %v378_v4 }
   0xd   : > { %199 = vst [vmem:[#allocation2] sm:$0xf] %v1358_v0  ;;  %s1405_s20 = scalar_lea.vmem %s1848_s0, %s1282_s17  ;;  %vm314_vm3 = vcmask 1040384   ;;  %v1429_v22 = vld [vmem:[%s1849_s1] sm:$0x2]  ;;  %vm1434_vm4 = vmand %vm308_vm1, %vm309_vm0  ;;  %vm446_vm6 = vcmask 1046528   ;;  %s1684_s11 = scalar_lea.vmem %s1852_s4, %s1282_s17 }
   0xe   : > { %200 = vst [vmem:[#allocation2 + $0x4] sm:$0x1] %v1358_v0  ;;  %v219_v1 = vld [vmem:[%s1405_s20] sm:$0xf]  ;;  %v220_v2 = vld [vmem:[%s1405_s20 + $0x4] sm:$0xf]  ;;  %vm1440_vm5 = vmand %vm314_vm3, %vm315_vm2  ;;  %v504_v45 = vunpack.c.l.bf16 %v1429_v22 }
   0xf   : > { %202 = vst [vmem:[#allocation2 + $0xc] sm:$0x1] %v1358_v0  ;;  %v228_v3 = vshrl.u32 %v219_v1, 16  ;;  %v236_v5 = vshrl.u32 %v220_v2, 16  ;;  %v221_v6 = vld [vmem:[%s1405_s20 + $0x8] sm:$0xf] }
  0x10   : > { %203 = vst [vmem:[#allocation2 + $0x10] sm:$0xf] %v1358_v0  ;;  %v231_v7 = vshll.u32 %v219_v1, 16  ;;  %v244_v9 = vshrl.u32 %v221_v6, 16  ;;  %v222_v10 = vld [vmem:[%s1405_s20 + $0xc] sm:$0xf] }
  0x11   : > { %204 = vst [vmem:[#allocation2 + $0x14] sm:$0x1] %v1358_v0  ;;  %v230_v8 = vrot.slane %v228_v3, 7  ;;  %v239_v11 = vshll.u32 %v220_v2, 16  ;;  %v238_v13 = vrot.slane %v236_v5, 7  ;;  %v252_v14 = vshrl.u32 %v222_v10, 16 }
  0x12   : > { %205 = vst [vmem:[#allocation2 + $0x18] sm:$0xf] %v1358_v0  ;;  %v223_v15 = vld [vmem:[%s1405_s20 + $0x10] sm:$0xf]  ;;  %v1423_v17 = vperm.slane %v379_v12, 0  ;;  %v246_v20 = vrot.slane %v244_v9, 7 }
  0x13   : > { %206 = vst [vmem:[#allocation2 + $0x1c] sm:$0x1] %v1358_v0  ;;  %v311_v16 = vld [vmem:[#allocation2 + $0x8] sm:$0xf]  ;;  %v233_v18 = vor.u32 %v231_v7, %v230_v8  ;;  %v247_v21 = vshll.u32 %v221_v6, 16  ;;  %v234_v24 = vrot.slane %v230_v8, 4  ;;  %v241_v28 = vor.u32 %v239_v11, %v238_v13 }
  0x14   : > { %207 = vst [vmem:[#allocation2 + $0x20] sm:$0xf] %v1358_v0  ;;  %v260_v26 = vshrl.u32 %v223_v15, 16  ;;  %v254_v30 = vrot.slane %v252_v14, 7  ;;  %v255_v31 = vshll.u32 %v222_v10, 16  ;;  %v242_v32 = vrot.slane %v238_v13, 4 }
  0x15   : > { %208 = vst [vmem:[#allocation2 + $0x24] sm:$0x1] %v1358_v0  ;;  %v312_v35 = vsel %vm1434_vm4, %v233_v18, %v311_v16  ;;  %v249_v36 = vor.u32 %v247_v21, %v246_v20  ;;  %v263_v38 = vshll.u32 %v223_v15, 16  ;;  %v224_v39 = vld [vmem:[%s1405_s20 + $0x14] sm:$0xf]  ;;  %v1449_v40 = vperm.slane %v379_v12, 1 }
  0x16   : > { %209 = vst [vmem:[#allocation2 + $0x28] sm:$0xf] %v1358_v0  ;;  %v317_v19 = vld [vmem:[#allocation2 + $0xc] sm:$0x1]  ;;  %v262_v34 = vrot.slane %v260_v26, 7  ;;  %v250_v42 = vrot.slane %v246_v20, 4  ;;  %v257_v47 = vor.u32 %v255_v31, %v254_v30 }
  0x17   : > { %210 = vst [vmem:[#allocation2 + $0x2c] sm:$0x1] %v1358_v0  ;;  %v320_v25 = vld [vmem:[#allocation2 + $0x10] sm:$0xf]  ;;  %v318_v41 = vsel %vm1440_vm5, %v234_v24, %v317_v19  ;;  %v268_v44 = vshrl.u32 %v224_v39, 16  ;;  %v258_v48 = vrot.slane %v254_v30, 4 }
  0x18   : > { %211 = vst [vmem:[#allocation2 + $0x30] sm:$0xf] %v1358_v0  ;;  %v323_v29 = vld [vmem:[#allocation2 + $0x14] sm:$0x1]  ;;  %v321_v46 = vsel %vm1434_vm4, %v241_v28, %v320_v25  ;;  %v271_v50 = vshll.u32 %v224_v39, 16  ;;  %v266_v53 = vrot.slane %v262_v34, 4  ;;  %v265_v56 = vor.u32 %v263_v38, %v262_v34 }
  0x19   : > { %212 = vst [vmem:[#allocation2 + $0x34] sm:$0x1] %v1358_v0  ;;  %v326_v33 = vld [vmem:[#allocation2 + $0x18] sm:$0xf]  ;;  %v324_v51 = vsel %vm1440_vm5, %v242_v32, %v323_v29  ;;  %v270_v54 = vrot.slane %v268_v44, 7  ;;  %v1468_v5 = vperm.slane %v504_v45, 2 }
  0x1a   : > { %213 = vst [vmem:[#allocation2 + $0x38] sm:$0xf] %v1358_v0  ;;  %v329_v37 = vld [vmem:[#allocation2 + $0x1c] sm:$0x1]  ;;  %v327_v55 = vsel %vm1434_vm4, %v249_v36, %v326_v33  ;;  %v225_v58 = vld [vmem:[%s1405_s20 + $0x18] sm:$0xf] }
  0x1b   : > { %214 = vst [vmem:[#allocation2 + $0x3c] sm:$0x1] %v1358_v0  ;;  %v332_v43 = vld [vmem:[#allocation2 + $0x20] sm:$0xf]  ;;  %v330_v59 = vsel %vm1440_vm5, %v250_v42, %v329_v37  ;;  %v276_v62 = vshrl.u32 %v225_v58, 16  ;;  %v279_v63 = vshll.u32 %v225_v58, 16  ;;  %v273_v1 = vor.u32 %v271_v50, %v270_v54 }
  0x1c   : > { %215 = vst [vmem:[#allocation2 + $0x40] sm:$0xf] %v1358_v0  ;;  %v335_v49 = vld [vmem:[#allocation2 + $0x24] sm:$0x1]  ;;  %v274_v2 = vrot.slane %v270_v54, 4  ;;  %vm538_vm7 = vcmask 1045504  }
  0x1d   : > { %216 = vst [vmem:[#allocation2 + $0x44] sm:$0x1] %v1358_v0  ;;  %v338_v52 = vld [vmem:[#allocation2 + $0x28] sm:$0xf]  ;;  %v226_v4 = vld [vmem:[%s1405_s20 + $0x1c] sm:$0xf]  ;;  %v336_v6 = vsel %vm1440_vm5, %v258_v48, %v335_v49 }
  0x1e   : > { %217 = vst [vmem:[#allocation2 + $0x48] sm:$0xf] %v1358_v0  ;;  %v341_v57 = vld [vmem:[#allocation2 + $0x2c] sm:$0x1]  ;;  %v278_v7 = vrot.slane %v276_v62, 7  ;;  %v284_v9 = vshrl.u32 %v226_v4, 16  ;;  %v339_v10 = vsel %vm1434_vm4, %v265_v56, %v338_v52 }
  0x1f   : > { %218 = vst [vmem:[#allocation2 + $0x4c] sm:$0x1] %v1358_v0  ;;  %v344_v60 = vld [vmem:[#allocation2 + $0x30] sm:$0xf]  ;;  %v333_v0 = vsel %vm1434_vm4, %v257_v47, %v332_v43  ;;  %v287_v11 = vshll.u32 %v226_v4, 16  ;;  %v1474_v14 = vperm.slane %v504_v45, 3  ;;  %v342_v15 = vsel %vm1440_vm5, %v266_v53, %v341_v57 }
  0x20   : > { %313 = vst [vmem:[#allocation2 + $0x8] sm:$0xf] %v312_v35  ;;  %v347_v61 = vld [vmem:[#allocation2 + $0x34] sm:$0x1]  ;;  %v281_v16 = vor.u32 %v279_v63, %v278_v7  ;;  %v282_v18 = vrot.slane %v278_v7, 4  ;;  %v286_v19 = vrot.slane %v284_v9, 7  ;;  %v345_v21 = vsel %vm1434_vm4, %v273_v1, %v344_v60 }
  0x21   : > { %319 = vst [vmem:[#allocation2 + $0xc] sm:$0x1] %v318_v41  ;;  %v350_v3 = vld [vmem:[#allocation2 + $0x38] sm:$0xf]  ;;  %v362_v20 = vld [vmem:[#allocation2] sm:$0xf]  ;;  %v348_v22 = vsel %vm1440_vm5, %v274_v2, %v347_v61 }
  0x22   : > { %322 = vst [vmem:[#allocation2 + $0x10] sm:$0xf] %v321_v46  ;;  %v353_v8 = vld [vmem:[#allocation2 + $0x3c] sm:$0x1]  ;;  %v370_v25 = vunpack.c.l.bf16 %v362_v20  ;;  %v397_v26 = vld [vmem:[#allocation2 + $0x4] sm:$0x1]  ;;  %v351_v28 = vsel %vm1434_vm4, %v281_v16, %v350_v3  ;;  %v289_v30 = vor.u32 %v287_v11, %v286_v19 }
  0x23   : > { %325 = vst [vmem:[#allocation2 + $0x14] sm:$0x1] %v324_v51  ;;  %v356_v12 = vld [vmem:[#allocation2 + $0x40] sm:$0xf]  ;;  %v354_v29 = vsel %vm1440_vm5, %v282_v18, %v353_v8  ;;  %v290_v31 = vrot.slane %v286_v19, 4  ;;  %v405_v35 = vunpack.c.l.bf16 %v397_v26 }
  0x24   : > { %328 = vst [vmem:[#allocation2 + $0x18] sm:$0xf] %v327_v55  ;;  %v359_v13 = vld [vmem:[#allocation2 + $0x44] sm:$0x1]  ;;  %v381_v34 = vmul.f32 %v1423_v17, %v370_v25  ;;  %v487_v37 = vld [vmem:[#allocation2] sm:$0xe]  ;;  %v357_v39 = vsel %vm1434_vm4, %v289_v30, %v356_v12  ;;  %v414_v42 = vmul.f32 %v1449_v40, %v370_v25 }
  0x25   : > { %331 = vst [vmem:[#allocation2 + $0x1c] sm:$0x1] %v330_v59  ;;  %v360_v41 = vsel %vm1440_vm5, %v290_v31, %v359_v13  ;;  %v495_v43 = vunpack.c.l.bf16 %v487_v37  ;;  %v415_v45 = vmul.f32 %v1449_v40, %v405_v35  ;;  %v507_v51 = vmul.f32 %v1468_v5, %v405_v35  ;;  %v628_v58 = vld [vmem:[%s1849_s1] sm:$0x4]  ;;  %v809_v18 = vld [vmem:[%s1849_s1] sm:$0x8] }
  0x26   : > { %334 = vst [vmem:[#allocation2 + $0x20] sm:$0xf] %v333_v0  ;;  %v447_v23 = vrot.slane %v414_v42, 1  ;;  %v810_v35 = vunpack.c.l.bf16 %v809_v18 }
  0x27   : > { %337 = vst [vmem:[#allocation2 + $0x24] sm:$0x1] %v336_v6  ;;  %v363_v24 = vld [vmem:[#allocation2 + $0x8] sm:$0xf]  ;;  %v506_v27 = vmul.f32 %v1468_v5, %v495_v43  ;;  %v448_v54 = vrot.slane %v415_v45, 1  ;;  %v540_v61 = vrot.slane %v507_v51, 2 }
  0x28   : > { %340 = vst [vmem:[#allocation2 + $0x28] sm:$0xf] %v339_v10  ;;  %v398_v32 = vld [vmem:[#allocation2 + $0xc] sm:$0x1]  ;;  %v371_v33 = vunpack.c.l.bf16 %v363_v24  ;;  %v488_v38 = vld [vmem:[#allocation2 + $0x8] sm:$0xe] }
  0x29   : > { %343 = vst [vmem:[#allocation2 + $0x2c] sm:$0x1] %v342_v15  ;;  %v406_v36 = vunpack.c.l.bf16 %v398_v32  ;;  %v579_v48 = vld [vmem:[#allocation2 + $0x8] sm:$0xf]  ;;  %v580_v49 = vld [vmem:[#allocation2 + $0x10] sm:$0xf]  ;;  %v496_v50 = vunpack.c.l.bf16 %v488_v38  ;;  %v449_v0 = vsel %vm446_vm6, %v447_v23, %v448_v54 }
  0x2a   : > { %346 = vst [vmem:[#allocation2 + $0x30] sm:$0xf] %v345_v21  ;;  %v382_v44 = vmul.f32 %v1423_v17, %v371_v33  ;;  %v416_v46 = vmul.f32 %v1449_v40, %v371_v33  ;;  %v612_v52 = vld [vmem:[#allocation2 + $0xc] sm:$0x1]  ;;  %v613_v53 = vld [vmem:[#allocation2 + $0x14] sm:$0x1]  ;;  %v587_v62 = vunpack.c.l.bf16 %v579_v48  ;;  %v588_v3 = vunpack.c.l.bf16 %v580_v49 }
  0x2b   : > { %349 = vst [vmem:[#allocation2 + $0x34] sm:$0x1] %v348_v22  ;;  %v417_v47 = vmul.f32 %v1449_v40, %v406_v36  ;;  %v509_v57 = vmul.f32 %v1468_v5, %v406_v36  ;;  %v508_v59 = vmul.f32 %v1468_v5, %v496_v50  ;;  %v539_v60 = vrot.slane %v506_v27, 2  ;;  %v703_v63 = vld [vmem:[#allocation2 + $0x8] sm:$0xe] }
  0x2c   : > { %352 = vst [vmem:[#allocation2 + $0x38] sm:$0xf] %v351_v28  ;;  %v450_v55 = vrot.slane %v416_v46, 1  ;;  %v704_v4 = vld [vmem:[#allocation2 + $0x10] sm:$0xe]  ;;  %v479_v6 = vadd.f32 %v449_v0, %v381_v34  ;;  %v596_v12 = vmul.f32 %v1474_v14, %v587_v62  ;;  %v597_v13 = vmul.f32 %v1474_v14, %v588_v3 }
  0x2d   : > { %355 = vst [vmem:[#allocation2 + $0x3c] sm:$0x1] %v354_v29  ;;  %v451_v56 = vrot.slane %v417_v47, 1  ;;  %v543_v2 = vrot.slane %v509_v57, 2  ;;  %v541_v8 = vsel %vm538_vm7, %v539_v60, %v540_v61  ;;  %v542_v9 = vrot.slane %v508_v59, 2 }
  0x2e   : > { %358 = vst [vmem:[#allocation2 + $0x40] sm:$0xf] %v357_v39  ;;  %v793_v10 = vld [vmem:[#allocation2 + $0x10] sm:$0xf]  ;;  %v794_v11 = vld [vmem:[#allocation2 + $0x18] sm:$0xf]  ;;  %v620_v15 = vunpack.c.l.bf16 %v612_v52  ;;  %v621_v16 = vunpack.c.l.bf16 %v613_v53  ;;  %v571_v20 = vadd.f32 %v541_v8, %v479_v6  ;;  %v629_v21 = vunpack.c.l.bf16 %v628_v58 }
  0x2f   : > { %361 = vst [vmem:[#allocation2 + $0x44] sm:$0x1] %v360_v41  ;;  %v452_v1 = vsel %vm446_vm6, %v450_v55, %v451_v56  ;;  %v544_v19 = vsel %vm538_vm7, %v542_v9, %v543_v2  ;;  %v711_v22 = vunpack.c.l.bf16 %v703_v63  ;;  %v1512_v24 = vld [vmem:[#allocation2 + $0x14] sm:$0x1]  ;;  %v1514_v25 = vld [vmem:[#allocation2 + $0x1c] sm:$0x1]  ;;  %v712_v29 = vunpack.c.l.bf16 %v704_v4 }
  0x30   : > { %v480_v7 = vadd.f32 %v452_v1, %v382_v44  ;;  %v1516_v26 = vld [vmem:[#allocation2 + $0x10] sm:$0xe]  ;;  %v801_v30 = vunpack.c.l.bf16 %v793_v10  ;;  %v802_v31 = vunpack.c.l.bf16 %v794_v11  ;;  %v604_v32 = vadd.f32 %v596_v12, %v571_v20  ;;  %v918_v63 = vld [vmem:[#allocation2 + $0x18] sm:$0xe]  ;;  %v933_v0 = vld [vmem:[%s1849_s1 + $0x4] sm:$0x1] }
  0x31   : > { %v1518_v33 = vperm.slane %v629_v21, 4  ;;  %v1520_v34 = vperm.slane %v629_v21, 5  ;;  %v836_v37 = vunpack.c.l.bf16 %v1512_v24  ;;  %v837_v38 = vunpack.c.l.bf16 %v1514_v25  ;;  %v364_v10 = vld [vmem:[#allocation2 + $0x10] sm:$0xf]  ;;  %v365_v11 = vld [vmem:[#allocation2 + $0x18] sm:$0xf] }
  0x32   : > { %v572_v28 = vadd.f32 %v544_v19, %v480_v7  ;;  %v925_v39 = vunpack.c.l.bf16 %v1516_v26  ;;  %v1535_v57 = vperm.slane %v810_v35, 6  ;;  %v1537_v58 = vperm.slane %v810_v35, 7  ;;  %v399_v18 = vld [vmem:[#allocation2 + $0x14] sm:$0x1]  ;;  %v400_v19 = vld [vmem:[#allocation2 + $0x1c] sm:$0x1] }
  0x33   : > { %v631_v41 = vmul.f32 %v1518_v33, %v587_v62  ;;  %v632_v42 = vmul.f32 %v1518_v33, %v620_v15  ;;  %v633_v43 = vmul.f32 %v1518_v33, %v588_v3  ;;  %v634_v44 = vmul.f32 %v1518_v33, %v621_v16 }
  0x34   : > { %v605_v36 = vadd.f32 %v597_v13, %v572_v28  ;;  %v720_v45 = vmul.f32 %v1520_v34, %v711_v22  ;;  %v721_v46 = vmul.f32 %v1520_v34, %v620_v15  ;;  %v722_v47 = vmul.f32 %v1520_v34, %v712_v29 }
  0x35   : > { %v723_v48 = vmul.f32 %v1520_v34, %v621_v16  ;;  %v663_v49 = vrot.slane %v631_v41, 1  ;;  %v664_v23 = vrot.slane %v632_v42, 1  ;;  %v666_v50 = vrot.slane %v633_v43, 1 }
  0x36   : > { %v667_v27 = vrot.slane %v634_v44, 1  ;;  %v752_v51 = vrot.slane %v720_v45, 2  ;;  %v753_v52 = vrot.slane %v721_v46, 2  ;;  %v755_v53 = vrot.slane %v722_v47, 2 }
  0x37   : > { %v756_v54 = vrot.slane %v723_v48, 2  ;;  %v665_v55 = vsel %vm446_vm6, %v663_v49, %v664_v23  ;;  %v812_v1 = vmul.f32 %v1535_v57, %v801_v30  ;;  %v813_v2 = vmul.f32 %v1535_v57, %v802_v31  ;;  %v489_v48 = vld [vmem:[#allocation2 + $0x10] sm:$0xe]  ;;  %v490_v49 = vld [vmem:[#allocation2 + $0x18] sm:$0xe] }
  0x38   : > { %v668_v56 = vsel %vm446_vm6, %v666_v50, %v667_v27  ;;  %v695_v59 = vadd.f32 %v665_v55, %v604_v32  ;;  %v754_v61 = vsel %vm538_vm7, %v752_v51, %v753_v52  ;;  %v845_v3 = vmul.f32 %v1537_v58, %v801_v30 }
  0x39   : > { %v696_v60 = vadd.f32 %v668_v56, %v605_v36  ;;  %v757_v62 = vsel %vm538_vm7, %v755_v53, %v756_v54  ;;  %v846_v4 = vmul.f32 %v1537_v58, %v836_v37  ;;  %v847_v8 = vmul.f32 %v1537_v58, %v802_v31 }
  0x3a   : > { %v784_v6 = vadd.f32 %v754_v61, %v695_v59  ;;  %v848_v9 = vmul.f32 %v1537_v58, %v837_v38  ;;  %v877_v12 = vrot.slane %v845_v3, 1  ;;  %v926_v15 = vunpack.c.l.bf16 %v918_v63 }
  0x3b   : > { %v785_v7 = vadd.f32 %v757_v62, %v696_v60  ;;  %v878_v13 = vrot.slane %v846_v4, 1  ;;  %v934_v16 = vunpack.c.l.bf16 %v933_v0  ;;  %v880_v22 = vrot.slane %v847_v8, 1  ;;  %v1574_v62 = vld [vmem:[%s1851_s3] ss:$0 sm:$0xff] }
  0x3c   : > { %v820_v20 = vadd.f32 %v812_v1, %v784_v6  ;;  %v881_v24 = vrot.slane %v848_v9, 1  ;;  %v372_v28 = vunpack.c.l.bf16 %v364_v10  ;;  %v373_v29 = vunpack.c.l.bf16 %v365_v11  ;;  %v581_v6 = vld [vmem:[#allocation2 + $0x18] sm:$0xf]  ;;  %v582_v11 = vld [vmem:[#allocation2 + $0x20] sm:$0xf] }
  0x3d   : > { %v821_v21 = vadd.f32 %v813_v2, %v785_v7  ;;  %v879_v25 = vsel %vm446_vm6, %v877_v12, %v878_v13  ;;  %v1551_v26 = vperm.slane %v934_v16, 0  ;;  %v407_v32 = vunpack.c.l.bf16 %v399_v18  ;;  %v614_v12 = vld [vmem:[#allocation2 + $0x1c] sm:$0x1] }
  0x3e   : > { %v882_v30 = vsel %vm446_vm6, %v880_v22, %v881_v24  ;;  %v909_v31 = vadd.f32 %v879_v25, %v820_v20  ;;  %v408_v35 = vunpack.c.l.bf16 %v400_v19  ;;  %v383_v45 = vmul.f32 %v1423_v17, %v372_v28  ;;  %v615_v19 = vld [vmem:[#allocation2 + $0x24] sm:$0x1] }
  0x3f   : > { %v910_v36 = vadd.f32 %v882_v30, %v821_v21  ;;  %v936_v41 = vmul.f32 %v1551_v26, %v925_v39  ;;  %v937_v42 = vmul.f32 %v1551_v26, %v836_v37  ;;  %v938_v43 = vmul.f32 %v1551_v26, %v926_v15  ;;  %v1565_v37 = vld [vmem:[%s1850_s2] ss:$0 sm:$0xff] }
  0x40   : > { %v939_v44 = vmul.f32 %v1551_v26, %v837_v38  ;;  %v384_v46 = vmul.f32 %v1423_v17, %v373_v29  ;;  %v418_v47 = vmul.f32 %v1449_v40, %v372_v28  ;;  %v419_v51 = vmul.f32 %v1449_v40, %v407_v32 }
  0x41   : > { %v968_v23 = vrot.slane %v936_v41, 2  ;;  %v969_v50 = vrot.slane %v937_v42, 2  ;;  %v971_v27 = vrot.slane %v938_v43, 2  ;;  %v420_v38 = vmul.f32 %v1449_v40, %v373_v29 }
  0x42   : > { %v972_v39 = vrot.slane %v939_v44, 2  ;;  %v421_v52 = vmul.f32 %v1449_v40, %v408_v35  ;;  %v453_v53 = vrot.slane %v418_v47, 1  ;;  %v454_v55 = vrot.slane %v419_v51, 1  ;;  %v705_v44 = vld [vmem:[#allocation2 + $0x18] sm:$0xe] }
  0x43   : > { %v970_v54 = vsel %vm538_vm7, %v968_v23, %v969_v50  ;;  %v497_v56 = vunpack.c.l.bf16 %v489_v48  ;;  %v498_v59 = vunpack.c.l.bf16 %v490_v49  ;;  %v456_v63 = vrot.slane %v420_v38, 1  ;;  %v706_v48 = vld [vmem:[#allocation2 + $0x20] sm:$0xe] }
  0x44   : > { %v973_v60 = vsel %vm538_vm7, %v971_v27, %v972_v39  ;;  %v1000_v61 = vadd.f32 %v970_v54, %v909_v31  ;;  %v457_v0 = vrot.slane %v421_v52, 1  ;;  %v455_v2 = vsel %vm446_vm6, %v453_v53, %v454_v55  ;;  %v795_v27 = vld [vmem:[#allocation2 + $0x20] sm:$0xf] }
  0x45   : > { %v1001_v1 = vadd.f32 %v973_v60, %v910_v36  ;;  %v510_v3 = vmul.f32 %v1468_v5, %v497_v56  ;;  %v511_v4 = vmul.f32 %v1468_v5, %v407_v32  ;;  %v481_v9 = vadd.f32 %v455_v2, %v383_v45 }
  0x46   : > { %v1012_v7 = vmul.f32 %v1565_v37, %v1000_v61  ;;  %v458_v8 = vsel %vm446_vm6, %v456_v63, %v457_v0  ;;  %v512_v10 = vmul.f32 %v1468_v5, %v498_v59  ;;  %v513_v16 = vmul.f32 %v1468_v5, %v408_v35  ;;  %v796_v59 = vld [vmem:[#allocation2 + $0x28] sm:$0xf] }
  0x47   : > { %v1013_v13 = vmul.f32 %v1565_v37, %v1001_v1  ;;  %v482_v15 = vadd.f32 %v458_v8, %v384_v46  ;;  %v545_v18 = vrot.slane %v510_v3, 2  ;;  %v546_v21 = vrot.slane %v511_v4, 2 }
  0x48   : > { %v1585_v20 = vadd.f32 %v1574_v62, %v1012_v7  ;;  %v548_v22 = vrot.slane %v512_v10, 2  ;;  %v589_v24 = vunpack.c.l.bf16 %v581_v6  ;;  %v549_v28 = vrot.slane %v513_v16, 2  ;;  %v831_v10 = vld [vmem:[#allocation2 + $0x2c] sm:$0x1] }
  0x49   : > { %v1588_v25 = vadd.f32 %v1574_v62, %v1013_v13  ;;  %v590_v29 = vunpack.c.l.bf16 %v582_v11  ;;  %v622_v30 = vunpack.c.l.bf16 %v614_v12  ;;  %v547_v32 = vsel %vm538_vm7, %v545_v18, %v546_v21 }
  0x4a   : > { %v1272_v31 = vmul.f32 -1.442695, %v1585_v20  ;;  %v623_v36 = vunpack.c.l.bf16 %v615_v19  ;;  %v550_v41 = vsel %vm538_vm7, %v548_v22, %v549_v28  ;;  %v573_v42 = vadd.f32 %v547_v32, %v481_v9  ;;  %v830_v9 = vld [vmem:[#allocation2 + $0x24] sm:$0x1]  ;;  %v919_v32 = vld [vmem:[#allocation2 + $0x20] sm:$0xe] }
  0x4b   : > { %v1273_v35 = vmul.f32 -1.442695, %v1588_v25  ;;  %v598_v43 = vmul.f32 %v1474_v14, %v589_v24  ;;  %v574_v45 = vadd.f32 %v550_v41, %v482_v15  ;;  %v635_v46 = vmul.f32 %v1518_v33, %v589_v24 }
  0x4c   : > { %1318 = vpow2.f32 %v1272_v31  ;;  %v636_v47 = vmul.f32 %v1518_v33, %v622_v30  ;;  %v599_v49 = vmul.f32 %v1474_v14, %v590_v29  ;;  %v637_v23 = vmul.f32 %v1518_v33, %v590_v29 }
  0x4d   : > { %1320 = vpow2.f32 %v1273_v35  ;;  %v638_v50 = vmul.f32 %v1518_v33, %v623_v36  ;;  %v606_v51 = vadd.f32 %v598_v43, %v573_v42  ;;  %v669_v39 = vrot.slane %v635_v46, 1  ;;  %v920_v43 = vld [vmem:[#allocation2 + $0x28] sm:$0xe] }
  0x4e   : > { %v670_v38 = vrot.slane %v636_v47, 1  ;;  %v713_v52 = vunpack.c.l.bf16 %v705_v44  ;;  %v672_v53 = vrot.slane %v637_v23, 1  ;;  %v714_v55 = vunpack.c.l.bf16 %v706_v48 }
  0x4f   : > { %v673_v54 = vrot.slane %v638_v50, 1  ;;  %v725_v56 = vmul.f32 %v1520_v34, %v622_v30  ;;  %v607_v60 = vadd.f32 %v599_v49, %v574_v45  ;;  %v727_v63 = vmul.f32 %v1520_v34, %v623_v36 }
  0x50   : > { %v724_v61 = vmul.f32 %v1520_v34, %v713_v52  ;;  %v803_v0 = vunpack.c.l.bf16 %v795_v27  ;;  %v671_v1 = vsel %vm446_vm6, %v669_v39, %v670_v38  ;;  %v726_v2 = vmul.f32 %v1520_v34, %v714_v55 }
  0x51   : > { %v674_v4 = vsel %vm446_vm6, %v672_v53, %v673_v54  ;;  %v759_v7 = vrot.slane %v725_v56, 2  ;;  %v804_v8 = vunpack.c.l.bf16 %v796_v59  ;;  %v697_v13 = vadd.f32 %v671_v1, %v606_v51 }
  0x52   : > { %v1319_v3 = vpop.eup %1318  ;;  %v758_v6 = vrot.slane %v724_v61, 2  ;;  %v761_v15 = vrot.slane %v726_v2, 2  ;;  %v762_v16 = vrot.slane %v727_v63, 2  ;;  %v698_v19 = vadd.f32 %v674_v4, %v607_v60 }
  0x53   : > { %v1321_v11 = vpop.eup %1320  ;;  %v1606_v12 = vadd.f32 1.0, %v1319_v3  ;;  %v814_v21 = vmul.f32 %v1535_v57, %v803_v0  ;;  %v838_v24 = vunpack.c.l.bf16 %v830_v9  ;;  %v839_v28 = vunpack.c.l.bf16 %v831_v10 }
  0x54   : > { %v1608_v18 = vadd.f32 1.0, %v1321_v11  ;;  %v760_v30 = vsel %vm538_vm7, %v758_v6, %v759_v7  ;;  %v815_v31 = vmul.f32 %v1535_v57, %v804_v8  ;;  %v763_v41 = vsel %vm538_vm7, %v761_v15, %v762_v16  ;;  %v366_v6 = vld [vmem:[#allocation2 + $0x20] sm:$0xf]  ;;  %v367_v7 = vld [vmem:[#allocation2 + $0x28] sm:$0xf] }
  0x55   : > { %1322 = vrcp.f32 %v1606_v12  ;;  %v1075_v22 = vand.u32 2147483648, %v1606_v12  ;;  %v1073_v36 = vand.u32 2147483647, %v1606_v12  ;;  %v786_v42 = vadd.f32 %v760_v30, %v697_v13  ;;  %v401_v13 = vld [vmem:[#allocation2 + $0x24] sm:$0x1] }
  0x56   : > { %1324 = vrcp.f32 %v1608_v18  ;;  %v1090_v29 = vand.u32 2147483648, %v1608_v18  ;;  %v1088_v35 = vand.u32 2147483647, %v1608_v18  ;;  %v787_v46 = vadd.f32 %v763_v41, %v698_v19  ;;  %v1646_v15 = vld [vmem:[#allocation2 + $0x2c] sm:$0x1] }
  0x57   : > { %v1620_v44 = vor.u32 1.1754944e-38, %v1075_v22  ;;  %v849_v47 = vmul.f32 %v1537_v58, %v803_v0  ;;  %v822_v48 = vadd.f32 %v814_v21, %v786_v42  ;;  %v850_v49 = vmul.f32 %v1537_v58, %v838_v24 }
  0x58   : > { %v1622_v45 = vor.u32 1.1754944e-38, %v1090_v29  ;;  %v851_v23 = vmul.f32 %v1537_v58, %v804_v8  ;;  %v852_v50 = vmul.f32 %v1537_v58, %v839_v28  ;;  %vm1069_vm8 = vweird.f32 %v1606_v12 }
  0x59   : > { %v823_v27 = vadd.f32 %v815_v31, %v787_v46  ;;  %v883_v51 = vrot.slane %v849_v47, 1  ;;  %v927_v39 = vunpack.c.l.bf16 %v919_v32  ;;  %v928_v38 = vunpack.c.l.bf16 %v920_v43 }
  0x5a   : > { %vm1084_vm9 = vweird.f32 %v1608_v18  ;;  %v884_v53 = vrot.slane %v850_v49, 1  ;;  %v886_v54 = vrot.slane %v851_v23, 1  ;;  %v887_v55 = vrot.slane %v852_v50, 1 }
  0x5b   : > { %v1323_v52 = vpop.eup %1322  ;;  %v941_v56 = vmul.f32 %v1551_v26, %v838_v24  ;;  %vm1632_vm11 = vcmp.eq.f32.partialorder %v1073_v36, 8.507059e+37  ;;  %v940_v63 = vmul.f32 %v1551_v26, %v927_v39  ;;  %v942_v0 = vmul.f32 %v1551_v26, %v928_v38 }
  0x5c   : > { %v1325_v59 = vpop.eup %1324  ;;  %v1065_v60 = vmul.f32 %v1323_v52, %v1606_v12  ;;  %vm1070_vm10 = vweird.f32 %v1323_v52  ;;  %vm1639_vm13 = vcmp.eq.f32.partialorder %v1088_v35, 8.507059e+37  ;;  %v885_v3 = vsel %vm446_vm6, %v883_v51, %v884_v53 }
  0x5d   : > { %v1080_v1 = vmul.f32 %v1325_v59, %v1608_v18  ;;  %vm1085_vm12 = vweird.f32 %v1325_v59  ;;  %v888_v4 = vsel %vm446_vm6, %v886_v54, %v887_v55  ;;  %v911_v9 = vadd.f32 %v885_v3, %v822_v48  ;;  %vm1071_vm14 = vmor %vm1069_vm8, %vm1070_vm10  ;;  %v491_v54 = vld [vmem:[#allocation2 + $0x20] sm:$0xe]  ;;  %v492_v55 = vld [vmem:[#allocation2 + $0x28] sm:$0xe] }
  0x5e   : > { %v1066_v8 = vsub.f32 1.0, %v1065_v60  ;;  %v912_v10 = vadd.f32 %v888_v4, %v823_v27  ;;  %v943_v11 = vmul.f32 %v1551_v26, %v839_v28  ;;  %v974_v19 = vrot.slane %v940_v63, 2  ;;  %vm1086_vm15 = vmor %vm1084_vm9, %vm1085_vm12 }
  0x5f   : > { %v1081_v16 = vsub.f32 1.0, %v1080_v1  ;;  %v975_v21 = vrot.slane %v941_v56, 2  ;;  %v977_v22 = vrot.slane %v942_v0, 2  ;;  %v374_v30 = vunpack.c.l.bf16 %v366_v6 }
  0x60   : > { %v1067_v24 = vmul.f32 %v1323_v52, %v1066_v8  ;;  %v978_v29 = vrot.slane %v943_v11, 2  ;;  %v375_v31 = vunpack.c.l.bf16 %v367_v7  ;;  %v409_v35 = vunpack.c.l.bf16 %v401_v13  ;;  %v583_v7 = vld [vmem:[#allocation2 + $0x28] sm:$0xf]  ;;  %v584_v8 = vld [vmem:[#allocation2 + $0x30] sm:$0xf] }
  0x61   : > { %v1082_v32 = vmul.f32 %v1325_v59, %v1081_v16  ;;  %v976_v36 = vsel %vm538_vm7, %v974_v19, %v975_v21  ;;  %v410_v41 = vunpack.c.l.bf16 %v1646_v15  ;;  %v385_v46 = vmul.f32 %v1423_v17, %v374_v30  ;;  %v616_v13 = vld [vmem:[#allocation2 + $0x2c] sm:$0x1]  ;;  %v617_v15 = vld [vmem:[#allocation2 + $0x34] sm:$0x1] }
  0x62   : > { %v1068_v42 = vadd.f32 %v1323_v52, %v1067_v24  ;;  %v979_v28 = vsel %vm538_vm7, %v977_v22, %v978_v29  ;;  %v1002_v43 = vadd.f32 %v976_v36, %v911_v9  ;;  %v386_v49 = vmul.f32 %v1423_v17, %v375_v31 }
  0x63   : > { %v1083_v47 = vadd.f32 %v1325_v59, %v1082_v32  ;;  %v1003_v48 = vadd.f32 %v979_v28, %v912_v10  ;;  %v422_v23 = vmul.f32 %v1449_v40, %v374_v30  ;;  %v423_v51 = vmul.f32 %v1449_v40, %v409_v35 }
  0x64   : > { %v1072_v50 = vsel %vm1071_vm14, %v1323_v52, %v1068_v42  ;;  %v1014_v27 = vmul.f32 %v1565_v37, %v1002_v43  ;;  %v424_v39 = vmul.f32 %v1449_v40, %v375_v31  ;;  %v425_v52 = vmul.f32 %v1449_v40, %v410_v41 }
  0x65   : > { %v1077_v12 = vsel %vm1632_vm11, %v1620_v44, %v1072_v50  ;;  %v1087_v38 = vsel %vm1086_vm15, %v1325_v59, %v1083_v47  ;;  %v1015_v53 = vmul.f32 %v1565_v37, %v1003_v48  ;;  %v459_v63 = vrot.slane %v422_v23, 1 }
  0x66   : > { %v1092_v18 = vsel %vm1639_vm13, %v1622_v45, %v1087_v38  ;;  %v1184_v56 = vmul.f32 %v1077_v12, %v1585_v20  ;;  %v1673_v60 = vadd.f32 %v1574_v62, %v1014_v27  ;;  %v460_v59 = vrot.slane %v423_v51, 1  ;;  %v707_v51 = vld [vmem:[#allocation2 + $0x28] sm:$0xe] }
  0x67   : > { %v1185_v61 = vmul.f32 %v1092_v18, %v1588_v25  ;;  %v1677_v44 = vadd.f32 %v1574_v62, %v1015_v53  ;;  %v462_v0 = vrot.slane %v424_v39, 1  ;;  %v463_v20 = vrot.slane %v425_v52, 1  ;;  %v708_v39 = vld [vmem:[#allocation2 + $0x30] sm:$0xe] }
  0x68   : > { %v1274_v45 = vmul.f32 -1.442695, %v1673_v60  ;;  %v499_v1 = vunpack.c.l.bf16 %v491_v54  ;;  %v500_v2 = vunpack.c.l.bf16 %v492_v55  ;;  %v461_v4 = vsel %vm446_vm6, %v459_v63, %v460_v59 }
  0x69   : > { %v1287_v3 = vpack.c.bf16 %v1185_v61, %v1184_v56  ;;  %v1275_v25 = vmul.f32 -1.442695, %v1677_v44  ;;  %v515_v6 = vmul.f32 %v1468_v5, %v409_v35  ;;  %v464_v9 = vsel %vm446_vm6, %v462_v0, %v463_v20 }
  0x6a   : > { %1326 = vpow2.f32 %v1274_v45  ;;  %v483_v10 = vadd.f32 %v461_v4, %v385_v46  ;;  %v514_v11 = vmul.f32 %v1468_v5, %v499_v1  ;;  %v484_v16 = vadd.f32 %v464_v9, %v386_v49  ;;  %v797_v45 = vld [vmem:[#allocation2 + $0x30] sm:$0xf]  ;;  %v798_v1 = vld [vmem:[#allocation2 + $0x38] sm:$0xf] }
  0x6b   : > { %1288 = vst [vmem:[%s1684_s11] sm:$0xff] %v1287_v3   ;;  %1328 = vpow2.f32 %v1275_v25  ;;  %v516_v19 = vmul.f32 %v1468_v5, %v500_v2  ;;  %v517_v21 = vmul.f32 %v1468_v5, %v410_v41  ;;  %v552_v24 = vrot.slane %v515_v6, 2  ;;  %v832_v2 = vld [vmem:[#allocation2 + $0x34] sm:$0x1] }
  0x6c   : > { %v551_v22 = vrot.slane %v514_v11, 2  ;;  %v591_v29 = vunpack.c.l.bf16 %v583_v7  ;;  %v592_v30 = vunpack.c.l.bf16 %v584_v8  ;;  %v624_v36 = vunpack.c.l.bf16 %v616_v13  ;;  %v833_v7 = vld [vmem:[#allocation2 + $0x3c] sm:$0x1] }
  0x6d   : > { %v554_v31 = vrot.slane %v516_v19, 2  ;;  %v555_v32 = vrot.slane %v517_v21, 2  ;;  %v625_v35 = vunpack.c.l.bf16 %v617_v15  ;;  %v715_v59 = vunpack.c.l.bf16 %v707_v51 }
  0x6e   : > { %v553_v42 = vsel %vm538_vm7, %v551_v22, %v552_v24  ;;  %v639_v28 = vmul.f32 %v1518_v33, %v591_v29  ;;  %v640_v47 = vmul.f32 %v1518_v33, %v624_v36  ;;  %v641_v48 = vmul.f32 %v1518_v33, %v592_v30 }
  0x6f   : > { %v556_v43 = vsel %vm538_vm7, %v554_v31, %v555_v32  ;;  %v575_v46 = vadd.f32 %v553_v42, %v483_v10  ;;  %v600_v23 = vmul.f32 %v1474_v14, %v591_v29  ;;  %v601_v50 = vmul.f32 %v1474_v14, %v592_v30 }
  0x70   : > { %v1327_v41 = vpop.eup %1326  ;;  %v576_v49 = vadd.f32 %v556_v43, %v484_v16  ;;  %v642_v27 = vmul.f32 %v1518_v33, %v625_v35  ;;  %v675_v53 = vrot.slane %v639_v28, 1  ;;  %v676_v52 = vrot.slane %v640_v47, 1 }
  0x71   : > { %v1329_v12 = vpop.eup %1328  ;;  %v1703_v38 = vadd.f32 1.0, %v1327_v41  ;;  %v678_v54 = vrot.slane %v641_v48, 1  ;;  %v608_v18 = vadd.f32 %v600_v23, %v575_v46  ;;  %v716_v0 = vunpack.c.l.bf16 %v708_v39 }
  0x72   : > { %v1705_v55 = vadd.f32 1.0, %v1329_v12  ;;  %v609_v56 = vadd.f32 %v601_v50, %v576_v49  ;;  %v679_v63 = vrot.slane %v642_v27, 1  ;;  %v677_v4 = vsel %vm446_vm6, %v675_v53, %v676_v52 }
  0x73   : > { %1330 = vrcp.f32 %v1703_v38  ;;  %v1105_v61 = vand.u32 2147483648, %v1703_v38  ;;  %v1103_v3 = vand.u32 2147483647, %v1703_v38  ;;  %v699_v10 = vadd.f32 %v677_v4, %v608_v18  ;;  %v921_v18 = vld [vmem:[#allocation2 + $0x30] sm:$0xe] }
  0x74   : > { %1332 = vrcp.f32 %v1705_v55  ;;  %v1120_v20 = vand.u32 2147483648, %v1705_v55  ;;  %v1118_v25 = vand.u32 2147483647, %v1705_v55  ;;  %v680_v6 = vsel %vm446_vm6, %v678_v54, %v679_v63 }
  0x75   : > { %v1715_v8 = vor.u32 1.1754944e-38, %v1105_v61  ;;  %v700_v11 = vadd.f32 %v680_v6, %v609_v56  ;;  %v728_v13 = vmul.f32 %v1520_v34, %v715_v59  ;;  %v729_v15 = vmul.f32 %v1520_v34, %v624_v36  ;;  %v922_v56 = vld [vmem:[#allocation2 + $0x38] sm:$0xe] }
  0x76   : > { %v1717_v9 = vor.u32 1.1754944e-38, %v1120_v20  ;;  %v730_v16 = vmul.f32 %v1520_v34, %v716_v0  ;;  %v731_v19 = vmul.f32 %v1520_v34, %v625_v35  ;;  %vm1099_vm0 = vweird.f32 %v1703_v38 }
  0x77   : > { %v805_v21 = vunpack.c.l.bf16 %v797_v45  ;;  %v806_v22 = vunpack.c.l.bf16 %v798_v1  ;;  %v840_v24 = vunpack.c.l.bf16 %v832_v2  ;;  %v841_v29 = vunpack.c.l.bf16 %v833_v7 }
  0x78   : > { %vm1114_vm1 = vweird.f32 %v1705_v55  ;;  %v764_v31 = vrot.slane %v728_v13, 2  ;;  %v765_v32 = vrot.slane %v729_v15, 2  ;;  %v767_v42 = vrot.slane %v730_v16, 2  ;;  %v368_v15 = vld [vmem:[#allocation2 + $0x30] sm:$0xf] }
  0x79   : > { %v1331_v30 = vpop.eup %1330  ;;  %v768_v28 = vrot.slane %v731_v19, 2  ;;  %vm1726_vm3 = vcmp.eq.f32.partialorder %v1103_v3, 8.507059e+37  ;;  %v816_v35 = vmul.f32 %v1535_v57, %v805_v21  ;;  %v817_v47 = vmul.f32 %v1535_v57, %v806_v22 }
  0x7a   : > { %v1333_v43 = vpop.eup %1332  ;;  %v1095_v36 = vmul.f32 %v1331_v30, %v1703_v38  ;;  %vm1100_vm2 = vweird.f32 %v1331_v30  ;;  %vm1733_vm5 = vcmp.eq.f32.partialorder %v1118_v25, 8.507059e+37  ;;  %v766_v49 = vsel %vm538_vm7, %v764_v31, %v765_v32  ;;  %v403_v38 = vld [vmem:[#allocation2 + $0x34] sm:$0x1] }
  0x7b   : > { %v1110_v48 = vmul.f32 %v1333_v43, %v1705_v55  ;;  %vm1115_vm4 = vweird.f32 %v1333_v43  ;;  %v769_v23 = vsel %vm538_vm7, %v767_v42, %v768_v28  ;;  %v788_v27 = vadd.f32 %v766_v49, %v699_v10  ;;  %vm1101_vm8 = vmor %vm1099_vm0, %vm1100_vm2  ;;  %v404_v28 = vld [vmem:[#allocation2 + $0x3c] sm:$0x1] }
  0x7c   : > { %v1096_v50 = vsub.f32 1.0, %v1095_v36  ;;  %v789_v51 = vadd.f32 %v769_v23, %v700_v11  ;;  %v853_v39 = vmul.f32 %v1537_v58, %v805_v21  ;;  %v854_v53 = vmul.f32 %v1537_v58, %v840_v24  ;;  %vm1116_vm9 = vmor %vm1114_vm1, %vm1115_vm4 }
  0x7d   : > { %v1111_v12 = vsub.f32 1.0, %v1110_v48  ;;  %v855_v52 = vmul.f32 %v1537_v58, %v806_v22  ;;  %v856_v54 = vmul.f32 %v1537_v58, %v841_v29  ;;  %v824_v61 = vadd.f32 %v816_v35, %v788_v27  ;;  %v494_v27 = vld [vmem:[#allocation2 + $0x38] sm:$0xe] }
  0x7e   : > { %v1097_v63 = vmul.f32 %v1331_v30, %v1096_v50  ;;  %v825_v59 = vadd.f32 %v817_v47, %v789_v51  ;;  %v889_v0 = vrot.slane %v853_v39, 1  ;;  %v890_v20 = vrot.slane %v854_v53, 1 }
  0x7f   : > { %v1112_v45 = vmul.f32 %v1333_v43, %v1111_v12  ;;  %v892_v1 = vrot.slane %v855_v52, 1  ;;  %v893_v2 = vrot.slane %v856_v54, 1  ;;  %v929_v25 = vunpack.c.l.bf16 %v921_v18 }
  0x80   : > { %v1098_v3 = vadd.f32 %v1331_v30, %v1097_v63  ;;  %v930_v4 = vunpack.c.l.bf16 %v922_v56  ;;  %v945_v6 = vmul.f32 %v1551_v26, %v840_v24  ;;  %v891_v10 = vsel %vm446_vm6, %v889_v0, %v890_v20  ;;  %v369_v24 = vld [vmem:[#allocation2 + $0x38] sm:$0xf] }
  0x81   : > { %v1113_v7 = vadd.f32 %v1333_v43, %v1112_v45  ;;  %v894_v11 = vsel %vm446_vm6, %v892_v1, %v893_v2  ;;  %v947_v13 = vmul.f32 %v1551_v26, %v841_v29  ;;  %v913_v19 = vadd.f32 %v891_v10, %v824_v61  ;;  %v618_v10 = vld [vmem:[#allocation2 + $0x3c] sm:$0x1] }
  0x82   : > { %v1102_v16 = vsel %vm1101_vm8, %v1331_v30, %v1098_v3  ;;  %v914_v21 = vadd.f32 %v894_v11, %v825_v59  ;;  %v944_v22 = vmul.f32 %v1551_v26, %v929_v25  ;;  %v946_v42 = vmul.f32 %v1551_v26, %v930_v4  ;;  %v493_v30 = vld [vmem:[#allocation2 + $0x30] sm:$0xe] }
  0x83   : > { %v1107_v31 = vsel %vm1726_vm3, %v1715_v8, %v1102_v16  ;;  %v1117_v32 = vsel %vm1116_vm9, %v1333_v43, %v1113_v7  ;;  %v981_v29 = vrot.slane %v945_v6, 2  ;;  %v984_v47 = vrot.slane %v947_v13, 2  ;;  %v585_v6 = vld [vmem:[#allocation2 + $0x38] sm:$0xf]  ;;  %v586_v7 = vld [vmem:[#allocation2 + $0x40] sm:$0xf] }
  0x84   : > { %v1122_v55 = vsel %vm1733_vm5, %v1717_v9, %v1117_v32  ;;  %v1186_v36 = vmul.f32 %v1107_v31, %v1673_v60  ;;  %v980_v35 = vrot.slane %v944_v22, 2  ;;  %v983_v49 = vrot.slane %v946_v42, 2 }
  0x85   : > { %v1187_v48 = vmul.f32 %v1122_v55, %v1677_v44  ;;  %v376_v46 = vunpack.c.l.bf16 %v368_v15  ;;  %v377_v8 = vunpack.c.l.bf16 %v369_v24  ;;  %v411_v23 = vunpack.c.l.bf16 %v403_v38  ;;  %v710_v55 = vld [vmem:[#allocation2 + $0x40] sm:$0xe] }
  0x86   : > { %v982_v43 = vsel %vm538_vm7, %v980_v35, %v981_v29  ;;  %v412_v50 = vunpack.c.l.bf16 %v404_v28  ;;  %v501_v51 = vunpack.c.l.bf16 %v493_v30  ;;  %v985_v41 = vsel %vm538_vm7, %v983_v49, %v984_v47  ;;  %v709_v30 = vld [vmem:[#allocation2 + $0x38] sm:$0xe] }
  0x87   : > { %v1292_v39 = vpack.c.bf16 %v1187_v48, %v1186_v36  ;;  %v1004_v9 = vadd.f32 %v982_v43, %v913_v19  ;;  %v387_v60 = vmul.f32 %v1423_v17, %v376_v46  ;;  %v1005_v12 = vadd.f32 %v985_v41, %v914_v21  ;;  %v619_v19 = vld [vmem:[#allocation2 + $0x44] sm:$0x1] }
  0x88   : > { %v388_v53 = vmul.f32 %v1423_v17, %v377_v8  ;;  %v426_v44 = vmul.f32 %v1449_v40, %v376_v46  ;;  %v427_v52 = vmul.f32 %v1449_v40, %v411_v23  ;;  %v428_v18 = vmul.f32 %v1449_v40, %v377_v8 }
  0x89   : > { %1304 = vst [vmem:[%s1684_s11 + $0x8] sm:$0xff] %v1292_v39   ;;  %v1016_v54 = vmul.f32 %v1565_v37, %v1004_v9  ;;  %v429_v56 = vmul.f32 %v1449_v40, %v412_v50  ;;  %v502_v63 = vunpack.c.l.bf16 %v494_v27  ;;  %v1017_v61 = vmul.f32 %v1565_v37, %v1005_v12 }
  0x8a   : > { %v465_v59 = vrot.slane %v426_v44, 1  ;;  %v466_v0 = vrot.slane %v427_v52, 1  ;;  %v518_v45 = vmul.f32 %v1468_v5, %v501_v51  ;;  %v468_v20 = vrot.slane %v428_v18, 1  ;;  %v799_v44 = vld [vmem:[#allocation2 + $0x40] sm:$0xf] }
  0x8b   : > { %v1776_v17 = vadd.f32 %v1574_v62, %v1016_v54  ;;  %v469_v1 = vrot.slane %v429_v56, 1  ;;  %v519_v2 = vmul.f32 %v1468_v5, %v411_v23  ;;  %v1780_v3 = vadd.f32 %v1574_v62, %v1017_v61 }
  0x8c   : > { %v467_v25 = vsel %vm446_vm6, %v465_v59, %v466_v0  ;;  %v520_v40 = vmul.f32 %v1468_v5, %v502_v63  ;;  %v521_v4 = vmul.f32 %v1468_v5, %v412_v50  ;;  %v557_v16 = vrot.slane %v518_v45, 2 }
  0x8d   : > { %v1276_v11 = vmul.f32 -1.442695, %v1776_v17  ;;  %v470_v13 = vsel %vm446_vm6, %v468_v20, %v469_v1  ;;  %v485_v15 = vadd.f32 %v467_v25, %v387_v60  ;;  %v1277_v21 = vmul.f32 -1.442695, %v1780_v3  ;;  %v800_v1 = vld [vmem:[#allocation2 + $0x48] sm:$0xf] }
  0x8e   : > { %v486_v22 = vadd.f32 %v470_v13, %v388_v53  ;;  %v558_v24 = vrot.slane %v519_v2, 2  ;;  %v560_v38 = vrot.slane %v520_v40, 2  ;;  %v561_v31 = vrot.slane %v521_v4, 2  ;;  %v834_v2 = vld [vmem:[#allocation2 + $0x44] sm:$0x1] }
  0x8f   : > { %1334 = vpow2.f32 %v1276_v11  ;;  %v593_v32 = vunpack.c.l.bf16 %v585_v6  ;;  %v594_v42 = vunpack.c.l.bf16 %v586_v7  ;;  %v626_v29 = vunpack.c.l.bf16 %v618_v10  ;;  %v835_v6 = vld [vmem:[#allocation2 + $0x4c] sm:$0x1] }
  0x90   : > { %1336 = vpow2.f32 %v1277_v21  ;;  %v559_v5 = vsel %vm538_vm7, %v557_v16, %v558_v24  ;;  %v627_v28 = vunpack.c.l.bf16 %v619_v19  ;;  %v562_v36 = vsel %vm538_vm7, %v560_v38, %v561_v31 }
  0x91   : > { %v577_v35 = vadd.f32 %v559_v5, %v485_v15  ;;  %v603_v47 = vmul.f32 %v1474_v14, %v594_v42  ;;  %v578_v48 = vadd.f32 %v562_v36, %v486_v22  ;;  %v643_v49 = vmul.f32 %v1518_v33, %v593_v32 }
  0x92   : > { %v644_v46 = vmul.f32 %v1518_v33, %v626_v29  ;;  %v645_v8 = vmul.f32 %v1518_v33, %v594_v42  ;;  %v602_v43 = vmul.f32 %v1474_v14, %v593_v32  ;;  %v646_v23 = vmul.f32 %v1518_v33, %v627_v28 }
  0x93   : > { %v717_v50 = vunpack.c.l.bf16 %v709_v30  ;;  %v718_v27 = vunpack.c.l.bf16 %v710_v55  ;;  %v681_v51 = vrot.slane %v643_v49, 1  ;;  %v611_v18 = vadd.f32 %v603_v47, %v578_v48  ;;  %v924_v47 = vld [vmem:[#allocation2 + $0x48] sm:$0xe] }
  0x94   : > { %v682_v39 = vrot.slane %v644_v46, 1  ;;  %v684_v41 = vrot.slane %v645_v8, 1  ;;  %v610_v60 = vadd.f32 %v602_v43, %v577_v35  ;;  %v685_v12 = vrot.slane %v646_v23, 1  ;;  %v923_v35 = vld [vmem:[#allocation2 + $0x40] sm:$0xe] }
  0x95   : > { %v1335_v9 = vpop.eup %1334  ;;  %v732_v53 = vmul.f32 %v1520_v34, %v717_v50  ;;  %v733_v56 = vmul.f32 %v1520_v34, %v626_v29  ;;  %v734_v63 = vmul.f32 %v1520_v34, %v718_v27  ;;  %v735_v61 = vmul.f32 %v1520_v34, %v627_v28 }
  0x96   : > { %v1337_v52 = vpop.eup %1336  ;;  %v1797_v54 = vadd.f32 1.0, %v1335_v9  ;;  %v686_v33 = vsel %vm446_vm6, %v684_v41, %v685_v12  ;;  %v683_v59 = vsel %vm446_vm6, %v681_v51, %v682_v39  ;;  %v807_v45 = vunpack.c.l.bf16 %v799_v44 }
  0x97   : > { %v1800_v14 = vadd.f32 1.0, %v1337_v52  ;;  %v770_v0 = vrot.slane %v732_v53, 2  ;;  %v701_v20 = vadd.f32 %v683_v59, %v610_v60  ;;  %v702_v40 = vadd.f32 %v686_v33, %v611_v18 }
  0x98   : > { %1338 = vrcp.f32 %v1797_v54  ;;  %v1133_v25 = vand.u32 2147483647, %v1797_v54  ;;  %v771_v4 = vrot.slane %v733_v56, 2  ;;  %v1135_v7 = vand.u32 2147483648, %v1797_v54 }
  0x99   : > { %1340 = vrcp.f32 %v1800_v14  ;;  %v1148_v34 = vand.u32 2147483647, %v1800_v14  ;;  %v773_v10 = vrot.slane %v734_v63, 2  ;;  %v774_v11 = vrot.slane %v735_v61, 2 }
  0x9a   : > { %v772_v13 = vsel %vm538_vm7, %v770_v0, %v771_v4  ;;  %v808_v15 = vunpack.c.l.bf16 %v800_v1  ;;  %v818_v16 = vmul.f32 %v1535_v57, %v807_v45  ;;  %v842_v19 = vunpack.c.l.bf16 %v834_v2 }
  0x9b   : > { %vm1129_vm10 = vweird.f32 %v1797_v54  ;;  %v775_v21 = vsel %vm538_vm7, %v773_v10, %v774_v11  ;;  %v790_v22 = vadd.f32 %v772_v13, %v701_v20  ;;  %v843_v24 = vunpack.c.l.bf16 %v835_v6 }
  0x9c   : > { %v857_v38 = vmul.f32 %v1537_v58, %v807_v45  ;;  %vm1144_vm11 = vweird.f32 %v1800_v14  ;;  %v791_v32 = vadd.f32 %v775_v21, %v702_v40  ;;  %v819_v42 = vmul.f32 %v1535_v57, %v808_v15 }
  0x9d   : > { %v858_v5 = vmul.f32 %v1537_v58, %v842_v19  ;;  %v859_v29 = vmul.f32 %v1537_v58, %v808_v15  ;;  %v1150_v55 = vand.u32 2147483648, %v1800_v14  ;;  %v860_v36 = vmul.f32 %v1537_v58, %v843_v24 }
  0x9e   : > { %v1339_v31 = vpop.eup %1338  ;;  %v826_v49 = vadd.f32 %v818_v16, %v790_v22  ;;  %v827_v46 = vadd.f32 %v819_v42, %v791_v32  ;;  %v895_v8 = vrot.slane %v857_v38, 1  ;;  %v931_v51 = vunpack.c.l.bf16 %v923_v35 }
  0x9f   : > { %v1341_v28 = vpop.eup %1340  ;;  %v1125_v30 = vmul.f32 %v1339_v31, %v1797_v54  ;;  %vm1130_vm12 = vweird.f32 %v1339_v31  ;;  %v896_v43 = vrot.slane %v858_v5, 1  ;;  %v898_v23 = vrot.slane %v859_v29, 1 }
  0xa0   : > { %v1140_v48 = vmul.f32 %v1341_v28, %v1800_v14  ;;  %v899_v50 = vrot.slane %v860_v36, 1  ;;  %v932_v39 = vunpack.c.l.bf16 %v924_v47  ;;  %v949_v41 = vmul.f32 %v1551_v26, %v842_v19  ;;  %vm1131_vm14 = vmor %vm1129_vm10, %vm1130_vm12 }
  0xa1   : > { %v1126_v57 = vsub.f32 1.0, %v1125_v30  ;;  %v897_v60 = vsel %vm446_vm6, %v895_v8, %v896_v43  ;;  %v951_v12 = vmul.f32 %v1551_v26, %v843_v24  ;;  %vm1145_vm13 = vweird.f32 %v1341_v28 }
  0xa2   : > { %v1141_v27 = vsub.f32 1.0, %v1140_v48  ;;  %v900_v58 = vsel %vm446_vm6, %v898_v23, %v899_v50  ;;  %v915_v44 = vadd.f32 %v897_v60, %v826_v49  ;;  %v948_v52 = vmul.f32 %v1551_v26, %v931_v51  ;;  %vm1146_vm15 = vmor %vm1144_vm11, %vm1145_vm13 }
  0xa3   : > { %v1127_v9 = vmul.f32 %v1339_v31, %v1126_v57  ;;  %v950_v56 = vmul.f32 %v1551_v26, %v932_v39  ;;  %v987_v33 = vrot.slane %v949_v41, 2  ;;  %v990_v63 = vrot.slane %v951_v12, 2 }
  0xa4   : > { %v1142_v53 = vmul.f32 %v1341_v28, %v1141_v27  ;;  %v1136_v61 = vor.u32 1.1754944e-38, %v1135_v7  ;;  %v916_v0 = vadd.f32 %v900_v58, %v827_v46  ;;  %v986_v45 = vrot.slane %v948_v52, 2 }
  0xa5   : > { %v1128_v18 = vadd.f32 %v1339_v31, %v1127_v9  ;;  %vm1134_vm6 = vcmp.eq.f32.partialorder %v1133_v25, 8.507059e+37  ;;  %v1151_v1 = vor.u32 1.1754944e-38, %v1150_v55  ;;  %v989_v2 = vrot.slane %v950_v56, 2 }
  0xa6   : > { %v1143_v59 = vadd.f32 %v1341_v28, %v1142_v53  ;;  %vm1149_vm0 = vcmp.eq.f32.partialorder %v1148_v34, 8.507059e+37  ;;  %v988_v4 = vsel %vm538_vm7, %v986_v45, %v987_v33 }
  0xa7   : > { %v1132_v20 = vsel %vm1131_vm14, %v1339_v31, %v1128_v18  ;;  %v991_v7 = vsel %vm538_vm7, %v989_v2, %v990_v63  ;;  %v1006_v10 = vadd.f32 %v988_v4, %v915_v44 }
  0xa8   : > { %v1137_v40 = vsel %vm1134_vm6, %v1136_v61, %v1132_v20  ;;  %v1147_v26 = vsel %vm1146_vm15, %v1341_v28, %v1143_v59  ;;  %v1007_v25 = vadd.f32 %v991_v7, %v916_v0 }
  0xa9   : > { %v1152_v6 = vsel %vm1149_vm0, %v1151_v1, %v1147_v26  ;;  %v1188_v54 = vmul.f32 %v1137_v40, %v1776_v17  ;;  %v1018_v14 = vmul.f32 %v1565_v37, %v1006_v10 }
  0xaa   : > { %v1189_v11 = vmul.f32 %v1152_v6, %v1780_v3  ;;  %v1019_v15 = vmul.f32 %v1565_v37, %v1007_v25 }
  0xab   : > { %v1030_v16 = vadd.f32 %v1574_v62, %v1018_v14 }
  0xac   : > { %v1297_v13 = vpack.c.bf16 %v1189_v11, %v1188_v54  ;;  %v1031_v34 = vadd.f32 %v1574_v62, %v1019_v15 }
  0xad   : > { %v1278_v19 = vmul.f32 -1.442695, %v1030_v16 }
  0xae   : > { %1305 = vst [vmem:[%s1684_s11 + $0x10] sm:$0xff] %v1297_v13   ;;  %v1279_v21 = vmul.f32 -1.442695, %v1031_v34 }
  0xaf   : > { %1342 = vpow2.f32 %v1278_v19 }
  0xb0   : > { %1344 = vpow2.f32 %v1279_v21 }
  0xb5   : > { %v1343_v17 = vpop.eup %1342 }
  0xb6   : > { %v1345_v22 = vpop.eup %1344  ;;  %v1062_v24 = vadd.f32 1.0, %v1343_v17 }
  0xb7   : > { %v1063_v38 = vadd.f32 1.0, %v1345_v22 }
  0xb8   : > { %1346 = vrcp.f32 %v1062_v24  ;;  %v1165_v5 = vand.u32 2147483648, %v1062_v24  ;;  %v1163_v62 = vand.u32 2147483647, %v1062_v24  ;;  %vm1159_vm2 = vweird.f32 %v1062_v24 }
  0xb9   : > { %1348 = vrcp.f32 %v1063_v38  ;;  %v1180_v30 = vand.u32 2147483648, %v1063_v38  ;;  %v1178_v36 = vand.u32 2147483647, %v1063_v38  ;;  %vm1174_vm4 = vweird.f32 %v1063_v38 }
  0xba   : > { %v1166_v47 = vor.u32 1.1754944e-38, %v1165_v5  ;;  %vm1164_vm5 = vcmp.eq.f32.partialorder %v1163_v62, 8.507059e+37 }
  0xbb   : > { %v1181_v46 = vor.u32 1.1754944e-38, %v1180_v30  ;;  %vm1179_vm9 = vcmp.eq.f32.partialorder %v1178_v36, 8.507059e+37 }
  0xbe   : > { %v1347_v3 = vpop.eup %1346 }
  0xbf   : > { %v1349_v31 = vpop.eup %1348  ;;  %v1155_v32 = vmul.f32 %v1347_v3, %v1062_v24  ;;  %vm1160_vm7 = vweird.f32 %v1347_v3 }
  0xc0   : > { %v1170_v42 = vmul.f32 %v1349_v31, %v1063_v38  ;;  %vm1175_vm1 = vweird.f32 %v1349_v31  ;;  %vm1161_vm3 = vmor %vm1159_vm2, %vm1160_vm7 }
  0xc1   : > { %v1156_v37 = vsub.f32 1.0, %v1155_v32  ;;  %vm1176_vm8 = vmor %vm1174_vm4, %vm1175_vm1 }
  0xc2   : > { %v1171_v29 = vsub.f32 1.0, %v1170_v42 }
  0xc3   : > { %v1157_v28 = vmul.f32 %v1347_v3, %v1156_v37 }
  0xc4   : > { %v1172_v55 = vmul.f32 %v1349_v31, %v1171_v29 }
  0xc5   : > { %v1158_v35 = vadd.f32 %v1347_v3, %v1157_v28 }
  0xc6   : > { %v1173_v48 = vadd.f32 %v1349_v31, %v1172_v55 }
  0xc7   : > { %v1162_v49 = vsel %vm1161_vm3, %v1347_v3, %v1158_v35 }
  0xc8   : > { %v1167_v8 = vsel %vm1164_vm5, %v1166_v47, %v1162_v49  ;;  %v1177_v57 = vsel %vm1176_vm8, %v1349_v31, %v1173_v48 }
  0xc9   : > { %v1182_v43 = vsel %vm1179_vm9, %v1181_v46, %v1177_v57  ;;  %v1190_v23 = vmul.f32 %v1167_v8, %v1030_v16 }
  0xca   : > { %v1191_v50 = vmul.f32 %v1182_v43, %v1031_v34 }
  0xcc   : > { %v1302_v27 = vpack.c.bf16 %v1191_v50, %v1190_v23 }
  0xce   : > { %1306 = vst [vmem:[%s1684_s11 + $0x18] sm:$0xff] %v1302_v27  }
  0xcf PF: > { %s14_s15 = sadd.s32 1, %s1356_s15  }
  0xd0   : > { %p11_p4 = scmp.ge.s32.totalorder %s14_s15, 4  }
  0xd2   :  { %13 = sbr.rel (!%p11_p4) target bundleno = 1 (0x1), region = 68 }

// kernel: _forward_impl.13
= control target key start
LH: loop header
LB: loop body
LE: loop exit
PB: predicated region body
PF: predicated region fallthrough
CT: control target
= control target key end

     0   :  { %s1077_s15 = smov 0   ;;  %s1510_s0 = inlined_call_operand.vmem [shape: bf16[128,128], index: 0, kind: input, shape index: {}]   ;;  %s1511_s1 = inlined_call_operand.vmem [shape: bf16[128,256], index: 1, kind: input, shape index: {}]   ;;  %s1512_s2 = inlined_call_operand.vmem [shape: f32[1,256], index: 2, kind: input, shape index: {}]   ;;  %s1513_s3 = inlined_call_operand.vmem [shape: f32[1,256], index: 3, kind: input, shape index: {}]   ;;  %s1514_s4 = inlined_call_operand.vmem [shape: bf16[128,256], index: 4, kind: output, shape index: {}]  }
   0x1 LB: > { %s827_s16 = sadd.s32 4294967295, %s1050_s15   ;;  %p831_p0 = scmp.ge.s32.totalorder %s1050_s15, 1  ;;  %s1050_s15 = sphi %s1077_s15, %s14_s15  }
   0x2   : > { %p163_p1 = scmp.lt.s32.totalorder %s1050_s15, 3 }
   0x4   : > { %p164_p2 = pnand %p831_p0, %p163_p1 }
   0x5   : > { %s832_s7 = sshll.u32 (!%p164_p2), %s827_s16, 3 }
   0x6   : > { %167 = sbr.rel (%p164_p2) target bundleno = 277 (0x115), region = 36  ;;  %p191_p3 = scmp.lt.s32.totalorder (!%p164_p2), %s832_s7, 15 }
   0xb   : > { %v911_v0 = vld [vmem:[%s1511_s1 + $0x70] sm:$0xf]  ;;  %v955_v1 = vld [vmem:[%s1511_s1 + $0x74] sm:$0xf0]  ;;  %v954_v2 = vld [vmem:[%s1511_s1 + $0x74] sm:$0xf] }
   0xc   : > { %v912_v3 = vor.u32 %v955_v1, %v911_v0  ;;  %v913_v4 = vld [vmem:[%s1511_s1 + $0x78] sm:$0xf0]  ;;  %v903_v5 = vld [vmem:[%s1511_s1 + $0x60] sm:$0xf]  ;;  %v953_v6 = vld [vmem:[%s1511_s1 + $0x64] sm:$0xf0] }
   0xd   : > { %v916_v7 = vor.u32 %v954_v2, %v913_v4  ;;  %v952_v8 = vld [vmem:[%s1511_s1 + $0x64] sm:$0xf]  ;;  %v905_v9 = vld [vmem:[%s1511_s1 + $0x68] sm:$0xf0]  ;;  %v904_v10 = vor.u32 %v953_v6, %v903_v5  ;;  %v895_v12 = vld [vmem:[%s1511_s1 + $0x50] sm:$0xf] }
   0xe   : > { %331 = vmatpush.bf16.msra.mxu0 %v912_v3  ;;  %956 = vmatpush.bf16.msra.mxu2 %v912_v3  ;;  %v908_v11 = vor.u32 %v952_v8, %v905_v9  ;;  %v951_v13 = vld [vmem:[%s1511_s1 + $0x54] sm:$0xf0]  ;;  %v950_v14 = vld [vmem:[%s1511_s1 + $0x54] sm:$0xf]  ;;  %v897_v15 = vld [vmem:[%s1511_s1 + $0x58] sm:$0xf0] }
   0xf   : > { %360 = vmatpush.bf16.msra.mxu1 %v916_v7  ;;  %964 = vmatpush.bf16.msra.mxu3 %v916_v7  ;;  %v896_v16 = vor.u32 %v951_v13, %v895_v12  ;;  %v900_v17 = vor.u32 %v950_v14, %v897_v15  ;;  %v887_v18 = vld [vmem:[%s1511_s1 + $0x40] sm:$0xf]  ;;  %v949_v19 = vld [vmem:[%s1511_s1 + $0x44] sm:$0xf0]  ;;  %v948_v20 = vld [vmem:[%s1511_s1 + $0x44] sm:$0xf] }
  0x10   : > { %v889_v21 = vld [vmem:[%s1511_s1 + $0x48] sm:$0xf0]  ;;  %v888_v22 = vor.u32 %v949_v19, %v887_v18  ;;  %v879_v24 = vld [vmem:[%s1511_s1 + $0x30] sm:$0xf]  ;;  %v947_v25 = vld [vmem:[%s1511_s1 + $0x34] sm:$0xf0] }
  0x11   : > { %v892_v23 = vor.u32 %v948_v20, %v889_v21  ;;  %v946_v26 = vld [vmem:[%s1511_s1 + $0x34] sm:$0xf]  ;;  %v881_v27 = vld [vmem:[%s1511_s1 + $0x38] sm:$0xf0]  ;;  %v880_v28 = vor.u32 %v947_v25, %v879_v24  ;;  %v871_v30 = vld [vmem:[%s1511_s1 + $0x20] sm:$0xf] }
  0x12   : > { %332 = vmatpush.bf16.msra.mxu0 %v904_v10  ;;  %957 = vmatpush.bf16.msra.mxu2 %v904_v10  ;;  %v884_v29 = vor.u32 %v946_v26, %v881_v27  ;;  %v945_v31 = vld [vmem:[%s1511_s1 + $0x24] sm:$0xf0]  ;;  %v944_v32 = vld [vmem:[%s1511_s1 + $0x24] sm:$0xf]  ;;  %v873_v33 = vld [vmem:[%s1511_s1 + $0x28] sm:$0xf0] }
  0x13   : > { %361 = vmatpush.bf16.msra.mxu1 %v908_v11  ;;  %965 = vmatpush.bf16.msra.mxu3 %v908_v11  ;;  %v872_v34 = vor.u32 %v945_v31, %v871_v30  ;;  %v876_v35 = vor.u32 %v944_v32, %v873_v33  ;;  %v863_v36 = vld [vmem:[%s1511_s1 + $0x10] sm:$0xf]  ;;  %v943_v37 = vld [vmem:[%s1511_s1 + $0x14] sm:$0xf0]  ;;  %s1534_s7 = smov (!%p191_p3, %s832_s7), 15 }
  0x14   : > { %v942_v38 = vld [vmem:[%s1511_s1 + $0x14] sm:$0xf]  ;;  %v865_v39 = vld [vmem:[%s1511_s1 + $0x18] sm:$0xf0]  ;;  %v864_v40 = vor.u32 %v943_v37, %v863_v36  ;;  %v855_v42 = vld [vmem:[%s1511_s1] sm:$0xf] }
  0x15   : > { %v868_v41 = vor.u32 %v942_v38, %v865_v39  ;;  %v941_v43 = vld [vmem:[%s1511_s1 + $0x4] sm:$0xf0]  ;;  %s833_s29 = sshll.u32 %s1534_s7, 2  ;;  %v940_v44 = vld [vmem:[%s1511_s1 + $0x4] sm:$0xf]  ;;  %s935_s17 = sshll.u32 %s1534_s7, 3 }
  0x16   : > { %333 = vmatpush.bf16.msra.mxu0 %v896_v16  ;;  %958 = vmatpush.bf16.msra.mxu2 %v896_v16  ;;  %v857_v45 = vld [vmem:[%s1511_s1 + $0x8] sm:$0xf0]  ;;  %v856_v46 = vor.u32 %v941_v43, %v855_v42  ;;  %s194_s11 = scalar_lea.vmem %s1510_s0, %s833_s29  ;;  %v389_v52 = vld [vmem:[%s1512_s2] sm:$0x3]  ;;  %s1319_s19 = scalar_lea.vmem %s1514_s4, %s935_s17 }
  0x17   : > { %362 = vmatpush.bf16.msra.mxu1 %v900_v17  ;;  %966 = vmatpush.bf16.msra.mxu3 %v900_v17  ;;  %v860_v47 = vor.u32 %v940_v44, %v857_v45  ;;  %v936_v48 = vld [vmem:[%s194_s11] sm:$0xff]  ;;  %v938_v49 = vld [vmem:[%s194_s11 + $0x10] sm:$0xff]  ;;  %v937_v50 = vld [vmem:[%s194_s11 + $0x8] sm:$0xff]  ;;  %v1195_v54 = vperm.slane %v389_v52, 0  ;;  %v1197_v55 = vperm.slane %v389_v52, 1 }
  0x18   : > { %v939_v51 = vld [vmem:[%s194_s11 + $0x18] sm:$0xff]  ;;  %v411_v53 = vld [vmem:[%s1513_s3] sm:$0x3] }
  0x19   : > { %v1199_v56 = vperm.slane %v411_v53, 0  ;;  %v1201_v58 = vperm.slane %v411_v53, 1 }
  0x1a   : > { %334 = vmatpush.bf16.msra.mxu0 %v888_v22  ;;  %959 = vmatpush.bf16.msra.mxu2 %v888_v22 }
  0x1b   : > { %363 = vmatpush.bf16.msra.mxu1 %v892_v23  ;;  %967 = vmatpush.bf16.msra.mxu3 %v892_v23 }
  0x1e   : > { %335 = vmatpush.bf16.msra.mxu0 %v880_v28  ;;  %960 = vmatpush.bf16.msra.mxu2 %v880_v28 }
  0x1f   : > { %364 = vmatpush.bf16.msra.mxu1 %v884_v29  ;;  %968 = vmatpush.bf16.msra.mxu3 %v884_v29 }
  0x22   : > { %336 = vmatpush.bf16.msra.mxu0 %v872_v34  ;;  %961 = vmatpush.bf16.msra.mxu2 %v872_v34 }
  0x23   : > { %365 = vmatpush.bf16.msra.mxu1 %v876_v35  ;;  %969 = vmatpush.bf16.msra.mxu3 %v876_v35 }
  0x26   : > { %337 = vmatpush.bf16.msra.mxu0 %v864_v40  ;;  %962 = vmatpush.bf16.msra.mxu2 %v864_v40 }
  0x27   : > { %366 = vmatpush.bf16.msra.mxu1 %v868_v41  ;;  %970 = vmatpush.bf16.msra.mxu3 %v868_v41 }
  0x2a   : > { %338 = vmatpush.bf16.msra.mxu0 %v856_v46  ;;  %963 = vmatpush.bf16.msra.mxu2 %v856_v46 }
  0x2b   : > { %367 = vmatpush.bf16.msra.mxu1 %v860_v47  ;;  %971 = vmatpush.bf16.msra.mxu3 %v860_v47 }
  0x2d   : > { %339 = vmatmul.bf16.vlgmr.msra.gmra.mxu0 %v936_v48  ;;  %349 = vmatmul.bf16.vlgmr.msra.gmra.mxu2 %v938_v49 }
  0x2e   : > { %368 = vmatmul.bf16.vlgmr.msra.gmra.mxu1 %v936_v48  ;;  %378 = vmatmul.bf16.vlgmr.msra.gmra.mxu3 %v938_v49 }
  0x3d   : > { %344 = vmatmul.bf16.gmra.mxu0 %v937_v50  ;;  %354 = vmatmul.bf16.gmra.mxu2 %v939_v51 }
  0x3e   : > { %373 = vmatmul.bf16.gmra.mxu1 %v937_v50  ;;  %383 = vmatmul.bf16.gmra.mxu3 %v939_v51 }
  0xaa   : > { %v340_v57 = vpop.f32.mrf.mxu0 }
  0xab   : > { %v395_v59 = vmul.f32 %v1195_v54, %v340_v57  ;;  %v369_v60 = vpop.f32.mrf.mxu1 }
  0xac   : > { %v396_v61 = vmul.f32 %v1197_v55, %v369_v60 }
  0xad   : > { %v1206_v62 = vadd.f32 %v1199_v56, %v395_v59 }
  0xae   : > { %v1209_v63 = vadd.f32 %v1201_v58, %v396_v61 }
  0xaf   : > { %v917_v0 = vmul.f32 -1.442695, %v1206_v62 }
  0xb0   : > { %v918_v1 = vmul.f32 -1.442695, %v1209_v63  ;;  %v350_v2 = vpop.f32.mrf.mxu2 }
  0xb1   : > { %980 = vpow2.f32 %v917_v0  ;;  %v403_v3 = vmul.f32 %v1195_v54, %v350_v2  ;;  %v379_v4 = vpop.f32.mrf.mxu3 }
  0xb2   : > { %982 = vpow2.f32 %v918_v1  ;;  %v404_v5 = vmul.f32 %v1197_v55, %v379_v4  ;;  %v342_v6 = vpop.f32.mrf.mxu0 }
  0xb3   : > { %v1216_v7 = vadd.f32 %v1199_v56, %v403_v3  ;;  %v397_v8 = vmul.f32 %v1195_v54, %v342_v6  ;;  %v371_v9 = vpop.f32.mrf.mxu1 }
  0xb4   : > { %v1220_v10 = vadd.f32 %v1201_v58, %v404_v5  ;;  %v398_v11 = vmul.f32 %v1197_v55, %v371_v9 }
  0xb5   : > { %v925_v12 = vmul.f32 -1.442695, %v1216_v7  ;;  %v1225_v13 = vadd.f32 %v1199_v56, %v397_v8 }
  0xb6   : > { %v926_v14 = vmul.f32 -1.442695, %v1220_v10  ;;  %v1229_v15 = vadd.f32 %v1201_v58, %v398_v11 }
  0xb7   : > { %v981_v16 = vpop.eup %980  ;;  %984 = vpow2.f32 %v925_v12  ;;  %v919_v17 = vmul.f32 -1.442695, %v1225_v13 }
  0xb8   : > { %v983_v18 = vpop.eup %982  ;;  %v1232_v19 = vadd.f32 1.0, %v981_v16  ;;  %986 = vpow2.f32 %v926_v14  ;;  %v920_v20 = vmul.f32 -1.442695, %v1229_v15  ;;  %v352_v21 = vpop.f32.mrf.mxu2 }
  0xb9   : > { %v1235_v22 = vadd.f32 1.0, %v983_v18  ;;  %988 = vpow2.f32 %v919_v17  ;;  %v405_v23 = vmul.f32 %v1195_v54, %v352_v21  ;;  %v381_v24 = vpop.f32.mrf.mxu3 }
  0xba   : > { %990 = vrcp.f32 %v1232_v19  ;;  %v345_v25 = vpop.f32.mrf.mxu0  ;;  %v508_v26 = vand.u32 2147483648, %v1232_v19  ;;  %v506_v29 = vand.u32 2147483647, %v1232_v19  ;;  %v406_v34 = vmul.f32 %v1197_v55, %v381_v24 }
  0xbb   : > { %992 = vrcp.f32 %v1235_v22  ;;  %v1242_v27 = vadd.f32 %v1199_v56, %v405_v23  ;;  %v523_v30 = vand.u32 2147483648, %v1235_v22  ;;  %v521_v32 = vand.u32 2147483647, %v1235_v22  ;;  %v374_v36 = vpop.f32.mrf.mxu1 }
  0xbc   : > { %994 = vpow2.f32 %v920_v20  ;;  %v399_v35 = vmul.f32 %v1195_v54, %v345_v25  ;;  %vm502_vm0 = vweird.f32 %v1232_v19  ;;  %v509_v40 = vor.u32 1.1754944e-38, %v508_v26 }
  0xbd   : > { %v985_v28 = vpop.eup %984  ;;  %vm517_vm1 = vweird.f32 %v1235_v22  ;;  %v927_v41 = vmul.f32 -1.442695, %v1242_v27  ;;  %vm1258_vm2 = vcmp.eq.f32.partialorder %v506_v29, 8.507059e+37  ;;  %v524_v45 = vor.u32 1.1754944e-38, %v523_v30 }
  0xbe   : > { %v987_v31 = vpop.eup %986  ;;  %v1247_v33 = vadd.f32 1.0, %v985_v28  ;;  %v1264_v46 = vmul.f32 %v1197_v55, %v374_v36  ;;  %vm1267_vm3 = vcmp.eq.f32.partialorder %v521_v32, 8.507059e+37  ;;  %v1273_v51 = vadd.f32 %v1201_v58, %v406_v34 }
  0xbf   : > { %v989_v37 = vpop.eup %988  ;;  %v1252_v38 = vadd.f32 1.0, %v987_v31  ;;  %v1276_v52 = vadd.f32 %v1199_v56, %v399_v35 }
  0xc0   : > { %v991_v39 = vpop.eup %990  ;;  %996 = vrcp.f32 %v1247_v33  ;;  %v628_v50 = vand.u32 2147483648, %v1247_v33  ;;  %v626_v57 = vand.u32 2147483647, %v1247_v33  ;;  %v1280_v60 = vadd.f32 1.0, %v989_v37  ;;  %v355_v44 = vpop.f32.mrf.mxu2 }
  0xc1   : > { %v993_v42 = vpop.eup %992  ;;  %v498_v43 = vmul.f32 %v991_v39, %v1232_v19  ;;  %998 = vrcp.f32 %v1252_v38  ;;  %v641_v59 = vand.u32 2147483647, %v1252_v38  ;;  %v643_v0 = vand.u32 2147483648, %v1252_v38 }
  0xc2   : > { %v995_v47 = vpop.eup %994  ;;  %v513_v48 = vmul.f32 %v993_v42, %v1235_v22  ;;  %1000 = vpow2.f32 %v927_v41  ;;  %vm503_vm4 = vweird.f32 %v991_v39  ;;  %vm622_vm5 = vweird.f32 %v1247_v33 }
  0xc3   : > { %v499_v53 = vsub.f32 1.0, %v498_v43  ;;  %v1283_v1 = vadd.f32 1.0, %v995_v47  ;;  %1002 = vrcp.f32 %v1280_v60  ;;  %vm518_vm6 = vweird.f32 %v993_v42  ;;  %vm504_vm9 = vmor %vm502_vm0, %vm503_vm4 }
  0xc4   : > { %v514_v61 = vsub.f32 1.0, %v513_v48  ;;  %v629_v5 = vor.u32 1.1754944e-38, %v628_v50  ;;  %vm637_vm7 = vweird.f32 %v1252_v38  ;;  %vm1289_vm8 = vcmp.eq.f32.partialorder %v626_v57, 8.507059e+37  ;;  %vm519_vm11 = vmor %vm517_vm1, %vm518_vm6 }
  0xc5   : > { %v500_v2 = vmul.f32 %v991_v39, %v499_v53  ;;  %1004 = vrcp.f32 %v1283_v1  ;;  %v928_v12 = vmul.f32 -1.442695, %v1273_v51  ;;  %vm1298_vm10 = vcmp.eq.f32.partialorder %v641_v59, 8.507059e+37 }
  0xc6   : > { %v997_v3 = vpop.eup %996  ;;  %v515_v4 = vmul.f32 %v993_v42, %v514_v61  ;;  %v644_v18 = vor.u32 1.1754944e-38, %v643_v0  ;;  %v536_v23 = vand.u32 2147483647, %v1280_v60  ;;  %v538_v24 = vand.u32 2147483648, %v1280_v60 }
  0xc7   : > { %v999_v6 = vpop.eup %998  ;;  %v501_v8 = vadd.f32 %v991_v39, %v500_v2  ;;  %v618_v9 = vmul.f32 %v997_v3, %v1247_v33  ;;  %vm532_vm12 = vweird.f32 %v1280_v60  ;;  %vm623_vm13 = vweird.f32 %v997_v3  ;;  %v384_v2 = vpop.f32.mrf.mxu3 }
  0xc8   : > { %v516_v14 = vadd.f32 %v993_v42, %v515_v4  ;;  %v633_v16 = vmul.f32 %v999_v6, %v1252_v38  ;;  %v1001_v19 = vpop.eup %1000  ;;  %vm638_vm14 = vweird.f32 %v999_v6  ;;  %vm1321_vm15 = vcmp.eq.f32.partialorder %v536_v23, 8.507059e+37  ;;  %vm624_vm0 = vmor %vm622_vm5, %vm623_vm13 }
  0xc9   : > { %v505_v20 = vsel %vm504_vm9, %v991_v39, %v501_v8  ;;  %v619_v21 = vsub.f32 1.0, %v618_v9  ;;  %v1003_v29 = vpop.eup %1002  ;;  %v539_v39 = vor.u32 1.1754944e-38, %v538_v24  ;;  %vm639_vm1 = vmor %vm637_vm7, %vm638_vm14  ;;  %v553_v47 = vand.u32 2147483648, %v1283_v1 }
  0xca   : > { %v510_v25 = vsel %vm1258_vm2, %v509_v40, %v505_v20  ;;  %v520_v26 = vsel %vm519_vm11, %v993_v42, %v516_v14  ;;  %v634_v28 = vsub.f32 1.0, %v633_v16  ;;  %v528_v35 = vmul.f32 %v1003_v29, %v1280_v60 }
  0xcb   : > { %v737_v30 = vmul.f32 %v510_v25, %v1206_v62  ;;  %v525_v22 = vsel %vm1267_vm3, %v524_v45, %v520_v26  ;;  %v620_v31 = vmul.f32 %v997_v3, %v619_v21  ;;  %v1005_v36 = vpop.eup %1004  ;;  %v1325_v40 = vadd.f32 1.0, %v1001_v19  ;;  %v357_v26 = vpop.f32.mrf.mxu2 }
  0xcc   : > { %v738_v32 = vmul.f32 %v525_v22, %v1209_v63  ;;  %v635_v34 = vmul.f32 %v999_v6, %v634_v28  ;;  %v529_v42 = vsub.f32 1.0, %v528_v35  ;;  %v543_v43 = vmul.f32 %v1005_v36, %v1283_v1 }
  0xcd   : > { %v621_v37 = vadd.f32 %v997_v3, %v620_v31  ;;  %vm533_vm2 = vweird.f32 %v1003_v29  ;;  %1006 = vrcp.f32 %v1325_v40  ;;  %vm548_vm3 = vweird.f32 %v1005_v36 }
  0xce   : > { %v753_v63 = vpack.c.bf16 %v738_v32, %v737_v30  ;;  %v636_v41 = vadd.f32 %v999_v6, %v635_v34  ;;  %v530_v49 = vmul.f32 %v1003_v29, %v529_v42  ;;  %v544_v50 = vsub.f32 1.0, %v543_v43  ;;  %vm534_vm4 = vmor %vm532_vm12, %vm533_vm2 }
  0xcf   : > { %v625_v45 = vsel %vm624_vm0, %v997_v3, %v621_v37  ;;  %v551_v38 = vand.u32 2147483647, %v1283_v1  ;;  %1008 = vpow2.f32 %v928_v12  ;;  %vm547_vm5 = vweird.f32 %v1283_v1  ;;  %v347_v12 = vpop.f32.mrf.mxu0 }
  0xd0   : > { %761 = vst [vmem:[%s1319_s19] sm:$0xff] %v753_v63  ;;  %v630_v33 = vsel %vm1289_vm8, %v629_v5, %v625_v45  ;;  %v640_v48 = vsel %vm639_vm1, %v999_v6, %v636_v41  ;;  %v531_v61 = vadd.f32 %v1003_v29, %v530_v49  ;;  %v545_v0 = vmul.f32 %v1005_v36, %v544_v50  ;;  %vm549_vm6 = vmor %vm547_vm5, %vm548_vm3 }
  0xd1   : > { %v745_v53 = vmul.f32 %v630_v33, %v1216_v7  ;;  %v645_v57 = vsel %vm1298_vm10, %v644_v18, %v640_v48  ;;  %v554_v7 = vor.u32 1.1754944e-38, %v553_v47  ;;  %v921_v3 = vmul.f32 -1.442695, %v1276_v52 }
  0xd2   : > { %v746_v59 = vmul.f32 %v645_v57, %v1220_v10  ;;  %v1350_v4 = vadd.f32 %v1201_v58, %v1264_v46  ;;  %v535_v10 = vsel %vm534_vm4, %v1003_v29, %v531_v61  ;;  %v546_v6 = vadd.f32 %v1005_v36, %v545_v0  ;;  %v376_v46 = vpop.f32.mrf.mxu1 }
  0xd3   : > { %v407_v8 = vmul.f32 %v1195_v54, %v355_v44  ;;  %v1353_v9 = vpop.eup %1006  ;;  %v540_v60 = vsel %vm1321_vm15, %v539_v39, %v535_v10  ;;  %1010 = vpow2.f32 %v921_v3  ;;  %v408_v11 = vmul.f32 %v1197_v55, %v384_v2  ;;  %v386_v10 = vpop.f32.mrf.mxu3 }
  0xd4   : > { %v757_v5 = vpack.c.bf16 %v746_v59, %v745_v53  ;;  %v922_v1 = vmul.f32 -1.442695, %v1350_v4  ;;  %v739_v14 = vmul.f32 %v540_v60, %v1225_v13  ;;  %v550_v16 = vsel %vm549_vm6, %v1005_v36, %v546_v6 }
  0xd5   : > { %vm552_vm7 = vcmp.eq.f32.partialorder %v551_v38, 8.507059e+37  ;;  %v648_v17 = vmul.f32 %v1353_v9, %v1325_v40  ;;  %v1365_v20 = vadd.f32 %v1199_v56, %v407_v8  ;;  %v1368_v21 = vadd.f32 %v1201_v58, %v408_v11  ;;  %v1009_v23 = vpop.eup %1008 }
  0xd6   : > { %765 = vst [vmem:[%s1319_s19 + $0x20] sm:$0xff] %v757_v5  ;;  %v555_v18 = vsel %vm552_vm7, %v554_v7, %v550_v16  ;;  %1012 = vpow2.f32 %v922_v1  ;;  %v401_v13 = vmul.f32 %v1195_v54, %v347_v12  ;;  %v402_v25 = vmul.f32 %v1197_v55, %v376_v46 }
  0xd7   : > { %v740_v24 = vmul.f32 %v555_v18, %v1229_v15  ;;  %v649_v19 = vsub.f32 1.0, %v648_v17  ;;  %v1373_v28 = vadd.f32 1.0, %v1009_v23  ;;  %v929_v29 = vmul.f32 -1.442695, %v1365_v20 }
  0xd8   : > { %v930_v30 = vmul.f32 -1.442695, %v1368_v21  ;;  %v1379_v32 = vadd.f32 %v1199_v56, %v401_v13  ;;  %vm653_vm8 = vweird.f32 %v1353_v9  ;;  %v1384_v34 = vadd.f32 %v1201_v58, %v402_v25 }
  0xd9   : > { %v754_v22 = vpack.c.bf16 %v740_v24, %v739_v14  ;;  %v650_v31 = vmul.f32 %v1353_v9, %v649_v19  ;;  %v1011_v15 = vpop.eup %1010  ;;  %1014 = vrcp.f32 %v1373_v28  ;;  %v409_v35 = vmul.f32 %v1195_v54, %v357_v26 }
  0xda   : > { %v1389_v37 = vadd.f32 1.0, %v1011_v15  ;;  %1016 = vpow2.f32 %v929_v29  ;;  %v923_v62 = vmul.f32 -1.442695, %v1379_v32  ;;  %v656_v63 = vand.u32 2147483647, %v1325_v40 }
  0xdb   : > { %762 = vst [vmem:[%s1319_s19 + $0x8] sm:$0xff] %v754_v22  ;;  %v651_v36 = vadd.f32 %v1353_v9, %v650_v31  ;;  %v658_v41 = vand.u32 2147483648, %v1325_v40  ;;  %1018 = vpow2.f32 %v930_v30  ;;  %vm652_vm9 = vweird.f32 %v1325_v40 }
  0xdc   : > { %v1013_v39 = vpop.eup %1012  ;;  %v671_v42 = vand.u32 2147483647, %v1373_v28  ;;  %v673_v54 = vand.u32 2147483648, %v1373_v28  ;;  %1020 = vrcp.f32 %v1389_v37  ;;  %vm1400_vm10 = vmor %vm652_vm9, %vm653_vm8  ;;  %v924_v45 = vmul.f32 -1.442695, %v1384_v34 }
  0xdd   : > { %v1404_v44 = vadd.f32 1.0, %v1013_v39  ;;  %v655_v40 = vsel %vm1400_vm10, %v1353_v9, %v651_v36  ;;  %1022 = vpow2.f32 %v923_v62  ;;  %v1411_v47 = vadd.f32 %v1199_v56, %v409_v35 }
  0xde   : > { %vm657_vm11 = vcmp.eq.f32.partialorder %v656_v63, 8.507059e+37  ;;  %v659_v48 = vor.u32 1.1754944e-38, %v658_v41  ;;  %vm667_vm12 = vweird.f32 %v1373_v28  ;;  %vm1416_vm13 = vcmp.eq.f32.partialorder %v671_v42, 8.507059e+37 }
  0xdf   : > { %v1015_v33 = vpop.eup %1014  ;;  %1024 = vrcp.f32 %v1404_v44  ;;  %v674_v57 = vor.u32 1.1754944e-38, %v673_v54  ;;  %v931_v38 = vmul.f32 -1.442695, %v1411_v47  ;;  %v566_v61 = vand.u32 2147483647, %v1389_v37 }
  0xe0   : > { %v1017_v49 = vpop.eup %1016  ;;  %v663_v50 = vmul.f32 %v1015_v33, %v1373_v28  ;;  %v660_v56 = vsel %vm657_vm11, %v659_v48, %v655_v40  ;;  %1026 = vpow2.f32 %v924_v45  ;;  %v568_v3 = vand.u32 2147483648, %v1389_v37 }
  0xe1   : > { %v1019_v59 = vpop.eup %1018  ;;  %v1422_v0 = vadd.f32 1.0, %v1017_v49  ;;  %1028 = vpow2.f32 %v931_v38  ;;  %v581_v8 = vand.u32 2147483647, %v1404_v44  ;;  %v583_v9 = vand.u32 2147483648, %v1404_v44 }
  0xe2   : > { %v1021_v2 = vpop.eup %1020  ;;  %v664_v7 = vsub.f32 1.0, %v663_v50  ;;  %v1425_v5 = vadd.f32 1.0, %v1019_v59  ;;  %vm668_vm14 = vweird.f32 %v1015_v33  ;;  %vm562_vm15 = vweird.f32 %v1389_v37 }
  0xe3   : > { %v558_v6 = vmul.f32 %v1021_v2, %v1389_v37  ;;  %1030 = vrcp.f32 %v1422_v0  ;;  %v1023_v60 = vpop.eup %1022  ;;  %v747_v12 = vmul.f32 %v660_v56, %v1242_v27  ;;  %vm1434_vm0 = vcmp.eq.f32.partialorder %v566_v61, 8.507059e+37  ;;  %vm669_vm2 = vmor %vm667_vm12, %vm668_vm14 }
  0xe4   : > { %v665_v1 = vmul.f32 %v1015_v33, %v664_v7  ;;  %1032 = vrcp.f32 %v1425_v5  ;;  %v410_v16 = vmul.f32 %v1197_v55, %v386_v10  ;;  %v569_v18 = vor.u32 1.1754944e-38, %v568_v3 }
  0xe5   : > { %v1025_v11 = vpop.eup %1024  ;;  %v559_v46 = vsub.f32 1.0, %v558_v6  ;;  %vm577_vm1 = vweird.f32 %v1404_v44  ;;  %vm563_vm3 = vweird.f32 %v1021_v2  ;;  %vm1443_vm4 = vcmp.eq.f32.partialorder %v581_v8, 8.507059e+37 }
  0xe6   : > { %v666_v17 = vadd.f32 %v1015_v33, %v665_v1  ;;  %v573_v23 = vmul.f32 %v1025_v11, %v1404_v44  ;;  %v1027_v24 = vpop.eup %1026  ;;  %v584_v13 = vor.u32 1.1754944e-38, %v583_v9  ;;  %v686_v29 = vand.u32 2147483647, %v1422_v0  ;;  %vm564_vm6 = vmor %vm562_vm15, %vm563_vm3 }
  0xe7   : > { %v560_v19 = vmul.f32 %v1021_v2, %v559_v46  ;;  %v1029_v25 = vpop.eup %1028  ;;  %v1448_v30 = vadd.f32 1.0, %v1023_v60  ;;  %vm578_vm5 = vweird.f32 %v1025_v11  ;;  %v1453_v15 = vadd.f32 %v1201_v58, %v410_v16 }
  0xe8   : > { %v670_v26 = vsel %vm669_vm2, %v1015_v33, %v666_v17  ;;  %v574_v55 = vsub.f32 1.0, %v573_v23  ;;  %v1460_v63 = vadd.f32 1.0, %v1027_v24  ;;  %v688_v42 = vand.u32 2147483648, %v1422_v0  ;;  %vm579_vm7 = vmor %vm577_vm1, %vm578_vm5 }
  0xe9   : > { %v1031_v22 = vpop.eup %1030  ;;  %v675_v31 = vsel %vm1416_vm13, %v674_v57, %v670_v26  ;;  %v561_v28 = vadd.f32 %v1021_v2, %v560_v19  ;;  %1034 = vrcp.f32 %v1448_v30  ;;  %v703_v40 = vand.u32 2147483648, %v1425_v5 }
  0xea   : > { %v1033_v35 = vpop.eup %1032  ;;  %v748_v36 = vmul.f32 %v675_v31, %v1273_v51  ;;  %v575_v62 = vmul.f32 %v1025_v11, %v574_v55  ;;  %v678_v39 = vmul.f32 %v1031_v22, %v1422_v0  ;;  %vm683_vm8 = vweird.f32 %v1031_v22 }
  0xeb   : > { %v565_v41 = vsel %vm564_vm6, %v1021_v2, %v561_v28  ;;  %v693_v54 = vmul.f32 %v1033_v35, %v1425_v5  ;;  %v1471_v33 = vadd.f32 1.0, %v1029_v25  ;;  %1036 = vrcp.f32 %v1460_v63 }
  0xec   : > { %v758_v58 = vpack.c.bf16 %v748_v36, %v747_v12  ;;  %v570_v51 = vsel %vm1434_vm0, %v569_v18, %v565_v41  ;;  %v576_v43 = vadd.f32 %v1025_v11, %v575_v62  ;;  %v679_v37 = vsub.f32 1.0, %v678_v39 }
  0xed   : > { %v694_v45 = vsub.f32 1.0, %v693_v54  ;;  %v741_v48 = vmul.f32 %v570_v51, %v1276_v52  ;;  %vm698_vm9 = vweird.f32 %v1033_v35  ;;  %v701_v44 = vand.u32 2147483647, %v1425_v5 }
  0xee   : > { %766 = vst [vmem:[%s1319_s19 + $0x28] sm:$0xff] %v758_v58  ;;  %v580_v49 = vsel %vm579_vm7, %v1025_v11, %v576_v43  ;;  %v680_v50 = vmul.f32 %v1031_v22, %v679_v37  ;;  %vm682_vm10 = vweird.f32 %v1422_v0  ;;  %vm697_vm11 = vweird.f32 %v1425_v5 }
  0xef   : > { %v585_v53 = vsel %vm1443_vm4, %v584_v13, %v580_v49  ;;  %v695_v57 = vmul.f32 %v1033_v35, %v694_v45  ;;  %v1035_v52 = vpop.eup %1034  ;;  %vm684_vm12 = vmor %vm682_vm10, %vm683_vm8  ;;  %vm687_vm13 = vcmp.eq.f32.partialorder %v686_v29, 8.507059e+37  ;;  %v689_v56 = vor.u32 1.1754944e-38, %v688_v42 }
  0xf0   : > { %v742_v38 = vmul.f32 %v585_v53, %v1350_v4  ;;  %v681_v59 = vadd.f32 %v1031_v22, %v680_v50  ;;  %1038 = vrcp.f32 %v1471_v33  ;;  %vm699_vm14 = vmor %vm697_vm11, %vm698_vm9  ;;  %v704_v3 = vor.u32 1.1754944e-38, %v703_v40 }
  0xf1   : > { %v696_v61 = vadd.f32 %v1033_v35, %v695_v57  ;;  %v588_v4 = vmul.f32 %v1035_v52, %v1448_v30  ;;  %vm702_vm15 = vcmp.eq.f32.partialorder %v701_v44, 8.507059e+37  ;;  %v1037_v0 = vpop.eup %1036  ;;  %v598_v1 = vand.u32 2147483648, %v1448_v30 }
  0xf2   : > { %v755_v2 = vpack.c.bf16 %v742_v38, %v741_v48  ;;  %v685_v7 = vsel %vm684_vm12, %v1031_v22, %v681_v59  ;;  %v603_v11 = vmul.f32 %v1037_v0, %v1460_v63  ;;  %vm593_vm0 = vweird.f32 %v1035_v52 }
  0xf3   : > { %v690_v10 = vsel %vm687_vm13, %v689_v56, %v685_v7  ;;  %v700_v6 = vsel %vm699_vm14, %v1033_v35, %v696_v61  ;;  %v589_v9 = vsub.f32 1.0, %v588_v4  ;;  %v596_v46 = vand.u32 2147483647, %v1448_v30 }
  0xf4   : > { %763 = vst [vmem:[%s1319_s19 + $0x10] sm:$0xff] %v755_v2  ;;  %v749_v5 = vmul.f32 %v690_v10, %v1365_v20  ;;  %v705_v8 = vsel %vm702_vm15, %v704_v3, %v700_v6  ;;  %v932_v14 = vmul.f32 -1.442695, %v1453_v15  ;;  %v604_v18 = vsub.f32 1.0, %v603_v11 }
  0xf5   : > { %v750_v60 = vmul.f32 %v705_v8, %v1368_v21  ;;  %v590_v12 = vmul.f32 %v1035_v52, %v589_v9  ;;  %vm592_vm1 = vweird.f32 %v1448_v30  ;;  %v613_v20 = vand.u32 2147483648, %v1460_v63 }
  0xf6   : > { %v1039_v16 = vpop.eup %1038  ;;  %1040 = vpow2.f32 %v932_v14  ;;  %vm594_vm2 = vmor %vm592_vm1, %vm593_vm0  ;;  %v599_v21 = vor.u32 1.1754944e-38, %v598_v1  ;;  %v605_v24 = vmul.f32 %v1037_v0, %v604_v18  ;;  %vm608_vm3 = vweird.f32 %v1037_v0 }
  0xf7   : > { %v759_v17 = vpack.c.bf16 %v750_v60, %v749_v5  ;;  %v591_v23 = vadd.f32 %v1035_v52, %v590_v12  ;;  %v611_v19 = vand.u32 2147483647, %v1460_v63  ;;  %vm597_vm4 = vcmp.eq.f32.partialorder %v596_v46, 8.507059e+37 }
  0xf8   : > { %v708_v13 = vmul.f32 %v1039_v16, %v1471_v33  ;;  %v606_v26 = vadd.f32 %v1037_v0, %v605_v24  ;;  %vm607_vm5 = vweird.f32 %v1460_v63  ;;  %v614_v55 = vor.u32 1.1754944e-38, %v613_v20 }
  0xf9   : > { %767 = vst [vmem:[%s1319_s19 + $0x30] sm:$0xff] %v759_v17  ;;  %v595_v27 = vsel %vm594_vm2, %v1035_v52, %v591_v23  ;;  %vm609_vm6 = vmor %vm607_vm5, %vm608_vm3  ;;  %vm612_vm7 = vcmp.eq.f32.partialorder %v611_v19, 8.507059e+37  ;;  %vm713_vm8 = vweird.f32 %v1039_v16  ;;  %v718_v63 = vand.u32 2147483648, %v1471_v33 }
  0xfa   : > { %v600_v25 = vsel %vm597_vm4, %v599_v21, %v595_v27  ;;  %v610_v30 = vsel %vm609_vm6, %v1037_v0, %v606_v26  ;;  %v709_v28 = vsub.f32 1.0, %v708_v13  ;;  %vm712_vm9 = vweird.f32 %v1471_v33 }
  0xfb   : > { %v743_v29 = vmul.f32 %v600_v25, %v1379_v32  ;;  %v615_v31 = vsel %vm612_vm7, %v614_v55, %v610_v30  ;;  %v716_v32 = vand.u32 2147483647, %v1471_v33  ;;  %vm714_vm10 = vmor %vm712_vm9, %vm713_vm8  ;;  %v719_v43 = vor.u32 1.1754944e-38, %v718_v63 }
  0xfc   : > { %v1041_v22 = vpop.eup %1040  ;;  %v744_v35 = vmul.f32 %v615_v31, %v1384_v34  ;;  %v710_v39 = vmul.f32 %v1039_v16, %v709_v28 }
  0xfd   : > { %v496_v36 = vadd.f32 1.0, %v1041_v22  ;;  %vm717_vm11 = vcmp.eq.f32.partialorder %v716_v32, 8.507059e+37 }
  0xfe   : > { %v756_v62 = vpack.c.bf16 %v744_v35, %v743_v29  ;;  %v711_v41 = vadd.f32 %v1039_v16, %v710_v39 }
  0xff   : > { %1042 = vrcp.f32 %v496_v36  ;;  %v733_v34 = vand.u32 2147483648, %v496_v36  ;;  %v731_v45 = vand.u32 2147483647, %v496_v36  ;;  %vm727_vm13 = vweird.f32 %v496_v36 }
 0x100   : > { %764 = vst [vmem:[%s1319_s19 + $0x18] sm:$0xff] %v756_v62  ;;  %v715_v58 = vsel %vm714_vm10, %v1039_v16, %v711_v41 }
 0x101   : > { %v720_v40 = vsel %vm717_vm11, %v719_v43, %v715_v58  ;;  %v734_v49 = vor.u32 1.1754944e-38, %v733_v34  ;;  %vm732_vm15 = vcmp.eq.f32.partialorder %v731_v45, 8.507059e+37 }
 0x102   : > { %v751_v50 = vmul.f32 %v720_v40, %v1411_v47 }
 0x105   : > { %v1043_v42 = vpop.eup %1042 }
 0x106   : > { %v723_v54 = vmul.f32 %v1043_v42, %v496_v36  ;;  %vm728_vm12 = vweird.f32 %v1043_v42 }
 0x107   : > { %vm729_vm14 = vmor %vm727_vm13, %vm728_vm12 }
 0x108   : > { %v724_v51 = vsub.f32 1.0, %v723_v54 }
 0x10a   : > { %v725_v37 = vmul.f32 %v1043_v42, %v724_v51 }
 0x10c   : > { %v726_v48 = vadd.f32 %v1043_v42, %v725_v37 }
 0x10e   : > { %v730_v53 = vsel %vm729_vm14, %v1043_v42, %v726_v48 }
 0x10f   : > { %v735_v33 = vsel %vm732_vm15, %v734_v49, %v730_v53 }
 0x110   : > { %v752_v57 = vmul.f32 %v735_v33, %v1453_v15 }
 0x112   : > { %v760_v44 = vpack.c.bf16 %v752_v57, %v751_v50 }
 0x114   : > { %768 = vst [vmem:[%s1319_s19 + $0x38] sm:$0xff] %v760_v44 }
 0x115 PF: > { %s14_s15 = sadd.s32 1, %s1050_s15  }
 0x116   : > { %p11_p4 = scmp.ge.s32.totalorder %s14_s15, 4  }
 0x118   :  { %13 = sbr.rel (!%p11_p4) target bundleno = 1 (0x1), region = 66 }

// kernel: _forward_impl.14
= control target key start
LH: loop header
LB: loop body
LE: loop exit
PB: predicated region body
PF: predicated region fallthrough
CT: control target
= control target key end

     0   :  { %s870_s15 = smov 0   ;;  %s1307_s0 = inlined_call_operand.vmem [shape: bf16[2,5,5,1024], index: 0, kind: input, shape index: {}]   ;;  %s1308_s1 = inlined_call_operand.vmem [shape: bf16[9,256], index: 1, kind: input, shape index: {}]   ;;  %s1309_s2 = inlined_call_operand.vmem [shape: f32[1,256], index: 2, kind: input, shape index: {}]   ;;  %s1310_s3 = inlined_call_operand.vmem [shape: f32[1,256], index: 3, kind: input, shape index: {}]   ;;  %s1311_s4 = inlined_call_operand.vmem [shape: bf16[2,4,4,256], index: 4, kind: output, shape index: {}]  }
   0x1 LB: > { %s777_s16 = sadd.s32 4294967295, %s843_s15   ;;  %p781_p0 = scmp.ge.s32.totalorder %s843_s15, 1  ;;  %s843_s15 = sphi %s870_s15, %s14_s15  }
   0x2   : > { %p162_p1 = scmp.lt.s32.totalorder %s843_s15, 3 }
   0x4   : > { %p163_p2 = pnand %p781_p0, %p162_p1 }
   0x5   : > { %p188_p3 = scmp.lt.s32.totalorder (!%p163_p2), %s777_s16, 1 }
   0x6   : > { %166 = sbr.rel (%p163_p2) target bundleno = 130 (0x82), region = 36 }
   0xb   : > { %v224_v0 = vld [vmem:[%s1308_s1] sm:$0x11]  ;;  %v271_v1 = vld [vmem:[%s1308_s1] sm:$0x22]  ;;  %v350_v6 = vld [vmem:[%s1308_s1] sm:$0x44] }
   0xc   : > { %v225_v2 = vunpack.c.l.bf16 %v224_v0  ;;  %v226_v3 = vunpack.c.h.bf16 %v224_v0  ;;  %v272_v4 = vunpack.c.l.bf16 %v271_v1  ;;  %v273_v5 = vunpack.c.h.bf16 %v271_v1  ;;  %s1344_s16 = smov (!%p188_p3, %s777_s16), 1 }
   0xd   : > { %v351_v7 = vunpack.c.l.bf16 %v350_v6  ;;  %v352_v8 = vunpack.c.h.bf16 %v350_v6  ;;  %s796_s23 = smul.u32 160, %s1344_s16  ;;  %s795_s9 = sshll.u32 %s1344_s16, 4 }
   0xe   : > { %v227_v9 = vperm.slane %v225_v2, 0  ;;  %v228_v10 = vperm.slane %v226_v3, 0  ;;  %v253_v11 = vperm.slane %v225_v2, 1  ;;  %v254_v12 = vperm.slane %v226_v3, 1  ;;  %s1276_s12 = scalar_lea.vmem %s1311_s4, %s795_s9 }
   0xf   : > { %v890_v13 = vperm.slane %v272_v4, 2  ;;  %v892_v14 = vperm.slane %v273_v5, 2  ;;  %s897_s26 = scalar_lea.vmem %s1307_s0, %s796_s23  ;;  %v899_v15 = vperm.slane %v272_v4, 3  ;;  %v901_v16 = vperm.slane %v273_v5, 3 }
  0x10   : > { %v903_v17 = vperm.slane %v351_v7, 4  ;;  %v905_v18 = vperm.slane %v352_v8, 4  ;;  %v198_v19 = vld [vmem:[%s897_s26] sm:$0x77]  ;;  %v199_v20 = vld [vmem:[%s897_s26 + $0x8] sm:$0x77] }
  0x11   : > { %v909_v21 = vperm.slane %v351_v7, 5  ;;  %v911_v22 = vperm.slane %v352_v8, 5  ;;  %v202_v23 = vld [vmem:[%s897_s26 + $0x20] sm:$0x77]  ;;  %v915_v24 = vld [vmem:[%s897_s26 + $0x28] sm:$0x77]  ;;  %v216_v25 = vunpack.c.l.bf16 %v198_v19  ;;  %v217_v26 = vunpack.c.h.bf16 %v198_v19 }
  0x12   : > { %v245_v27 = vunpack.c.l.bf16 %v199_v20  ;;  %v246_v28 = vunpack.c.h.bf16 %v199_v20  ;;  %v206_v29 = vld [vmem:[%s897_s26 + $0x40] sm:$0x77]  ;;  %v918_v30 = vunpack.c.l.bf16 %v202_v23  ;;  %v920_v31 = vunpack.c.h.bf16 %v202_v23  ;;  %v925_v34 = vld [vmem:[%s897_s26 + $0x48] sm:$0x77]  ;;  %v976_v19 = vld [vmem:[%s897_s26 + $0x10] sm:$0x77] }
  0x13   : > { %v247_v32 = vunpack.c.l.bf16 %v915_v24  ;;  %v248_v33 = vunpack.c.h.bf16 %v915_v24  ;;  %v927_v35 = vunpack.c.l.bf16 %v206_v29  ;;  %v929_v36 = vunpack.c.h.bf16 %v206_v29  ;;  %v210_v39 = vld [vmem:[%s897_s26 + $0x60] sm:$0x77]  ;;  %v933_v40 = vld [vmem:[%s897_s26 + $0x68] sm:$0x77] }
  0x14   : > { %v229_v37 = vmul.f32 %v227_v9, %v216_v25  ;;  %v230_v38 = vmul.f32 %v228_v10, %v217_v26  ;;  %v231_v41 = vmul.f32 %v227_v9, %v918_v30  ;;  %v232_v42 = vmul.f32 %v228_v10, %v920_v31 }
  0x15   : > { %v249_v43 = vunpack.c.l.bf16 %v925_v34  ;;  %v250_v44 = vunpack.c.h.bf16 %v925_v34  ;;  %v939_v45 = vunpack.c.l.bf16 %v210_v39  ;;  %v941_v46 = vunpack.c.h.bf16 %v210_v39  ;;  %v982_v39 = vld [vmem:[%s897_s26 + $0x50] sm:$0x77] }
  0x16   : > { %v233_v47 = vmul.f32 %v227_v9, %v927_v35  ;;  %v234_v48 = vmul.f32 %v228_v10, %v929_v36  ;;  %v251_v49 = vunpack.c.l.bf16 %v933_v40  ;;  %v1312_v50 = vunpack.c.h.bf16 %v933_v40 }
  0x17   : > { %v255_v51 = vmul.f32 %v253_v11, %v245_v27  ;;  %v256_v52 = vmul.f32 %v254_v12, %v246_v28  ;;  %v235_v53 = vmul.f32 %v227_v9, %v939_v45  ;;  %v236_v54 = vmul.f32 %v228_v10, %v941_v46  ;;  %v979_v27 = vld [vmem:[%s897_s26 + $0x30] sm:$0x77] }
  0x18   : > { %v257_v55 = vmul.f32 %v253_v11, %v247_v32  ;;  %v258_v56 = vmul.f32 %v254_v12, %v248_v33  ;;  %v259_v57 = vmul.f32 %v253_v11, %v249_v43  ;;  %v260_v58 = vmul.f32 %v254_v12, %v250_v44 }
  0x19   : > { %v261_v59 = vmul.f32 %v253_v11, %v251_v49  ;;  %v262_v60 = vmul.f32 %v254_v12, %v1312_v50  ;;  %v263_v61 = vadd.f32 %v255_v51, %v229_v37  ;;  %v264_v62 = vadd.f32 %v256_v52, %v230_v38 }
  0x1a   : > { %v265_v63 = vadd.f32 %v257_v55, %v231_v41  ;;  %v266_v0 = vadd.f32 %v258_v56, %v232_v42  ;;  %v267_v1 = vadd.f32 %v259_v57, %v233_v47  ;;  %v268_v2 = vadd.f32 %v260_v58, %v234_v48  ;;  %v985_v41 = vld [vmem:[%s897_s26 + $0x70] sm:$0x77] }
  0x1b   : > { %v269_v3 = vadd.f32 %v261_v59, %v235_v53  ;;  %v270_v4 = vadd.f32 %v262_v60, %v236_v54  ;;  %v276_v5 = vmul.f32 %v890_v13, %v216_v25  ;;  %v277_v6 = vmul.f32 %v892_v14, %v217_v26 }
  0x1c   : > { %v278_v7 = vmul.f32 %v890_v13, %v918_v30  ;;  %v279_v8 = vmul.f32 %v892_v14, %v920_v31  ;;  %v280_v9 = vmul.f32 %v890_v13, %v927_v35  ;;  %v281_v10 = vmul.f32 %v892_v14, %v929_v36 }
  0x1d   : > { %v282_v11 = vmul.f32 %v890_v13, %v939_v45  ;;  %v283_v12 = vmul.f32 %v892_v14, %v941_v46  ;;  %v292_v20 = vrot.slane %v276_v5, 1  ;;  %v293_v23 = vrot.slane %v277_v6, 1 }
  0x1e   : > { %v294_v25 = vrot.slane %v278_v7, 1  ;;  %v295_v26 = vrot.slane %v279_v8, 1  ;;  %v296_v28 = vrot.slane %v280_v9, 1  ;;  %v297_v29 = vrot.slane %v281_v10, 1  ;;  %v209_v8 = vld [vmem:[%s897_s26 + $0x58] sm:$0x77] }
  0x1f   : > { %v298_v37 = vrot.slane %v282_v11, 1  ;;  %v299_v38 = vrot.slane %v283_v12, 1  ;;  %v308_v13 = vadd.f32 %v292_v20, %v263_v61  ;;  %v309_v42 = vadd.f32 %v293_v23, %v264_v62  ;;  %v213_v9 = vld [vmem:[%s897_s26 + $0x78] sm:$0x77] }
  0x20   : > { %v310_v47 = vadd.f32 %v294_v25, %v265_v63  ;;  %v311_v14 = vadd.f32 %v295_v26, %v266_v0  ;;  %v312_v48 = vadd.f32 %v296_v28, %v267_v1  ;;  %v313_v51 = vadd.f32 %v297_v29, %v268_v2  ;;  %v201_v2 = vld [vmem:[%s897_s26 + $0x18] sm:$0x77] }
  0x21   : > { %v314_v52 = vadd.f32 %v298_v37, %v269_v3  ;;  %v315_v53 = vadd.f32 %v299_v38, %v270_v4  ;;  %v316_v54 = vunpack.c.l.bf16 %v976_v19  ;;  %v317_v55 = vunpack.c.h.bf16 %v976_v19  ;;  %v205_v3 = vld [vmem:[%s897_s26 + $0x38] sm:$0x77] }
  0x22   : > { %v318_v56 = vunpack.c.l.bf16 %v979_v27  ;;  %v319_v57 = vunpack.c.h.bf16 %v979_v27  ;;  %v320_v58 = vunpack.c.l.bf16 %v982_v39  ;;  %v321_v59 = vunpack.c.h.bf16 %v982_v39 }
  0x23   : > { %v322_v60 = vunpack.c.l.bf16 %v985_v41  ;;  %v323_v61 = vunpack.c.h.bf16 %v985_v41  ;;  %v326_v62 = vmul.f32 %v899_v15, %v316_v54  ;;  %v327_v63 = vmul.f32 %v901_v16, %v317_v55 }
  0x24   : > { %v328_v0 = vmul.f32 %v899_v15, %v318_v56  ;;  %v329_v1 = vmul.f32 %v901_v16, %v319_v57  ;;  %v330_v4 = vmul.f32 %v899_v15, %v320_v58  ;;  %v331_v5 = vmul.f32 %v901_v16, %v321_v59 }
  0x25   : > { %v332_v6 = vmul.f32 %v899_v15, %v322_v60  ;;  %v333_v7 = vmul.f32 %v901_v16, %v323_v61  ;;  %v334_v10 = vadd.f32 %v326_v62, %v308_v13  ;;  %v335_v11 = vadd.f32 %v327_v63, %v309_v42 }
  0x26   : > { %v336_v12 = vadd.f32 %v328_v0, %v310_v47  ;;  %v337_v19 = vadd.f32 %v329_v1, %v311_v14  ;;  %v338_v20 = vadd.f32 %v330_v4, %v312_v48  ;;  %v339_v23 = vadd.f32 %v331_v5, %v313_v51 }
  0x27   : > { %v340_v25 = vadd.f32 %v332_v6, %v314_v52  ;;  %v341_v26 = vadd.f32 %v333_v7, %v315_v53  ;;  %v342_v27 = vunpack.c.l.bf16 %v201_v2  ;;  %v343_v28 = vunpack.c.h.bf16 %v201_v2 }
  0x28   : > { %v344_v29 = vunpack.c.l.bf16 %v205_v3  ;;  %v345_v37 = vunpack.c.h.bf16 %v205_v3  ;;  %v346_v38 = vunpack.c.l.bf16 %v209_v8  ;;  %v347_v39 = vunpack.c.h.bf16 %v209_v8 }
  0x29   : > { %v348_v41 = vunpack.c.l.bf16 %v213_v9  ;;  %v349_v15 = vunpack.c.h.bf16 %v213_v9  ;;  %v355_v16 = vmul.f32 %v903_v17, %v342_v27  ;;  %v356_v50 = vmul.f32 %v905_v18, %v343_v28  ;;  %v1024_v9 = vld [vmem:[%s897_s26 + $0x80] sm:$0x77] }
  0x2a   : > { %v357_v13 = vmul.f32 %v903_v17, %v344_v29  ;;  %v358_v42 = vmul.f32 %v905_v18, %v345_v37  ;;  %v359_v47 = vmul.f32 %v903_v17, %v346_v38  ;;  %v360_v14 = vmul.f32 %v905_v18, %v347_v39  ;;  %v501_v39 = vld [vmem:[%s1309_s2] sm:$0x3] }
  0x2b   : > { %v361_v48 = vmul.f32 %v903_v17, %v348_v41  ;;  %v362_v51 = vmul.f32 %v905_v18, %v349_v15  ;;  %v363_v52 = vadd.f32 %v355_v16, %v334_v10  ;;  %v364_v53 = vadd.f32 %v356_v50, %v335_v11 }
  0x2c   : > { %v365_v62 = vadd.f32 %v357_v13, %v336_v12  ;;  %v366_v63 = vadd.f32 %v358_v42, %v337_v19  ;;  %v367_v0 = vadd.f32 %v359_v47, %v338_v20  ;;  %v368_v1 = vadd.f32 %v360_v14, %v339_v23 }
  0x2d   : > { %v369_v2 = vadd.f32 %v361_v48, %v340_v25  ;;  %v370_v3 = vadd.f32 %v362_v51, %v341_v26  ;;  %v373_v4 = vmul.f32 %v909_v21, %v316_v54  ;;  %v374_v5 = vmul.f32 %v911_v22, %v317_v55 }
  0x2e   : > { %v375_v6 = vmul.f32 %v909_v21, %v318_v56  ;;  %v376_v17 = vmul.f32 %v911_v22, %v319_v57  ;;  %v377_v18 = vmul.f32 %v909_v21, %v320_v58  ;;  %v378_v7 = vmul.f32 %v911_v22, %v321_v59  ;;  %v415_v57 = vld [vmem:[%s1308_s1] sm:$0x88]  ;;  %v215_v58 = vld [vmem:[%s897_s26 + $0x88] sm:$0x77] }
  0x2f   : > { %v379_v50 = vmul.f32 %v909_v21, %v322_v60  ;;  %v380_v8 = vmul.f32 %v911_v22, %v323_v61  ;;  %v389_v10 = vrot.slane %v373_v4, 1  ;;  %v390_v11 = vrot.slane %v374_v5, 1  ;;  %v456_v22 = vld [vmem:[%s1308_s1 + $0x8] sm:$0x11] }
  0x30   : > { %v391_v54 = vrot.slane %v375_v6, 1  ;;  %v392_v12 = vrot.slane %v376_v17, 1  ;;  %v393_v55 = vrot.slane %v377_v18, 1  ;;  %v394_v19 = vrot.slane %v378_v7, 1 }
  0x31   : > { %v395_v56 = vrot.slane %v379_v50, 1  ;;  %v396_v20 = vrot.slane %v380_v8, 1  ;;  %v405_v59 = vadd.f32 %v389_v10, %v363_v52  ;;  %v406_v23 = vadd.f32 %v390_v11, %v364_v53 }
  0x32   : > { %v407_v21 = vadd.f32 %v391_v54, %v365_v62  ;;  %v408_v60 = vadd.f32 %v392_v12, %v366_v63  ;;  %v409_v61 = vadd.f32 %v393_v55, %v367_v0  ;;  %v410_v25 = vadd.f32 %v394_v19, %v368_v1 }
  0x33   : > { %v411_v26 = vadd.f32 %v395_v56, %v369_v2  ;;  %v412_v27 = vadd.f32 %v396_v20, %v370_v3  ;;  %v413_v28 = vunpack.c.l.bf16 %v1024_v9  ;;  %v414_v29 = vunpack.c.h.bf16 %v1024_v9 }
  0x34   : > { %v416_v37 = vunpack.c.l.bf16 %v415_v57  ;;  %v417_v38 = vunpack.c.h.bf16 %v415_v57  ;;  %v436_v41 = vunpack.c.l.bf16 %v215_v58  ;;  %v437_v15 = vunpack.c.h.bf16 %v215_v58 }
  0x35   : > { %v457_v16 = vunpack.c.l.bf16 %v456_v22  ;;  %v458_v13 = vunpack.c.h.bf16 %v456_v22  ;;  %v1038_v53 = vperm.slane %v501_v39, 0  ;;  %v1040_v62 = vperm.slane %v501_v39, 1 }
  0x36   : > { %v418_v42 = vperm.slane %v416_v37, 6  ;;  %v419_v47 = vperm.slane %v417_v38, 6  ;;  %v438_v14 = vperm.slane %v416_v37, 7  ;;  %v439_v48 = vperm.slane %v417_v38, 7 }
  0x37   : > { %v459_v51 = vperm.slane %v457_v16, 0  ;;  %v460_v52 = vperm.slane %v458_v13, 0  ;;  %v1313_v20 = vunpack.c.h.bf16 %v933_v40 }
  0x38   : > { %v420_v63 = vmul.f32 %v418_v42, %v918_v30  ;;  %v421_v0 = vmul.f32 %v419_v47, %v920_v31  ;;  %v422_v1 = vmul.f32 %v418_v42, %v927_v35  ;;  %v423_v2 = vmul.f32 %v419_v47, %v929_v36 }
  0x39   : > { %v424_v3 = vmul.f32 %v418_v42, %v939_v45  ;;  %v425_v4 = vmul.f32 %v419_v47, %v941_v46  ;;  %v426_v5 = vmul.f32 %v418_v42, %v413_v28  ;;  %v427_v6 = vmul.f32 %v419_v47, %v414_v29 }
  0x3a   : > { %v428_v17 = vadd.f32 %v420_v63, %v405_v59  ;;  %v429_v18 = vadd.f32 %v421_v0, %v406_v23  ;;  %v430_v7 = vadd.f32 %v422_v1, %v407_v21  ;;  %v431_v50 = vadd.f32 %v423_v2, %v408_v60 }
  0x3b   : > { %v432_v8 = vadd.f32 %v424_v3, %v409_v61  ;;  %v433_v9 = vadd.f32 %v425_v4, %v410_v25  ;;  %v434_v10 = vadd.f32 %v426_v5, %v411_v26  ;;  %v435_v11 = vadd.f32 %v427_v6, %v412_v27 }
  0x3c   : > { %v440_v54 = vmul.f32 %v438_v14, %v247_v32  ;;  %v441_v12 = vmul.f32 %v439_v48, %v248_v33  ;;  %v442_v55 = vmul.f32 %v438_v14, %v249_v43  ;;  %v443_v19 = vmul.f32 %v439_v48, %v250_v44 }
  0x3d   : > { %v444_v56 = vmul.f32 %v438_v14, %v251_v49  ;;  %v445_v57 = vmul.f32 %v439_v48, %v1313_v20  ;;  %v446_v58 = vmul.f32 %v438_v14, %v436_v41  ;;  %v447_v59 = vmul.f32 %v439_v48, %v437_v15 }
  0x3e   : > { %v448_v23 = vadd.f32 %v440_v54, %v428_v17  ;;  %v449_v21 = vadd.f32 %v441_v12, %v429_v18  ;;  %v450_v32 = vadd.f32 %v442_v55, %v430_v7  ;;  %v451_v60 = vadd.f32 %v443_v19, %v431_v50 }
  0x3f   : > { %v452_v24 = vadd.f32 %v444_v56, %v432_v8  ;;  %v453_v33 = vadd.f32 %v445_v57, %v433_v9  ;;  %v454_v22 = vadd.f32 %v446_v58, %v434_v10  ;;  %v455_v61 = vadd.f32 %v447_v59, %v435_v11 }
  0x40   : > { %v461_v43 = vmul.f32 %v459_v51, %v918_v30  ;;  %v462_v34 = vmul.f32 %v460_v52, %v920_v31  ;;  %v463_v44 = vmul.f32 %v459_v51, %v927_v35  ;;  %v464_v49 = vmul.f32 %v460_v52, %v929_v36 }
  0x41   : > { %v465_v40 = vmul.f32 %v459_v51, %v939_v45  ;;  %v466_v25 = vmul.f32 %v460_v52, %v941_v46  ;;  %v467_v26 = vmul.f32 %v459_v51, %v413_v28  ;;  %v468_v27 = vmul.f32 %v460_v52, %v414_v29  ;;  %v515_v46 = vld [vmem:[%s1310_s3] sm:$0x3] }
  0x42   : > { %v477_v37 = vrot.slane %v461_v43, 1  ;;  %v478_v38 = vrot.slane %v462_v34, 1  ;;  %v479_v39 = vrot.slane %v463_v44, 1  ;;  %v480_v41 = vrot.slane %v464_v49, 1 }
  0x43   : > { %v481_v15 = vrot.slane %v465_v40, 1  ;;  %v482_v16 = vrot.slane %v466_v25, 1  ;;  %v483_v13 = vrot.slane %v467_v26, 1  ;;  %v484_v30 = vrot.slane %v468_v27, 1 }
  0x44   : > { %v493_v42 = vadd.f32 %v477_v37, %v448_v23  ;;  %v494_v31 = vadd.f32 %v478_v38, %v449_v21  ;;  %v495_v47 = vadd.f32 %v479_v39, %v450_v32  ;;  %v496_v35 = vadd.f32 %v480_v41, %v451_v60 }
  0x45   : > { %v497_v14 = vadd.f32 %v481_v15, %v452_v24  ;;  %v498_v36 = vadd.f32 %v482_v16, %v453_v33  ;;  %v499_v48 = vadd.f32 %v483_v13, %v454_v22  ;;  %v500_v45 = vadd.f32 %v484_v30, %v455_v61 }
  0x46   : > { %v507_v28 = vmul.f32 %v1038_v53, %v493_v42  ;;  %v508_v29 = vmul.f32 %v1040_v62, %v494_v31  ;;  %v509_v51 = vmul.f32 %v1038_v53, %v495_v47  ;;  %v510_v52 = vmul.f32 %v1040_v62, %v496_v35 }
  0x47   : > { %v511_v63 = vmul.f32 %v1038_v53, %v497_v14  ;;  %v512_v0 = vmul.f32 %v1040_v62, %v498_v36  ;;  %v513_v1 = vmul.f32 %v1038_v53, %v499_v48  ;;  %v517_v2 = vperm.slane %v515_v46, 0 }
  0x48   : > { %v518_v3 = vperm.slane %v515_v46, 1  ;;  %v514_v4 = vmul.f32 %v1040_v62, %v500_v45 }
  0x49   : > { %v1077_v5 = vadd.f32 %v517_v2, %v507_v28  ;;  %v1081_v17 = vadd.f32 %v517_v2, %v509_v51  ;;  %v1085_v7 = vadd.f32 %v517_v2, %v511_v63  ;;  %v1089_v8 = vadd.f32 %v517_v2, %v513_v1 }
  0x4a   : > { %v1079_v6 = vadd.f32 %v518_v3, %v508_v29  ;;  %v1083_v18 = vadd.f32 %v518_v3, %v510_v52  ;;  %v1087_v50 = vadd.f32 %v518_v3, %v512_v0  ;;  %v1094_v10 = vadd.f32 %v518_v3, %v514_v4 }
  0x4b   : > { %v785_v53 = vmul.f32 -1.442695, %v1077_v5  ;;  %v787_v62 = vmul.f32 -1.442695, %v1081_v17  ;;  %v789_v54 = vmul.f32 -1.442695, %v1085_v7 }
  0x4c   : > { %v786_v9 = vmul.f32 -1.442695, %v1079_v6  ;;  %v788_v11 = vmul.f32 -1.442695, %v1083_v18  ;;  %v790_v12 = vmul.f32 -1.442695, %v1087_v50 }
  0x4d   : > { %805 = vpow2.f32 %v785_v53  ;;  %v791_v55 = vmul.f32 -1.442695, %v1089_v8  ;;  %v792_v19 = vmul.f32 -1.442695, %v1094_v10 }
  0x4e   : > { %807 = vpow2.f32 %v786_v9 }
  0x4f   : > { %809 = vpow2.f32 %v787_v62 }
  0x50   : > { %811 = vpow2.f32 %v788_v11 }
  0x51   : > { %813 = vpow2.f32 %v789_v54 }
  0x52   : > { %815 = vpow2.f32 %v790_v12 }
  0x53   : > { %v806_v56 = vpop.eup %805  ;;  %817 = vpow2.f32 %v791_v55 }
  0x54   : > { %v808_v20 = vpop.eup %807  ;;  %819 = vpow2.f32 %v792_v19  ;;  %v553_v57 = vadd.f32 1.0, %v806_v56 }
  0x55   : > { %v810_v58 = vpop.eup %809  ;;  %v1101_v59 = vadd.f32 1.0, %v808_v20 }
  0x56   : > { %v812_v23 = vpop.eup %811  ;;  %v1103_v21 = vadd.f32 1.0, %v810_v58  ;;  %821 = vrcp.f32 %v553_v57  ;;  %v572_v24 = vand.u32 2147483648, %v553_v57  ;;  %vm566_vm0 = vweird.f32 %v553_v57 }
  0x57   : > { %v814_v32 = vpop.eup %813  ;;  %v1105_v60 = vadd.f32 1.0, %v812_v23  ;;  %823 = vrcp.f32 %v1101_v59  ;;  %v587_v43 = vand.u32 2147483648, %v1101_v59  ;;  %v570_v44 = vand.u32 2147483647, %v553_v57 }
  0x58   : > { %v816_v33 = vpop.eup %815  ;;  %v1108_v22 = vadd.f32 1.0, %v814_v32  ;;  %825 = vrcp.f32 %v1103_v21  ;;  %vm581_vm1 = vweird.f32 %v1101_v59  ;;  %v585_v49 = vand.u32 2147483647, %v1101_v59 }
  0x59   : > { %v818_v61 = vpop.eup %817  ;;  %v1114_v40 = vadd.f32 1.0, %v816_v33  ;;  %v1116_v25 = vor.u32 1.1754944e-38, %v572_v24  ;;  %v602_v26 = vand.u32 2147483648, %v1103_v21  ;;  %827 = vrcp.f32 %v1105_v60 }
  0x5a   : > { %v820_v34 = vpop.eup %819  ;;  %vm596_vm2 = vweird.f32 %v1103_v21  ;;  %v600_v37 = vand.u32 2147483647, %v1103_v21  ;;  %v615_v38 = vand.u32 2147483647, %v1105_v60  ;;  %829 = vrcp.f32 %v1108_v22 }
  0x5b   : > { %v1128_v41 = vadd.f32 1.0, %v818_v61  ;;  %v1130_v15 = vadd.f32 1.0, %v820_v34  ;;  %v1133_v13 = vor.u32 1.1754944e-38, %v587_v43  ;;  %vm611_vm4 = vweird.f32 %v1105_v60 }
  0x5c   : > { %v1120_v27 = vpop.eup %821  ;;  %v617_v42 = vand.u32 2147483648, %v1105_v60  ;;  %vm1142_vm5 = vcmp.eq.f32.partialorder %v570_v44, 8.507059e+37  ;;  %vm1146_vm6 = vcmp.eq.f32.partialorder %v585_v49, 8.507059e+37  ;;  %v603_v36 = vor.u32 1.1754944e-38, %v602_v26 }
  0x5d   : > { %v1126_v39 = vpop.eup %823  ;;  %v562_v16 = vmul.f32 %v1120_v27, %v553_v57  ;;  %vm567_vm3 = vweird.f32 %v1120_v27  ;;  %vm626_vm7 = vweird.f32 %v1108_v22  ;;  %831 = vrcp.f32 %v1114_v40 }
  0x5e   : > { %v577_v30 = vmul.f32 %v1126_v39, %v1101_v59  ;;  %v1140_v31 = vpop.eup %825  ;;  %vm582_vm8 = vweird.f32 %v1126_v39  ;;  %vm1155_vm9 = vcmp.eq.f32.partialorder %v600_v37, 8.507059e+37  ;;  %vm1159_vm10 = vcmp.eq.f32.partialorder %v615_v38, 8.507059e+37  ;;  %vm1174_vm12 = vmor %vm566_vm0, %vm567_vm3 }
  0x5f   : > { %v563_v47 = vsub.f32 1.0, %v562_v16  ;;  %v592_v45 = vmul.f32 %v1140_v31, %v1103_v21  ;;  %v828_v29 = vpop.eup %827  ;;  %vm597_vm11 = vweird.f32 %v1140_v31  ;;  %v630_v52 = vand.u32 2147483647, %v1108_v22  ;;  %vm1185_vm14 = vmor %vm581_vm1, %vm582_vm8 }
  0x60   : > { %v578_v48 = vsub.f32 1.0, %v577_v30  ;;  %v632_v63 = vand.u32 2147483648, %v1108_v22  ;;  %v830_v0 = vpop.eup %829  ;;  %v607_v3 = vmul.f32 %v828_v29, %v1105_v60  ;;  %v645_v4 = vand.u32 2147483647, %v1114_v40  ;;  %vm1194_vm0 = vmor %vm596_vm2, %vm597_vm11 }
  0x61   : > { %v564_v51 = vmul.f32 %v1120_v27, %v563_v47  ;;  %v593_v2 = vsub.f32 1.0, %v592_v45  ;;  %v618_v62 = vor.u32 1.1754944e-38, %v617_v42  ;;  %v622_v11 = vmul.f32 %v830_v0, %v1108_v22 }
  0x62   : > { %v579_v1 = vmul.f32 %v1126_v39, %v578_v48  ;;  %v608_v19 = vsub.f32 1.0, %v607_v3  ;;  %vm612_vm15 = vweird.f32 %v828_v29  ;;  %vm627_vm3 = vweird.f32 %v830_v0 }
  0x63   : > { %v565_v53 = vadd.f32 %v1120_v27, %v564_v51  ;;  %v594_v55 = vmul.f32 %v1140_v31, %v593_v2  ;;  %v832_v56 = vpop.eup %831  ;;  %v623_v57 = vsub.f32 1.0, %v622_v11  ;;  %vm1198_vm13 = vcmp.eq.f32.partialorder %v630_v52, 8.507059e+37  ;;  %vm1216_vm2 = vmor %vm611_vm4, %vm612_vm15 }
  0x64   : > { %v580_v54 = vadd.f32 %v1126_v39, %v579_v1  ;;  %833 = vrcp.f32 %v1128_v41  ;;  %v609_v23 = vmul.f32 %v828_v29, %v608_v19  ;;  %v633_v32 = vor.u32 1.1754944e-38, %v632_v63  ;;  %vm1226_vm8 = vmor %vm626_vm7, %vm627_vm3 }
  0x65   : > { %v595_v59 = vadd.f32 %v1140_v31, %v594_v55  ;;  %vm1204_vm1 = vcmp.eq.f32.partialorder %v645_v4, 8.507059e+37  ;;  %v569_v21 = vsel %vm1174_vm12, %v1120_v27, %v565_v53  ;;  %v624_v43 = vmul.f32 %v830_v0, %v623_v57 }
  0x66   : > { %v584_v33 = vsel %vm1185_vm14, %v1126_v39, %v580_v54  ;;  %v637_v34 = vmul.f32 %v832_v56, %v1114_v40  ;;  %v610_v49 = vadd.f32 %v828_v29, %v609_v23  ;;  %v647_v60 = vand.u32 2147483648, %v1114_v40 }
  0x67   : > { %v599_v44 = vsel %vm1194_vm0, %v1140_v31, %v595_v59  ;;  %vm656_vm4 = vweird.f32 %v1128_v41  ;;  %v625_v27 = vadd.f32 %v830_v0, %v624_v43  ;;  %vm642_vm11 = vweird.f32 %v832_v56 }
  0x68   : > { %v638_v37 = vsub.f32 1.0, %v637_v34  ;;  %v660_v38 = vand.u32 2147483647, %v1128_v41  ;;  %v574_v39 = vsel %vm1142_vm5, %v1116_v25, %v569_v21  ;;  %v589_v22 = vsel %vm1146_vm6, %v1133_v13, %v584_v33 }
  0x69   : > { %v614_v16 = vsel %vm1216_vm2, %v828_v29, %v610_v49  ;;  %835 = vrcp.f32 %v1130_v15  ;;  %v604_v42 = vsel %vm1155_vm9, %v603_v36, %v599_v44  ;;  %v629_v25 = vsel %vm1226_vm8, %v830_v0, %v625_v27 }
  0x6a   : > { %v834_v30 = vpop.eup %833  ;;  %v619_v31 = vsel %vm1159_vm10, %v618_v62, %v614_v16  ;;  %v639_v47 = vmul.f32 %v832_v56, %v638_v37  ;;  %v634_v13 = vsel %vm1198_vm13, %v633_v32, %v629_v25  ;;  %vm1336_vm5 = vweird.f32 %v1114_v40 }
  0x6b   : > { %vm1252_vm6 = vmor %vm1336_vm5, %vm642_vm11  ;;  %v648_v14 = vor.u32 1.1754944e-38, %v647_v60  ;;  %v652_v48 = vmul.f32 %v834_v30, %v1128_v41  ;;  %v662_v36 = vand.u32 2147483648, %v1128_v41  ;;  %vm1258_vm7 = vcmp.eq.f32.partialorder %v660_v38, 8.507059e+37 }
  0x6c   : > { %v640_v45 = vadd.f32 %v832_v56, %v639_v47  ;;  %v681_v28 = vmul.f32 %v574_v39, %v1077_v5  ;;  %v682_v29 = vmul.f32 %v589_v22, %v1079_v6  ;;  %vm657_vm9 = vweird.f32 %v834_v30 }
  0x6d   : > { %v653_v40 = vsub.f32 1.0, %v652_v48  ;;  %v683_v51 = vmul.f32 %v604_v42, %v1081_v17  ;;  %v684_v52 = vmul.f32 %v619_v31, %v1083_v18  ;;  %vm671_vm10 = vweird.f32 %v1130_v15  ;;  %vm1280_vm13 = vmor %vm656_vm4, %vm657_vm9 }
  0x6e   : > { %v644_v63 = vsel %vm1252_vm6, %v832_v56, %v640_v45  ;;  %v685_v0 = vmul.f32 %v634_v13, %v1085_v7  ;;  %v689_v1 = vpack.c.bf16 %v682_v29, %v681_v28  ;;  %vm701_vm12 = vcmask 1041408  }
  0x6f   : > { %v836_v2 = vpop.eup %835  ;;  %v649_v5 = vsel %vm1204_vm1, %v648_v14, %v644_v63  ;;  %v654_v6 = vmul.f32 %v834_v30, %v653_v40  ;;  %v690_v3 = vpack.c.bf16 %v684_v52, %v683_v51  ;;  %v663_v18 = vor.u32 1.1754944e-38, %v662_v36 }
  0x70   : > { %v667_v7 = vmul.f32 %v836_v2, %v1130_v15  ;;  %v686_v4 = vmul.f32 %v649_v5, %v1087_v50  ;;  %v697_v53 = vrot.slane %v689_v1, 2  ;;  %v675_v62 = vand.u32 2147483647, %v1130_v15 }
  0x71   : > { %v655_v9 = vadd.f32 %v834_v30, %v654_v6  ;;  %v677_v11 = vand.u32 2147483648, %v1130_v15  ;;  %v698_v54 = vrot.slane %v690_v3, 2  ;;  %vm672_vm14 = vweird.f32 %v836_v2 }
  0x72   : > { %v668_v12 = vsub.f32 1.0, %v667_v7  ;;  %v691_v41 = vpack.c.bf16 %v686_v4, %v685_v0  ;;  %v704_v55 = vsel %vm701_vm12, %v689_v1, %v697_v53  ;;  %vm673_vm15 = vmor %vm671_vm10, %vm672_vm14  ;;  %vm676_vm0 = vcmp.eq.f32.partialorder %v675_v62, 8.507059e+37 }
  0x73   : > { %v659_v19 = vsel %vm1280_vm13, %v834_v30, %v655_v9  ;;  %v707_v56 = vsel %vm701_vm12, %v690_v3, %v698_v54  ;;  %718 = vst [vmem:[%s1276_s12] sm:$0xf] %v704_v55  ;;  %v678_v58 = vor.u32 1.1754944e-38, %v677_v11 }
  0x74   : > { %v669_v50 = vmul.f32 %v836_v2, %v668_v12  ;;  %v699_v20 = vrot.slane %v691_v41, 2  ;;  %719 = vst [vmem:[%s1276_s12 + $0x4] sm:$0xf] %v707_v56  ;;  %v664_v57 = vsel %vm1258_vm7, %v663_v18, %v659_v19 }
  0x75   : > { %v687_v24 = vmul.f32 %v664_v57, %v1089_v8 }
  0x76   : > { %v670_v59 = vadd.f32 %v836_v2, %v669_v50  ;;  %v710_v23 = vsel %vm701_vm12, %v691_v41, %v699_v20 }
  0x77   : > { %720 = vst [vmem:[%s1276_s12 + $0x8] sm:$0xf] %v710_v23 }
  0x78   : > { %v674_v32 = vsel %vm673_vm15, %v836_v2, %v670_v59 }
  0x79   : > { %v679_v21 = vsel %vm676_vm0, %v678_v58, %v674_v32 }
  0x7a   : > { %v688_v33 = vmul.f32 %v679_v21, %v1094_v10 }
  0x7c   : > { %v692_v61 = vpack.c.bf16 %v688_v33, %v687_v24 }
  0x7e   : > { %v700_v43 = vrot.slane %v692_v61, 2 }
  0x80   : > { %v713_v34 = vsel %vm701_vm12, %v692_v61, %v700_v43 }
  0x81   : > { %721 = vst [vmem:[%s1276_s12 + $0xc] sm:$0xf] %v713_v34 }
  0x82 PF: > { %s14_s15 = sadd.s32 1, %s843_s15  }
  0x83   : > { %p11_p4 = scmp.ge.s32.totalorder %s14_s15, 4  }
  0x85   :  { %13 = sbr.rel (!%p11_p4) target bundleno = 1 (0x1), region = 66 }

// kernel: _forward_impl.15
= control target key start
LH: loop header
LB: loop body
LE: loop exit
PB: predicated region body
PF: predicated region fallthrough
CT: control target
= control target key end

     0   :  { %s595_s15 = smov 0   ;;  %s670_s0 = inlined_call_operand.vmem [shape: bf16[32,256], index: 0, kind: input, shape index: {}]   ;;  %s671_s1 = inlined_call_operand.vmem [shape: bf16[256,128], index: 1, kind: input, shape index: {}]   ;;  %s672_s2 = inlined_call_operand.vmem [shape: f32[1,128], index: 2, kind: input, shape index: {}]   ;;  %s673_s3 = inlined_call_operand.vmem [shape: f32[1,128], index: 3, kind: input, shape index: {}]   ;;  %s674_s4 = inlined_call_operand.vmem [shape: bf16[32,128], index: 4, kind: output, shape index: {}]  }
   0x1 LB: > { %s444_s16 = sadd.s32 4294967295, %s568_s15   ;;  %p448_p0 = scmp.ge.s32.totalorder %s568_s15, 1  ;;  %s568_s15 = sphi %s595_s15, %s14_s15  }
   0x2   : > { %p164_p1 = scmp.lt.s32.totalorder %s568_s15, 3 }
   0x4   : > { %p165_p2 = pnand %p448_p0, %p164_p1 }
   0x5   : > { %s449_s29 = sshll.u32 (!%p165_p2), %s444_s16, 1 }
   0x6   : > { %168 = sbr.rel (%p165_p2) target bundleno = 187 (0xbb), region = 36  ;;  %p192_p3 = scmp.lt.s32.totalorder (!%p165_p2), %s449_s29, 3 }
   0xb   : > { %v538_v0 = vld [vmem:[%s671_s1 + $0x38] sm:$0xff]  ;;  %v537_v2 = vld [vmem:[%s671_s1 + $0x30] sm:$0xff]  ;;  %v536_v4 = vld [vmem:[%s671_s1 + $0x28] sm:$0xff]  ;;  %s676_s29 = smov (!%p192_p3, %s449_s29), 3 }
   0xc   : > { %v546_v1 = vld [vmem:[%s671_s1 + $0x78] sm:$0xff]  ;;  %344 = vmatpush.bf16.msra.mxu0 %v538_v0  ;;  %v545_v3 = vld [vmem:[%s671_s1 + $0x70] sm:$0xff]  ;;  %v544_v5 = vld [vmem:[%s671_s1 + $0x68] sm:$0xff]  ;;  %s528_s17 = sshll.u32 %s676_s29, 3  ;;  %s453_s8 = sshll.u32 %s676_s29, 2 }
   0xd   : > { %358 = vmatpush.bf16.msra.mxu1 %v546_v1  ;;  %v535_v6 = vld [vmem:[%s671_s1 + $0x20] sm:$0xff]  ;;  %v534_v8 = vld [vmem:[%s671_s1 + $0x18] sm:$0xff]  ;;  %v533_v10 = vld [vmem:[%s671_s1 + $0x10] sm:$0xff]  ;;  %s196_s24 = scalar_lea.vmem %s670_s0, %s528_s17  ;;  %s202_s11 = scalar_lea.vmem %s674_s4, %s453_s8 }
   0xe   : > { %v543_v7 = vld [vmem:[%s671_s1 + $0x60] sm:$0xff]  ;;  %v542_v9 = vld [vmem:[%s671_s1 + $0x58] sm:$0xff]  ;;  %v541_v11 = vld [vmem:[%s671_s1 + $0x50] sm:$0xff] }
   0xf   : > { %v532_v12 = vld [vmem:[%s671_s1 + $0x8] sm:$0xff]  ;;  %v531_v14 = vld [vmem:[%s671_s1] sm:$0xff] }
  0x10   : > { %345 = vmatpush.bf16.msra.mxu0 %v537_v2  ;;  %v540_v13 = vld [vmem:[%s671_s1 + $0x48] sm:$0xff]  ;;  %v539_v15 = vld [vmem:[%s671_s1 + $0x40] sm:$0xff] }
  0x11   : > { %359 = vmatpush.bf16.msra.mxu1 %v545_v3  ;;  %v456_v16 = vld [vmem:[%s196_s24] sm:$0xf]  ;;  %v530_v17 = vld [vmem:[%s196_s24 + $0x4] sm:$0xf0]  ;;  %v529_v18 = vld [vmem:[%s196_s24 + $0x4] sm:$0xf] }
  0x12   : > { %v458_v19 = vld [vmem:[%s196_s24 + $0x8] sm:$0xf0]  ;;  %v457_v20 = vor.u32 %v530_v17, %v456_v16  ;;  %v560_v25 = vld [vmem:[%s672_s2] ss:$0 sm:$0xff] }
  0x13   : > { %v461_v21 = vor.u32 %v529_v18, %v458_v19  ;;  %v561_v29 = vld [vmem:[%s673_s3] ss:$0 sm:$0xff] }
  0x14   : > { %346 = vmatpush.bf16.msra.mxu0 %v536_v4 }
  0x15   : > { %360 = vmatpush.bf16.msra.mxu1 %v544_v5 }
  0x18   : > { %347 = vmatpush.bf16.msra.mxu0 %v535_v6 }
  0x19   : > { %361 = vmatpush.bf16.msra.mxu1 %v543_v7 }
  0x1c   : > { %348 = vmatpush.bf16.msra.mxu0 %v534_v8 }
  0x1d   : > { %362 = vmatpush.bf16.msra.mxu1 %v542_v9 }
  0x20   : > { %349 = vmatpush.bf16.msra.mxu0 %v533_v10 }
  0x21   : > { %363 = vmatpush.bf16.msra.mxu1 %v541_v11 }
  0x24   : > { %350 = vmatpush.bf16.msra.mxu0 %v532_v12 }
  0x25   : > { %364 = vmatpush.bf16.msra.mxu1 %v540_v13 }
  0x28   : > { %351 = vmatpush.bf16.msra.mxu0 %v531_v14 }
  0x29   : > { %365 = vmatpush.bf16.msra.mxu1 %v539_v15 }
  0x2b   : > { %352 = vmatmul.bf16.vlgmr.msra.gmra.mxu0 %v457_v20 }
  0x2c   : > { %366 = vmatmul.bf16.vlgmr.msra.gmra.mxu1 %v461_v21 }
  0xa8   : > { %v353_v22 = vpop.f32.mrf.mxu0 }
  0xa9   : > { %v367_v23 = vpop.f32.mrf.mxu1 }
  0xaa   : > { %v368_v24 = vadd.f32 %v367_v23, %v353_v22 }
  0xac   : > { %v376_v28 = vmul.f32 %v560_v25, %v368_v24 }
  0xae   : > { %v382_v32 = vadd.f32 %v561_v29, %v376_v28 }
  0xb0   : > { %v355_v26 = vpop.f32.mrf.mxu0 }
  0xb1   : > { %v369_v27 = vpop.f32.mrf.mxu1 }
  0xb2   : > { %v370_v30 = vadd.f32 %v369_v27, %v355_v26 }
  0xb4   : > { %v377_v31 = vmul.f32 %v560_v25, %v370_v30 }
  0xb6   : > { %v383_v33 = vadd.f32 %v561_v29, %v377_v31 }
  0xb8   : > { %v550_v34 = vpack.c.bf16 %v383_v33, %v382_v32 }
  0xba   : > { %551 = vst [vmem:[%s202_s11] sm:$0xff] %v550_v34  }
  0xbb PF: > { %s14_s15 = sadd.s32 1, %s568_s15  }
  0xbc   : > { %p11_p4 = scmp.ge.s32.totalorder %s14_s15, 4  }
  0xbe   :  { %13 = sbr.rel (!%p11_p4) target bundleno = 1 (0x1), region = 66 }

// kernel: _forward_impl.16
= control target key start
LH: loop header
LB: loop body
LE: loop exit
PB: predicated region body
PF: predicated region fallthrough
CT: control target
= control target key end

     0   :  { %s656_s15 = smov 0   ;;  %s789_s0 = inlined_call_operand.vmem [shape: bf16[32,128], index: 0, kind: input, shape index: {}]   ;;  %s790_s1 = inlined_call_operand.vmem [shape: bf16[128,256], index: 1, kind: input, shape index: {}]   ;;  %s791_s2 = inlined_call_operand.vmem [shape: f32[1,256], index: 2, kind: input, shape index: {}]   ;;  %s792_s3 = inlined_call_operand.vmem [shape: f32[1,256], index: 3, kind: input, shape index: {}]   ;;  %s793_s4 = inlined_call_operand.vmem [shape: bf16[32,256], index: 4, kind: output, shape index: {}]  }
   0x1 LB: > { %s497_s16 = sadd.s32 4294967295, %s629_s15   ;;  %p501_p0 = scmp.ge.s32.totalorder %s629_s15, 1  ;;  %s629_s15 = sphi %s656_s15, %s14_s15  }
   0x2   : > { %p163_p1 = scmp.lt.s32.totalorder %s629_s15, 3 }
   0x4   : > { %p164_p2 = pnand %p501_p0, %p163_p1 }
   0x5   : > { %s502_s7 = sshll.u32 (!%p164_p2), %s497_s16, 1 }
   0x6   : > { %167 = sbr.rel (%p164_p2) target bundleno = 219 (0xdb), region = 36  ;;  %p191_p3 = scmp.lt.s32.totalorder (!%p164_p2), %s502_s7, 3 }
   0xb   : > { %v569_v0 = vld [vmem:[%s790_s1 + $0x70] sm:$0xf]  ;;  %v598_v1 = vld [vmem:[%s790_s1 + $0x74] sm:$0xf0]  ;;  %v597_v2 = vld [vmem:[%s790_s1 + $0x74] sm:$0xf] }
   0xc   : > { %v570_v3 = vor.u32 %v598_v1, %v569_v0  ;;  %v571_v4 = vld [vmem:[%s790_s1 + $0x78] sm:$0xf0]  ;;  %v561_v5 = vld [vmem:[%s790_s1 + $0x60] sm:$0xf]  ;;  %v596_v6 = vld [vmem:[%s790_s1 + $0x64] sm:$0xf0] }
   0xd   : > { %v574_v7 = vor.u32 %v597_v2, %v571_v4  ;;  %v595_v8 = vld [vmem:[%s790_s1 + $0x64] sm:$0xf]  ;;  %v563_v9 = vld [vmem:[%s790_s1 + $0x68] sm:$0xf0]  ;;  %v562_v10 = vor.u32 %v596_v6, %v561_v5  ;;  %v553_v12 = vld [vmem:[%s790_s1 + $0x50] sm:$0xf] }
   0xe   : > { %307 = vmatpush.bf16.msra.mxu0 %v570_v3  ;;  %v566_v11 = vor.u32 %v595_v8, %v563_v9  ;;  %v594_v13 = vld [vmem:[%s790_s1 + $0x54] sm:$0xf0]  ;;  %v593_v14 = vld [vmem:[%s790_s1 + $0x54] sm:$0xf]  ;;  %v555_v15 = vld [vmem:[%s790_s1 + $0x58] sm:$0xf0] }
   0xf   : > { %321 = vmatpush.bf16.msra.mxu1 %v574_v7  ;;  %v554_v16 = vor.u32 %v594_v13, %v553_v12  ;;  %v558_v17 = vor.u32 %v593_v14, %v555_v15  ;;  %v545_v18 = vld [vmem:[%s790_s1 + $0x40] sm:$0xf]  ;;  %v592_v19 = vld [vmem:[%s790_s1 + $0x44] sm:$0xf0]  ;;  %v591_v20 = vld [vmem:[%s790_s1 + $0x44] sm:$0xf] }
  0x10   : > { %v547_v21 = vld [vmem:[%s790_s1 + $0x48] sm:$0xf0]  ;;  %v546_v22 = vor.u32 %v592_v19, %v545_v18  ;;  %v537_v24 = vld [vmem:[%s790_s1 + $0x30] sm:$0xf]  ;;  %v590_v25 = vld [vmem:[%s790_s1 + $0x34] sm:$0xf0] }
  0x11   : > { %v550_v23 = vor.u32 %v591_v20, %v547_v21  ;;  %v589_v26 = vld [vmem:[%s790_s1 + $0x34] sm:$0xf]  ;;  %v539_v27 = vld [vmem:[%s790_s1 + $0x38] sm:$0xf0]  ;;  %v538_v28 = vor.u32 %v590_v25, %v537_v24  ;;  %v529_v30 = vld [vmem:[%s790_s1 + $0x20] sm:$0xf] }
  0x12   : > { %308 = vmatpush.bf16.msra.mxu0 %v562_v10  ;;  %v542_v29 = vor.u32 %v589_v26, %v539_v27  ;;  %v588_v31 = vld [vmem:[%s790_s1 + $0x24] sm:$0xf0]  ;;  %v587_v32 = vld [vmem:[%s790_s1 + $0x24] sm:$0xf]  ;;  %v531_v33 = vld [vmem:[%s790_s1 + $0x28] sm:$0xf0] }
  0x13   : > { %322 = vmatpush.bf16.msra.mxu1 %v566_v11  ;;  %v530_v34 = vor.u32 %v588_v31, %v529_v30  ;;  %v534_v35 = vor.u32 %v587_v32, %v531_v33  ;;  %v521_v36 = vld [vmem:[%s790_s1 + $0x10] sm:$0xf]  ;;  %v586_v37 = vld [vmem:[%s790_s1 + $0x14] sm:$0xf0]  ;;  %s795_s7 = smov (!%p191_p3, %s502_s7), 3 }
  0x14   : > { %v585_v38 = vld [vmem:[%s790_s1 + $0x14] sm:$0xf]  ;;  %v523_v39 = vld [vmem:[%s790_s1 + $0x18] sm:$0xf0]  ;;  %v522_v40 = vor.u32 %v586_v37, %v521_v36  ;;  %v513_v42 = vld [vmem:[%s790_s1] sm:$0xf] }
  0x15   : > { %v526_v41 = vor.u32 %v585_v38, %v523_v39  ;;  %v584_v43 = vld [vmem:[%s790_s1 + $0x4] sm:$0xf0]  ;;  %s503_s29 = sshll.u32 %s795_s7, 2  ;;  %v583_v44 = vld [vmem:[%s790_s1 + $0x4] sm:$0xf]  ;;  %s581_s16 = sshll.u32 %s795_s7, 3 }
  0x16   : > { %309 = vmatpush.bf16.msra.mxu0 %v554_v16  ;;  %v515_v45 = vld [vmem:[%s790_s1 + $0x8] sm:$0xf0]  ;;  %v514_v46 = vor.u32 %v584_v43, %v513_v42  ;;  %s194_s11 = scalar_lea.vmem %s789_s0, %s503_s29  ;;  %v335_v49 = vld [vmem:[%s791_s2] sm:$0x3]  ;;  %s201_s20 = scalar_lea.vmem %s793_s4, %s581_s16 }
  0x17   : > { %323 = vmatpush.bf16.msra.mxu1 %v558_v17  ;;  %v518_v47 = vor.u32 %v583_v44, %v515_v45  ;;  %v582_v48 = vld [vmem:[%s194_s11] sm:$0xff]  ;;  %v337_v51 = vperm.slane %v335_v49, 0  ;;  %v338_v52 = vperm.slane %v335_v49, 1 }
  0x18   : > { %v345_v50 = vld [vmem:[%s792_s3] sm:$0x3] }
  0x19   : > { %v347_v53 = vperm.slane %v345_v50, 0  ;;  %v348_v55 = vperm.slane %v345_v50, 1 }
  0x1a   : > { %310 = vmatpush.bf16.msra.mxu0 %v546_v22 }
  0x1b   : > { %324 = vmatpush.bf16.msra.mxu1 %v550_v23 }
  0x1e   : > { %311 = vmatpush.bf16.msra.mxu0 %v538_v28 }
  0x1f   : > { %325 = vmatpush.bf16.msra.mxu1 %v542_v29 }
  0x22   : > { %312 = vmatpush.bf16.msra.mxu0 %v530_v34 }
  0x23   : > { %326 = vmatpush.bf16.msra.mxu1 %v534_v35 }
  0x26   : > { %313 = vmatpush.bf16.msra.mxu0 %v522_v40 }
  0x27   : > { %327 = vmatpush.bf16.msra.mxu1 %v526_v41 }
  0x2a   : > { %314 = vmatpush.bf16.msra.mxu0 %v514_v46 }
  0x2b   : > { %328 = vmatpush.bf16.msra.mxu1 %v518_v47 }
  0x2d   : > { %315 = vmatmul.bf16.vlgmr.msra.gmra.mxu0 %v582_v48 }
  0x2e   : > { %329 = vmatmul.bf16.vlgmr.msra.gmra.mxu1 %v582_v48 }
  0xaa   : > { %v316_v54 = vpop.f32.mrf.mxu0 }
  0xab   : > { %v341_v56 = vmul.f32 %v337_v51, %v316_v54  ;;  %v330_v57 = vpop.f32.mrf.mxu1 }
  0xac   : > { %v342_v58 = vmul.f32 %v338_v52, %v330_v57 }
  0xad   : > { %v351_v59 = vadd.f32 %v347_v53, %v341_v56 }
  0xae   : > { %v352_v60 = vadd.f32 %v348_v55, %v342_v58 }
  0xaf   : > { %v575_v61 = vmul.f32 -1.442695, %v351_v59 }
  0xb0   : > { %v576_v62 = vmul.f32 -1.442695, %v352_v60 }
  0xb1   : > { %607 = vpow2.f32 %v575_v61 }
  0xb2   : > { %609 = vpow2.f32 %v576_v62  ;;  %v318_v63 = vpop.f32.mrf.mxu0 }
  0xb3   : > { %v343_v0 = vmul.f32 %v337_v51, %v318_v63  ;;  %v332_v1 = vpop.f32.mrf.mxu1 }
  0xb4   : > { %v344_v2 = vmul.f32 %v338_v52, %v332_v1 }
  0xb5   : > { %v774_v3 = vadd.f32 %v347_v53, %v343_v0 }
  0xb6   : > { %v776_v4 = vadd.f32 %v348_v55, %v344_v2 }
  0xb7   : > { %v608_v5 = vpop.eup %607  ;;  %v577_v6 = vmul.f32 -1.442695, %v774_v3 }
  0xb8   : > { %v610_v7 = vpop.eup %609  ;;  %v367_v8 = vadd.f32 1.0, %v608_v5  ;;  %v578_v9 = vmul.f32 -1.442695, %v776_v4 }
  0xb9   : > { %v368_v10 = vadd.f32 1.0, %v610_v7  ;;  %611 = vpow2.f32 %v577_v6 }
  0xba   : > { %613 = vrcp.f32 %v367_v8  ;;  %v380_v20 = vand.u32 2147483647, %v367_v8  ;;  %v382_v21 = vand.u32 2147483648, %v367_v8  ;;  %vm376_vm2 = vweird.f32 %v367_v8 }
  0xbb   : > { %615 = vrcp.f32 %v368_v10  ;;  %v397_v24 = vand.u32 2147483648, %v368_v10  ;;  %v395_v26 = vand.u32 2147483647, %v368_v10  ;;  %vm391_vm4 = vweird.f32 %v368_v10 }
  0xbc   : > { %617 = vpow2.f32 %v578_v9  ;;  %v383_v29 = vor.u32 1.1754944e-38, %v382_v21  ;;  %vm381_vm5 = vcmp.eq.f32.partialorder %v380_v20, 8.507059e+37 }
  0xbd   : > { %v398_v32 = vor.u32 1.1754944e-38, %v397_v24  ;;  %vm396_vm7 = vcmp.eq.f32.partialorder %v395_v26, 8.507059e+37 }
  0xbf   : > { %v612_v11 = vpop.eup %611 }
  0xc0   : > { %v614_v12 = vpop.eup %613  ;;  %v369_v13 = vadd.f32 1.0, %v612_v11 }
  0xc1   : > { %v616_v14 = vpop.eup %615  ;;  %v372_v15 = vmul.f32 %v614_v12, %v367_v8  ;;  %vm377_vm0 = vweird.f32 %v614_v12 }
  0xc2   : > { %v618_v16 = vpop.eup %617  ;;  %v387_v17 = vmul.f32 %v616_v14, %v368_v10  ;;  %619 = vrcp.f32 %v369_v13  ;;  %vm392_vm1 = vweird.f32 %v616_v14  ;;  %vm378_vm3 = vmor %vm376_vm2, %vm377_vm0  ;;  %v412_v41 = vand.u32 2147483648, %v369_v13 }
  0xc3   : > { %v373_v18 = vsub.f32 1.0, %v372_v15  ;;  %v370_v19 = vadd.f32 1.0, %v618_v16  ;;  %vm393_vm6 = vmor %vm391_vm4, %vm392_vm1  ;;  %v410_v44 = vand.u32 2147483647, %v369_v13  ;;  %vm406_vm9 = vweird.f32 %v369_v13 }
  0xc4   : > { %v388_v22 = vsub.f32 1.0, %v387_v17  ;;  %v413_v49 = vor.u32 1.1754944e-38, %v412_v41 }
  0xc5   : > { %v374_v23 = vmul.f32 %v614_v12, %v373_v18  ;;  %621 = vrcp.f32 %v370_v19  ;;  %v427_v48 = vand.u32 2147483648, %v370_v19  ;;  %v425_v51 = vand.u32 2147483647, %v370_v19 }
  0xc6   : > { %v389_v25 = vmul.f32 %v616_v14, %v388_v22  ;;  %vm411_vm12 = vcmp.eq.f32.partialorder %v410_v44, 8.507059e+37  ;;  %vm421_vm13 = vweird.f32 %v370_v19 }
  0xc7   : > { %v375_v27 = vadd.f32 %v614_v12, %v374_v23  ;;  %v428_v55 = vor.u32 1.1754944e-38, %v427_v48  ;;  %vm426_vm15 = vcmp.eq.f32.partialorder %v425_v51, 8.507059e+37 }
  0xc8   : > { %v620_v28 = vpop.eup %619  ;;  %v390_v30 = vadd.f32 %v616_v14, %v389_v25 }
  0xc9   : > { %v379_v31 = vsel %vm378_vm3, %v614_v12, %v375_v27  ;;  %v402_v33 = vmul.f32 %v620_v28, %v369_v13  ;;  %vm407_vm8 = vweird.f32 %v620_v28 }
  0xca   : > { %v384_v34 = vsel %vm381_vm5, %v383_v29, %v379_v31  ;;  %v394_v35 = vsel %vm393_vm6, %v616_v14, %v390_v30  ;;  %vm408_vm10 = vmor %vm406_vm9, %vm407_vm8 }
  0xcb   : > { %v622_v36 = vpop.eup %621  ;;  %v431_v37 = vmul.f32 %v384_v34, %v351_v59  ;;  %v399_v38 = vsel %vm396_vm7, %v398_v32, %v394_v35  ;;  %v403_v39 = vsub.f32 1.0, %v402_v33 }
  0xcc   : > { %v432_v40 = vmul.f32 %v399_v38, %v352_v60  ;;  %v417_v42 = vmul.f32 %v622_v36, %v370_v19  ;;  %vm422_vm11 = vweird.f32 %v622_v36 }
  0xcd   : > { %v404_v43 = vmul.f32 %v620_v28, %v403_v39  ;;  %vm423_vm14 = vmor %vm421_vm13, %vm422_vm11 }
  0xce   : > { %v435_v45 = vpack.c.bf16 %v432_v40, %v431_v37  ;;  %v418_v46 = vsub.f32 1.0, %v417_v42 }
  0xcf   : > { %v405_v47 = vadd.f32 %v620_v28, %v404_v43 }
  0xd0   : > { %437 = vst [vmem:[%s201_s20] sm:$0xff] %v435_v45  ;;  %v419_v50 = vmul.f32 %v622_v36, %v418_v46 }
  0xd1   : > { %v409_v52 = vsel %vm408_vm10, %v620_v28, %v405_v47 }
  0xd2   : > { %v414_v53 = vsel %vm411_vm12, %v413_v49, %v409_v52  ;;  %v420_v54 = vadd.f32 %v622_v36, %v419_v50 }
  0xd3   : > { %v433_v56 = vmul.f32 %v414_v53, %v774_v3 }
  0xd4   : > { %v424_v57 = vsel %vm423_vm14, %v622_v36, %v420_v54 }
  0xd5   : > { %v429_v58 = vsel %vm426_vm15, %v428_v55, %v424_v57 }
  0xd6   : > { %v434_v59 = vmul.f32 %v429_v58, %v776_v4 }
  0xd8   : > { %v436_v60 = vpack.c.bf16 %v434_v59, %v433_v56 }
  0xda   : > { %438 = vst [vmem:[%s201_s20 + $0x8] sm:$0xff] %v436_v60 }
  0xdb PF: > { %s14_s15 = sadd.s32 1, %s629_s15  }
  0xdc   : > { %p11_p4 = scmp.ge.s32.totalorder %s14_s15, 4  }
  0xde   :  { %13 = sbr.rel (!%p11_p4) target bundleno = 1 (0x1), region = 66 }

// kernel: _forward_impl.19
= control target key start
LH: loop header
LB: loop body
LE: loop exit
PB: predicated region body
PF: predicated region fallthrough
CT: control target
= control target key end

     0   :  { %s221_s1 = inlined_call_operand.vmem [shape: bf16[128,128], index: 1, kind: input, shape index: {}]   ;;  %s222_s0 = inlined_call_operand.vmem [shape: bf16[8,128], index: 0, kind: input, shape index: {}]   ;;  %s223_s2 = inlined_call_operand.vmem [shape: bf16[8,128], index: 2, kind: output, shape index: {0}]   ;;  %s224_s3 = inlined_call_operand.vmem [shape: bf16[8,128], index: 3, kind: output, shape index: {1}]  }
   0x1   :  { %v163_v0 = vld [vmem:[%s221_s1 + $0x38] sm:$0xff]  ;;  %v162_v1 = vld [vmem:[%s221_s1 + $0x30] sm:$0xff]  ;;  %v161_v2 = vld [vmem:[%s221_s1 + $0x28] sm:$0xff] }
   0x2   :  { %78 = vmatpush.bf16.msra.mxu0 %v163_v0  ;;  %v160_v3 = vld [vmem:[%s221_s1 + $0x20] sm:$0xff]  ;;  %v159_v4 = vld [vmem:[%s221_s1 + $0x18] sm:$0xff]  ;;  %v158_v5 = vld [vmem:[%s221_s1 + $0x10] sm:$0xff] }
   0x3   :  { %v157_v6 = vld [vmem:[%s221_s1 + $0x8] sm:$0xff]  ;;  %v156_v7 = vld [vmem:[%s221_s1] sm:$0xff] }
   0x4   :  { %v13_v8 = vld [vmem:[%s222_s0] sm:$0xf] }
   0x6   :  { %79 = vmatpush.bf16.msra.mxu0 %v162_v1 }
   0xa   :  { %80 = vmatpush.bf16.msra.mxu0 %v161_v2 }
   0xe   :  { %81 = vmatpush.bf16.msra.mxu0 %v160_v3 }
  0x12   :  { %82 = vmatpush.bf16.msra.mxu0 %v159_v4 }
  0x16   :  { %83 = vmatpush.bf16.msra.mxu0 %v158_v5 }
  0x1a   :  { %84 = vmatpush.bf16.msra.mxu0 %v157_v6 }
  0x1e   :  { %85 = vmatpush.bf16.msra.mxu0 %v156_v7 }
  0x21   :  { %86 = vmatmul.bf16.vlgmr.msra.gmra.mxu0 %v13_v8 }
  0x9e   :  { %v87_v9 = vpop.f32.mrf.mxu0 }
  0x9f   :  { %v91_v10 = vpack.c.bf16 %v87_v9, %v87_v9  ;;  %v155_v11 = vmul.f32 -1.442695, %v87_v9 }
  0xa1   :  { %92 = vst [vmem:[%s223_s2] sm:$0xf] %v91_v10  ;;  %164 = vpow2.f32 %v155_v11 }
  0xa6   :  { %v89_v12 = vpop.f32.mrf.mxu0 }
  0xa7   :  { %v165_v13 = vpop.eup %164 }
  0xa8   :  { %v96_v14 = vadd.f32 1.0, %v165_v13 }
  0xaa   :  { %166 = vrcp.f32 %v96_v14  ;;  %v108_v18 = vand.u32 2147483648, %v96_v14  ;;  %v106_v20 = vand.u32 2147483647, %v96_v14  ;;  %vm102_vm1 = vweird.f32 %v96_v14 }
  0xac   :  { %v109_v22 = vor.u32 1.1754944e-38, %v108_v18  ;;  %vm107_vm3 = vcmp.eq.f32.partialorder %v106_v20, 8.507059e+37 }
  0xb0   :  { %v167_v15 = vpop.eup %166 }
  0xb1   :  { %v98_v16 = vmul.f32 %v167_v15, %v96_v14  ;;  %vm103_vm0 = vweird.f32 %v167_v15 }
  0xb2   :  { %vm104_vm2 = vmor %vm102_vm1, %vm103_vm0 }
  0xb3   :  { %v99_v17 = vsub.f32 1.0, %v98_v16 }
  0xb5   :  { %v100_v19 = vmul.f32 %v167_v15, %v99_v17 }
  0xb7   :  { %v101_v21 = vadd.f32 %v167_v15, %v100_v19 }
  0xb9   :  { %v105_v23 = vsel %vm104_vm2, %v167_v15, %v101_v21 }
  0xba   :  { %v110_v24 = vsel %vm107_vm3, %v109_v22, %v105_v23 }
  0xbb   :  { %v112_v25 = vmul.f32 %v110_v24, %v87_v9 }
  0xbd   :  { %v113_v26 = vpack.c.bf16 %v112_v25, %v112_v25 }
  0xbf   :  { %114 = vst [vmem:[%s224_s3] sm:$0xf] %v113_v26 }

// kernel: _forward_impl.17
= control target key start
LH: loop header
LB: loop body
LE: loop exit
PB: predicated region body
PF: predicated region fallthrough
CT: control target
= control target key end

     0   :  { %s576_s15 = smov 0   ;;  %s642_s0 = inlined_call_operand.vmem [shape: bf16[2,3,3,1024], index: 0, kind: input, shape index: {}]   ;;  %s643_s1 = inlined_call_operand.vmem [shape: bf16[9,256], index: 1, kind: input, shape index: {}]   ;;  %s644_s2 = inlined_call_operand.vmem [shape: f32[1,256], index: 2, kind: input, shape index: {}]   ;;  %s645_s3 = inlined_call_operand.vmem [shape: f32[1,256], index: 3, kind: input, shape index: {}]   ;;  %s646_s4 = inlined_call_operand.vmem [shape: bf16[2,2,2,256], index: 4, kind: output, shape index: {}]  }
   0x1 LB: > { %s509_s16 = sadd.s32 4294967295, %s549_s15   ;;  %p513_p0 = scmp.ge.s32.totalorder %s549_s15, 1  ;;  %s549_s15 = sphi %s576_s15, %s14_s15  }
   0x2   : > { %p162_p1 = scmp.lt.s32.totalorder %s549_s15, 3 }
   0x4   : > { %p163_p2 = pnand %p513_p0, %p162_p1 }
   0x5   : > { %p187_p3 = scmp.lt.s32.totalorder (!%p163_p2), %s509_s16, 1 }
   0x6   : > { %166 = sbr.rel (%p163_p2) target bundleno = 97 (0x61), region = 36 }
   0xb   : > { %v203_v0 = vld [vmem:[%s643_s1] sm:$0x11]  ;;  %v237_v1 = vld [vmem:[%s643_s1] sm:$0x22]  ;;  %v281_v6 = vld [vmem:[%s643_s1] sm:$0x44] }
   0xc   : > { %v204_v2 = vunpack.c.l.bf16 %v203_v0  ;;  %v205_v3 = vunpack.c.h.bf16 %v203_v0  ;;  %v238_v4 = vunpack.c.l.bf16 %v237_v1  ;;  %v239_v5 = vunpack.c.h.bf16 %v237_v1  ;;  %s648_s16 = smov (!%p187_p3, %s509_s16), 1  ;;  %v316_v11 = vld [vmem:[%s643_s1] sm:$0x88]  ;;  %v345_v55 = vld [vmem:[%s643_s1 + $0x8] sm:$0x11] }
   0xd   : > { %vm211_vm0 = vcmask 1043456   ;;  %v283_v10 = vunpack.c.h.bf16 %v281_v6  ;;  %s526_s25 = smul.u32 48, %s648_s16  ;;  %v282_v15 = vunpack.c.l.bf16 %v281_v6  ;;  %v317_v22 = vunpack.c.l.bf16 %v316_v11  ;;  %s515_s9 = sshll.u32 %s648_s16, 2 }
   0xe   : > { %v206_v7 = vperm.slane %v204_v2, 0  ;;  %v207_v8 = vperm.slane %v205_v3, 0  ;;  %v227_v9 = vperm.slane %v205_v3, 1  ;;  %v226_v12 = vperm.slane %v204_v2, 1  ;;  %v368_v3 = vld [vmem:[%s644_s2] sm:$0x3]  ;;  %s195_s12 = scalar_lea.vmem %s646_s4, %s515_s9 }
   0xf   : > { %v241_v13 = vperm.slane %v239_v5, 2  ;;  %v263_v14 = vperm.slane %v239_v5, 3  ;;  %v240_v18 = vperm.slane %v238_v4, 2  ;;  %v285_v19 = vperm.slane %v283_v10, 4  ;;  %s602_s28 = scalar_lea.vmem %s642_s0, %s526_s25 }
  0x10   : > { %v210_v16 = vrot.slane %v207_v8, 4  ;;  %v230_v17 = vrot.slane %v227_v9, 4  ;;  %v262_v21 = vperm.slane %v238_v4, 3  ;;  %v318_v23 = vunpack.c.h.bf16 %v316_v11  ;;  %v196_v24 = vld [vmem:[%s602_s28] sm:$0xff]  ;;  %v197_v25 = vld [vmem:[%s602_s28 + $0x8] sm:$0xff]  ;;  %v198_v26 = vld [vmem:[%s602_s28 + $0x10] sm:$0xff] }
  0x11   : > { %v244_v20 = vrot.slane %v241_v13, 4  ;;  %v266_v28 = vrot.slane %v263_v14, 4  ;;  %v284_v29 = vperm.slane %v282_v15, 4  ;;  %v296_v30 = vperm.slane %v283_v10, 5 }
  0x12   : > { %v212_v27 = vsel %vm211_vm0, %v206_v7, %v210_v16  ;;  %v201_v31 = vunpack.c.l.bf16 %v196_v24  ;;  %v608_v32 = vunpack.c.l.bf16 %v198_v26  ;;  %v220_v33 = vrot.slane %v196_v24, 4  ;;  %v199_v7 = vld [vmem:[%s602_s28 + $0x18] sm:$0xff]  ;;  %v200_v24 = vld [vmem:[%s602_s28 + $0x20] sm:$0xff] }
  0x13   : > { %v221_v34 = vrot.slane %v198_v26, 4  ;;  %v231_v35 = vsel %vm211_vm0, %v226_v12, %v230_v17  ;;  %v245_v36 = vsel %vm211_vm0, %v240_v18, %v244_v20  ;;  %v275_v37 = vrot.slane %v197_v25, 4  ;;  %v377_v12 = vld [vmem:[%s645_s3] sm:$0x3] }
  0x14   : > { %v288_v38 = vrot.slane %v285_v19, 4  ;;  %v214_v39 = vmul.f32 %v212_v27, %v201_v31  ;;  %v224_v40 = vunpack.c.l.bf16 %v220_v33  ;;  %v295_v42 = vperm.slane %v282_v15, 5 }
  0x15   : > { %v225_v41 = vunpack.c.l.bf16 %v221_v34  ;;  %v246_v43 = vrot.slane %v245_v36, 7  ;;  %v260_v44 = vunpack.c.l.bf16 %v197_v25  ;;  %v267_v45 = vsel %vm211_vm0, %v262_v21, %v266_v28 }
  0x16   : > { %v319_v46 = vperm.slane %v317_v22, 6  ;;  %v215_v47 = vmul.f32 %v212_v27, %v608_v32  ;;  %v233_v48 = vmul.f32 %v231_v35, %v224_v40  ;;  %v299_v49 = vrot.slane %v296_v30, 4 }
  0x17   : > { %v320_v50 = vperm.slane %v318_v23, 6  ;;  %v248_v51 = vmul.f32 %v246_v43, %v201_v31  ;;  %v279_v52 = vunpack.c.l.bf16 %v275_v37  ;;  %v289_v53 = vsel %vm211_vm0, %v284_v29, %v288_v38 }
  0x18   : > { %v335_v54 = vperm.slane %v318_v23, 7  ;;  %v234_v56 = vmul.f32 %v231_v35, %v225_v41  ;;  %v235_v57 = vadd.f32 %v233_v48, %v214_v39  ;;  %v300_v58 = vsel %vm211_vm0, %v295_v42, %v299_v49 }
  0x19   : > { %v323_v59 = vrot.slane %v320_v50, 4  ;;  %v516_v60 = vrot.slane %v248_v51, 9  ;;  %v269_v61 = vmul.f32 %v267_v45, %v260_v44  ;;  %v301_v62 = vrot.slane %v300_v58, 7 }
  0x1a   : > { %v346_v63 = vunpack.c.l.bf16 %v345_v55  ;;  %v334_v0 = vperm.slane %v317_v22, 7  ;;  %v338_v1 = vrot.slane %v335_v54, 4  ;;  %v347_v2 = vunpack.c.h.bf16 %v345_v55 }
  0x1b   : > { %v258_v4 = vadd.f32 %v516_v60, %v235_v57  ;;  %v291_v5 = vmul.f32 %v289_v53, %v279_v52  ;;  %v303_v6 = vmul.f32 %v301_v62, %v260_v44  ;;  %v236_v8 = vadd.f32 %v234_v56, %v215_v47 }
  0x1c   : > { %v324_v9 = vsel %vm211_vm0, %v319_v46, %v323_v59  ;;  %v348_v10 = vperm.slane %v346_v63, 0  ;;  %v349_v11 = vperm.slane %v347_v2, 0  ;;  %v370_v15 = vperm.slane %v368_v3, 0 }
  0x1d   : > { %v271_v13 = vadd.f32 %v269_v61, %v258_v4  ;;  %v518_v14 = vrot.slane %v303_v6, 9  ;;  %v371_v16 = vperm.slane %v368_v3, 1  ;;  %v339_v17 = vsel %vm211_vm0, %v334_v0, %v338_v1 }
  0x1e   : > { %v352_v18 = vrot.slane %v349_v11, 4  ;;  %v249_v19 = vmul.f32 %v246_v43, %v608_v32  ;;  %v261_v20 = vunpack.c.l.bf16 %v199_v7  ;;  %v326_v22 = vmul.f32 %v324_v9, %v608_v32 }
  0x1f   : > { %v293_v21 = vadd.f32 %v291_v5, %v271_v13  ;;  %v380_v23 = vperm.slane %v377_v12, 1  ;;  %v276_v25 = vrot.slane %v199_v7, 4  ;;  %v341_v31 = vmul.f32 %v339_v17, %v225_v41 }
  0x20   : > { %v353_v26 = vsel %vm211_vm0, %v348_v10, %v352_v18  ;;  %v517_v27 = vrot.slane %v249_v19, 9  ;;  %v270_v28 = vmul.f32 %v267_v45, %v261_v20  ;;  %v304_v29 = vmul.f32 %v301_v62, %v261_v20 }
  0x21   : > { %v313_v30 = vadd.f32 %v518_v14, %v293_v21  ;;  %v354_v33 = vrot.slane %v353_v26, 7  ;;  %v280_v34 = vunpack.c.l.bf16 %v276_v25  ;;  %v372_v35 = vrot.slane %v371_v16, 4 }
  0x22   : > { %v259_v36 = vadd.f32 %v517_v27, %v236_v8  ;;  %v315_v37 = vunpack.c.l.bf16 %v200_v24  ;;  %v331_v38 = vrot.slane %v200_v24, 4  ;;  %v379_v42 = vperm.slane %v377_v12, 0 }
  0x23   : > { %v328_v39 = vadd.f32 %v326_v22, %v313_v30  ;;  %v356_v40 = vmul.f32 %v354_v33, %v608_v32  ;;  %v292_v43 = vmul.f32 %v289_v53, %v280_v34  ;;  %v381_v44 = vrot.slane %v380_v23, 4 }
  0x24   : > { %v272_v46 = vadd.f32 %v270_v28, %v259_v36  ;;  %v519_v47 = vrot.slane %v304_v29, 9  ;;  %v333_v48 = vunpack.c.l.bf16 %v331_v38  ;;  %v373_v50 = vsel %vm211_vm0, %v370_v15, %v372_v35 }
  0x25   : > { %v343_v49 = vadd.f32 %v341_v31, %v328_v39  ;;  %v520_v45 = vrot.slane %v356_v40, 9  ;;  %v327_v51 = vmul.f32 %v324_v9, %v315_v37  ;;  %v357_v52 = vmul.f32 %v354_v33, %v315_v37 }
  0x26   : > { %v294_v41 = vadd.f32 %v292_v43, %v272_v46  ;;  %v382_v55 = vsel %vm211_vm0, %v379_v42, %v381_v44  ;;  %v342_v57 = vmul.f32 %v339_v17, %v333_v48  ;;  %vm445_vm9 = vcmask 1040384  }
  0x27   : > { %v366_v54 = vadd.f32 %v520_v45, %v343_v49  ;;  %v521_v59 = vrot.slane %v357_v52, 9 }
  0x28   : > { %v314_v56 = vadd.f32 %v519_v47, %v294_v41 }
  0x29   : > { %v375_v58 = vmul.f32 %v373_v50, %v366_v54 }
  0x2a   : > { %v329_v32 = vadd.f32 %v327_v51, %v314_v56 }
  0x2b   : > { %v384_v53 = vadd.f32 %v382_v55, %v375_v58 }
  0x2c   : > { %v344_v60 = vadd.f32 %v342_v57, %v329_v32 }
  0x2d   : > { %v522_v61 = vmul.f32 -1.442695, %v384_v53 }
  0x2e   : > { %v367_v62 = vadd.f32 %v521_v59, %v344_v60 }
  0x2f   : > { %535 = vpow2.f32 %v522_v61 }
  0x30   : > { %v376_v63 = vmul.f32 %v373_v50, %v367_v62 }
  0x32   : > { %v385_v0 = vadd.f32 %v382_v55, %v376_v63 }
  0x34   : > { %v523_v1 = vmul.f32 -1.442695, %v385_v0 }
  0x35   : > { %v536_v2 = vpop.eup %535 }
  0x36   : > { %v392_v3 = vadd.f32 1.0, %v536_v2  ;;  %537 = vpow2.f32 %v523_v1 }
  0x38   : > { %539 = vrcp.f32 %v392_v3  ;;  %v405_v8 = vand.u32 2147483648, %v392_v3  ;;  %vm399_vm1 = vweird.f32 %v392_v3  ;;  %v403_v10 = vand.u32 2147483647, %v392_v3 }
  0x3a   : > { %v406_v12 = vor.u32 1.1754944e-38, %v405_v8  ;;  %vm404_vm4 = vcmp.eq.f32.partialorder %v403_v10, 8.507059e+37 }
  0x3c   : > { %v538_v4 = vpop.eup %537 }
  0x3d   : > { %v393_v5 = vadd.f32 1.0, %v538_v4 }
  0x3e   : > { %v540_v6 = vpop.eup %539 }
  0x3f   : > { %v395_v7 = vmul.f32 %v540_v6, %v392_v3  ;;  %541 = vrcp.f32 %v393_v5  ;;  %vm400_vm2 = vweird.f32 %v540_v6  ;;  %vm414_vm5 = vweird.f32 %v393_v5 }
  0x40   : > { %vm401_vm3 = vmor %vm399_vm1, %vm400_vm2  ;;  %v420_v17 = vand.u32 2147483648, %v393_v5  ;;  %v418_v20 = vand.u32 2147483647, %v393_v5 }
  0x41   : > { %v396_v9 = vsub.f32 1.0, %v395_v7 }
  0x42   : > { %v421_v23 = vor.u32 1.1754944e-38, %v420_v17  ;;  %vm419_vm8 = vcmp.eq.f32.partialorder %v418_v20, 8.507059e+37 }
  0x43   : > { %v397_v11 = vmul.f32 %v540_v6, %v396_v9 }
  0x45   : > { %v542_v13 = vpop.eup %541  ;;  %v398_v14 = vadd.f32 %v540_v6, %v397_v11 }
  0x46   : > { %v410_v15 = vmul.f32 %v542_v13, %v393_v5  ;;  %vm415_vm6 = vweird.f32 %v542_v13 }
  0x47   : > { %v402_v16 = vsel %vm401_vm3, %v540_v6, %v398_v14  ;;  %vm416_vm7 = vmor %vm414_vm5, %vm415_vm6 }
  0x48   : > { %v407_v18 = vsel %vm404_vm4, %v406_v12, %v402_v16  ;;  %v411_v19 = vsub.f32 1.0, %v410_v15 }
  0x49   : > { %v424_v21 = vmul.f32 %v407_v18, %v384_v53 }
  0x4a   : > { %v412_v22 = vmul.f32 %v542_v13, %v411_v19 }
  0x4b   : > { %428 = vst [vmem:[#allocation1] ss:$2 sm:$0xff] %v424_v21 }
  0x4c   : > { %v413_v24 = vadd.f32 %v542_v13, %v412_v22 }
  0x4e   : > { %v417_v25 = vsel %vm416_vm7, %v542_v13, %v413_v24 }
  0x4f   : > { %v422_v26 = vsel %vm419_vm8, %v421_v23, %v417_v25 }
  0x50   : > { %v425_v27 = vmul.f32 %v422_v26, %v385_v0 }
  0x52   : > { %432 = vst [vmem:[#allocation1 + $0x10] ss:$2 sm:$0xff] %v425_v27  ;;  %v429_v28 = vld.sshfl [vmem:[#allocation1] sm:$0xff pattern:$0x75316420] }
  0x53   : > { %v430_v29 = vld.sshfl [vmem:[#allocation1 + $0x8] sm:$0xff pattern:$0x75316420] }
  0x54   : > { %v439_v30 = vpack.c.bf16 %v430_v29, %v429_v28 }
  0x56   : > { %v443_v31 = vrot.slane %v439_v30, 3 }
  0x58   : > { %v448_v33 = vsel %vm445_vm9, %v439_v30, %v443_v31 }
  0x59   : > { %454 = vst [vmem:[%s195_s12] sm:$0x3] %v448_v33  ;;  %v433_v34 = vld.sshfl [vmem:[#allocation1 + $0x10] sm:$0xff pattern:$0x75316420] }
  0x5a   : > { %v434_v35 = vld.sshfl [vmem:[#allocation1 + $0x18] sm:$0xff pattern:$0x75316420] }
  0x5b   : > { %v440_v36 = vpack.c.bf16 %v434_v35, %v433_v34 }
  0x5d   : > { %v444_v37 = vrot.slane %v440_v36, 3 }
  0x5f   : > { %v451_v38 = vsel %vm445_vm9, %v440_v36, %v444_v37 }
  0x60   : > { %455 = vst [vmem:[%s195_s12 + $0x2] sm:$0x3] %v451_v38 }
  0x61 PF: > { %s14_s15 = sadd.s32 1, %s549_s15  }
  0x62   : > { %p11_p4 = scmp.ge.s32.totalorder %s14_s15, 4  }
  0x64   :  { %13 = sbr.rel (!%p11_p4) target bundleno = 1 (0x1), region = 67 }

// kernel: _forward_impl.18
= control target key start
LH: loop header
LB: loop body
LE: loop exit
PB: predicated region body
PF: predicated region fallthrough
CT: control target
= control target key end

     0   :  { %s362_s1 = inlined_call_operand.vmem [shape: bf16[256,128], index: 1, kind: input, shape index: {}]   ;;  %s363_s0 = inlined_call_operand.vmem [shape: bf16[8,256], index: 0, kind: input, shape index: {}]   ;;  %s364_s2 = inlined_call_operand.vmem [shape: f32[1,128], index: 2, kind: input, shape index: {}]   ;;  %s365_s3 = inlined_call_operand.vmem [shape: f32[1,128], index: 3, kind: input, shape index: {}]   ;;  %s366_s4 = inlined_call_operand.vmem [shape: bf16[8,128], index: 4, kind: output, shape index: {}]  }
   0x1   :  { %v266_v0 = vld [vmem:[%s362_s1 + $0x38] sm:$0xff]  ;;  %v265_v2 = vld [vmem:[%s362_s1 + $0x30] sm:$0xff]  ;;  %v264_v4 = vld [vmem:[%s362_s1 + $0x28] sm:$0xff] }
   0x2   :  { %v274_v1 = vld [vmem:[%s362_s1 + $0x78] sm:$0xff]  ;;  %153 = vmatpush.bf16.msra.mxu0 %v266_v0  ;;  %v273_v3 = vld [vmem:[%s362_s1 + $0x70] sm:$0xff]  ;;  %v272_v5 = vld [vmem:[%s362_s1 + $0x68] sm:$0xff] }
   0x3   :  { %166 = vmatpush.bf16.msra.mxu1 %v274_v1  ;;  %v263_v6 = vld [vmem:[%s362_s1 + $0x20] sm:$0xff]  ;;  %v262_v8 = vld [vmem:[%s362_s1 + $0x18] sm:$0xff]  ;;  %v261_v10 = vld [vmem:[%s362_s1 + $0x10] sm:$0xff] }
   0x4   :  { %v271_v7 = vld [vmem:[%s362_s1 + $0x60] sm:$0xff]  ;;  %v270_v9 = vld [vmem:[%s362_s1 + $0x58] sm:$0xff]  ;;  %v269_v11 = vld [vmem:[%s362_s1 + $0x50] sm:$0xff] }
   0x5   :  { %v260_v12 = vld [vmem:[%s362_s1 + $0x8] sm:$0xff]  ;;  %v17_v14 = vld [vmem:[%s363_s0] sm:$0xff] }
   0x6   :  { %154 = vmatpush.bf16.msra.mxu0 %v265_v2  ;;  %v268_v13 = vld [vmem:[%s362_s1 + $0x48] sm:$0xff]  ;;  %v51_v15 = vunpack.c.l.b16 %v17_v14  ;;  %v52_v16 = vunpack.c.h.b16 %v17_v14  ;;  %v259_v17 = vld [vmem:[%s362_s1] sm:$0xff] }
   0x7   :  { %167 = vmatpush.bf16.msra.mxu1 %v273_v3  ;;  %v267_v18 = vld [vmem:[%s362_s1 + $0x40] sm:$0xff] }
   0x8   :  { %v53_v19 = vpack.c.b16 %v51_v15, %v51_v15  ;;  %v54_v20 = vpack.c.b16 %v52_v16, %v52_v16  ;;  %v275_v21 = vld [vmem:[%s364_s2] ss:$0 sm:$0xff] }
   0x9   :  { %v276_v25 = vld [vmem:[%s365_s3] ss:$0 sm:$0xff] }
   0xa   :  { %155 = vmatpush.bf16.msra.mxu0 %v264_v4 }
   0xb   :  { %168 = vmatpush.bf16.msra.mxu1 %v272_v5 }
   0xe   :  { %156 = vmatpush.bf16.msra.mxu0 %v263_v6 }
   0xf   :  { %169 = vmatpush.bf16.msra.mxu1 %v271_v7 }
  0x12   :  { %157 = vmatpush.bf16.msra.mxu0 %v262_v8 }
  0x13   :  { %170 = vmatpush.bf16.msra.mxu1 %v270_v9 }
  0x16   :  { %158 = vmatpush.bf16.msra.mxu0 %v261_v10 }
  0x17   :  { %171 = vmatpush.bf16.msra.mxu1 %v269_v11 }
  0x1a   :  { %159 = vmatpush.bf16.msra.mxu0 %v260_v12 }
  0x1b   :  { %172 = vmatpush.bf16.msra.mxu1 %v268_v13 }
  0x1e   :  { %160 = vmatpush.bf16.msra.mxu0 %v259_v17 }
  0x1f   :  { %173 = vmatpush.bf16.msra.mxu1 %v267_v18 }
  0x21   :  { %161 = vmatmul.bf16.vlgmr.msra.gmra.mxu0 %v53_v19 }
  0x22   :  { %174 = vmatmul.bf16.vlgmr.msra.gmra.mxu1 %v54_v20 }
  0x9e   :  { %v162_v22 = vpop.f32.mrf.mxu0 }
  0x9f   :  { %v175_v23 = vpop.f32.mrf.mxu1 }
  0xa0   :  { %v176_v24 = vadd.f32 %v175_v23, %v162_v22 }
  0xa2   :  { %v183_v26 = vmul.f32 %v275_v21, %v176_v24 }
  0xa4   :  { %v188_v27 = vadd.f32 %v276_v25, %v183_v26 }
  0xa6   :  { %v189_v28 = vpack.c.bf16 %v188_v27, %v188_v27  ;;  %v164_v29 = vpop.f32.mrf.mxu0 }
  0xa7   :  { %v177_v30 = vpop.f32.mrf.mxu1 }
  0xa8   :  { %190 = vst [vmem:[%s366_s4] sm:$0xf] %v189_v28 }

</bundles_post_ra>
